<compile_context>
chip_gen: v7x
topology: tpu7x:2x2x1
jax: 0.10.0
libtpu: 0.0.40
codegen_flags: <defaults>
</compile_context>

<pallas_src>
import functools
import math

import jax
import jax.numpy as jnp
from jax import lax
from jax.experimental import pallas as pl
from jax.experimental.pallas import tpu as pltpu

_LANE = 128
_BN_EPS = 1e-5


def _round_up(x, m):
    return (x + m - 1) // m * m


def _vmem_limit_bytes():
    """Generation-aware scoped-VMEM budget (3/4 of physical, capped at 100 MiB)."""
    cap = 0
    try:
        get_info = getattr(pltpu, "get_tpu_info", None)
        if get_info is not None:
            cap = int(getattr(get_info(), "vmem_capacity_bytes", 0) or 0)
    except Exception:
        cap = 0
    if cap <= 0:
        cap = 64 * 1024 * 1024          # conservative fallback: v7x per-core VMEM
    return min(cap * 3 // 4, 100 * 1024 * 1024)


def _pick_row_tile(H, W, Cp, vmem_limit):
    """Largest divisor of H whose (halo'd, lane-padded) f32 tile fits the budget."""
    lane_c = max(_round_up(Cp, _LANE), _LANE)
    max_tile_bytes = max(vmem_limit // 16, 1 << 20)
    best = 1
    for th in range(1, H + 1):
        if H % th == 0 and (th + 2) * (W + 2) * lane_c * 4 <= max_tile_bytes:
            best = th
    return best


# ---------------------------------------------------------------------------
# Kernel helpers
# ---------------------------------------------------------------------------

def _conv_rows(slab, w_ref, b_ref, nrows, W, Cin, Cp):
    """conv3x3 + bias for `nrows` output rows from a bf16 slab [nrows+2, >=W+2, Cin].

    Nine small accumulated MXU dots (one per tap) -> f32 [nrows, W, Cp]."""
    acc = jnp.zeros((nrows * W, Cp), jnp.float32)
    for k in range(9):
        ky, kx = divmod(k, 3)
        patch = slab[ky:ky + nrows, kx:kx + W, :].reshape(nrows * W, Cin)
        acc = acc + jnp.dot(patch, w_ref[k], preferred_element_type=jnp.float32)
    acc = acc + b_ref[...].astype(jnp.float32)
    return acc.reshape(nrows, W, Cp)


def _depthwise9(pad_ref, dw_ref, th, W, Cp):
    """Depthwise 3x3 over an already-filled [th+2, W+2, Cp] f32 scratch."""
    acc = jnp.zeros((th, W, Cp), jnp.float32)
    for k in range(9):
        ky, kx = divmod(k, 3)
        tap = dw_ref[k:k + 1, :].reshape(1, 1, Cp)
        acc = acc + pad_ref[ky:ky + th, kx:kx + W, :] * tap
    return acc


def _zero_ring_cols(pad_ref, th, W, Cp):
    """Zero only the always-zero left/right halo columns (covers the corners)."""
    zcol = jnp.zeros((th + 2, 1, Cp), jnp.float32)
    pad_ref[:, 0:1, :] = zcol
    pad_ref[:, W + 1:W + 2, :] = zcol


# ---------------------------------------------------------------------------
# Kernels
# ---------------------------------------------------------------------------

def _conv3x3_elu_kernel(xp_ref, w_ref, b_ref, o_ref, *, th):
    # xp_ref: [H+2, W+2, Cin] bf16 reflection-padded input (per-batch resident)
    # w_ref : [9, Cin, Cp] bf16 taps; b_ref: [1, Cp] f32; o_ref: [th, W, Cp] f32
    r = pl.program_id(1)
    _, W, Cp = o_ref.shape
    Cin = xp_ref.shape[-1]
    row0 = pl.multiple_of(r * th, th)

    slab = xp_ref[pl.ds(row0, th + 2), :, :]
    acc = _conv_rows(slab, w_ref, b_ref, th, W, Cin, Cp)
    acc = jnp.where(acc > 0.0, acc, jnp.expm1(acc))        # fused ELU(alpha=1)
    o_ref[...] = acc.astype(o_ref.dtype)


def _conv3x3_frelu_kernel(xp_ref, w_ref, b_ref, dw_ref, o_ref, stats_ref, ext_ref, *, th):
    # Fused pass: conv3x3+bias row tile -> bf16 conv_out, plus depthwise 3x3 on the
    # tile (1 recomputed halo conv row above/below) and per-batch BN stat partials.
    # o_ref    : [th, W, Cp] bf16 conv output tile
    # stats_ref: [2, Cp] f32 per-batch (sum, sum_sq) of the depthwise conv
    # ext_ref  : [th+2, W+2, Cp] f32 scratch (conv rows + zero halo)
    r = pl.program_id(1)
    nr = pl.num_programs(1)
    _, W, Cp = o_ref.shape
    Cin = xp_ref.shape[-1]
    row0 = pl.multiple_of(r * th, th)

    # Centre conv rows (the tile's own output).
    slab = xp_ref[pl.ds(row0, th + 2), :, :]
    center = _conv_rows(slab, w_ref, b_ref, th, W, Cin, Cp)     # f32 [th, W, Cp]
    o_ref[...] = center.astype(o_ref.dtype)                    # bf16 intermediate

    # Fill the halo scratch: ring columns, centre, and the two halo rows.
    _zero_ring_cols(ext_ref, th, W, Cp)
    ext_ref[1:th + 1, 1:W + 1, :] = center

    zrow = jnp.zeros((1, W, Cp), jnp.float32)
    ext_ref[0:1, 1:W + 1, :] = zrow                 # image top edge -> zero pad

    @pl.when(r > 0)
    def _():                                        # recompute conv row row0-1
        slab_t = xp_ref[pl.ds(row0 - 1, 3), :, :]
        ext_ref[0:1, 1:W + 1, :] = _conv_rows(slab_t, w_ref, b_ref, 1, W, Cin, Cp)

    ext_ref[th + 1:th + 2, 1:W + 1, :] = zrow       # image bottom edge -> zero pad

    @pl.when(r < nr - 1)
    def _():                                        # recompute conv row row0+th
        slab_b = xp_ref[pl.ds(row0 + th, 3), :, :]
        ext_ref[th + 1:th + 2, 1:W + 1, :] = _conv_rows(slab_b, w_ref, b_ref, 1, W, Cin, Cp)

    # Depthwise 3x3 of the conv output; accumulate per-batch sum / sum-of-squares.
    funnel = _depthwise9(ext_ref, dw_ref, th, W, Cp)
    flat = funnel.reshape(th * W, Cp)

    @pl.when(r == 0)
    def _():
        stats_ref[...] = jnp.zeros_like(stats_ref)

    stats_ref[0:1, :] = stats_ref[0:1, :] + jnp.sum(flat, axis=0, keepdims=True)
    stats_ref[1:2, :] = stats_ref[1:2, :] + jnp.sum(flat * flat, axis=0, keepdims=True)


def _frelu_apply_kernel(x_ref, dw_ref, scale_ref, shift_ref, o_ref, pad_ref, *, th):
    # Pass 2: recompute the depthwise conv of the bf16 conv_out, apply BatchNorm with
    # the precomputed (scale, shift) and take max(x, funnel).
    # x_ref: [H, W, Cp] bf16 (per-batch resident); o_ref: [th, W, Cp] f32
    r = pl.program_id(1)
    nr = pl.num_programs(1)
    _, W, Cp = o_ref.shape
    row0 = pl.multiple_of(r * th, th)

    _zero_ring_cols(pad_ref, th, W, Cp)
    pad_ref[1:th + 1, 1:W + 1, :] = x_ref[pl.ds(row0, th), :, :].astype(jnp.float32)

    zrow = jnp.zeros((1, W, Cp), jnp.float32)
    pad_ref[0:1, 1:W + 1, :] = zrow

    @pl.when(r > 0)
    def _():
        pad_ref[0:1, 1:W + 1, :] = x_ref[pl.ds(row0 - 1, 1), :, :].astype(jnp.float32)

    pad_ref[th + 1:th + 2, 1:W + 1, :] = zrow

    @pl.when(r < nr - 1)
    def _():
        pad_ref[th + 1:th + 2, 1:W + 1, :] = x_ref[pl.ds(row0 + th, 1), :, :].astype(jnp.float32)

    funnel = _depthwise9(pad_ref, dw_ref, th, W, Cp)
    funnel = funnel * scale_ref[...].reshape(1, 1, Cp) + shift_ref[...].reshape(1, 1, Cp)
    center = pad_ref[1:th + 1, 1:W + 1, :]
    o_ref[...] = jnp.maximum(center, funnel).astype(o_ref.dtype)


# ---------------------------------------------------------------------------
# Wrapper
# ---------------------------------------------------------------------------

def conv_block(x_nchw, params, use_frelu, row_tile=None):
    """ConvBlock forward. x_nchw: [B, Cin, H, W] (PyTorch layout). Returns NCHW f32."""
    x = jnp.transpose(x_nchw, (0, 2, 3, 1)).astype(jnp.bfloat16)   # NCHW -> NHWC, bf16
    B, H, W, Cin = x.shape
    conv_w = params["conv_w"]                                      # [Cout, Cin, 3, 3]
    Cout = conv_w.shape[0]
    # Lane-dense channel padding only pays when the padded lanes carry real data.
    Cp = Cout if Cout <= _LANE else _round_up(Cout, _LANE)
    pad_c = Cp - Cout

    # Taps laid out [tap, cin, cout]; padded cout channels (if any) are zero.
    w9 = jnp.transpose(conv_w, (2, 3, 1, 0)).reshape(9, Cin, Cout)
    if pad_c:
        w9 = jnp.pad(w9, ((0, 0), (0, 0), (0, pad_c)))
    w9 = w9.astype(jnp.bfloat16)
    bias = params["conv_b"]
    if pad_c:
        bias = jnp.pad(bias, (0, pad_c))
    bias = bias.reshape(1, Cp).astype(jnp.float32)

    # 1-px reflection pad (bf16, done once per block; boundary glue left to XLA).
    xp = jnp.pad(x, ((0, 0), (1, 1), (1, 1), (0, 0)), mode="reflect")
    Hp, Wp = H + 2, W + 2

    vmem_limit = _vmem_limit_bytes()
    th = row_tile if row_tile is not None else _pick_row_tile(H, W, Cp, vmem_limit)
    assert H % th == 0, "row_tile must divide H"
    nr = H // th

    if not use_frelu:
        out = pl.pallas_call(
            functools.partial(_conv3x3_elu_kernel, th=th),
            out_shape=jax.ShapeDtypeStruct((B, H, W, Cp), jnp.float32),
            grid=(B, nr),
            in_specs=[
                pl.BlockSpec((None, Hp, Wp, Cin), lambda b, r: (b, 0, 0, 0)),
                pl.BlockSpec((9, Cin, Cp), lambda b, r: (0, 0, 0)),
                pl.BlockSpec((1, Cp), lambda b, r: (0, 0)),
            ],
            out_specs=pl.BlockSpec((None, th, W, Cp), lambda b, r: (b, r, 0, 0)),
            compiler_params=pltpu.CompilerParams(
                dimension_semantics=("parallel", "parallel"),
                vmem_limit_bytes=vmem_limit),
        )(xp, w9, bias)
    else:
        dw9 = jnp.transpose(params["frelu_dw"][:, 0], (1, 2, 0)).reshape(9, Cout)
        if pad_c:
            dw9 = jnp.pad(dw9, ((0, 0), (0, pad_c)))
        dw9 = dw9.astype(jnp.float32)
        gamma = params["bn_gamma"]
        beta = params["bn_beta"]
        if pad_c:
            gamma = jnp.pad(gamma, (0, pad_c))
            beta = jnp.pad(beta, (0, pad_c))

        # Pass 1 (fused): conv + bias -> bf16 conv_out, plus per-batch BN stat partials.
        conv_out, stats_part = pl.pallas_call(
            functools.partial(_conv3x3_frelu_kernel, th=th),
            out_shape=(jax.ShapeDtypeStruct((B, H, W, Cp), jnp.bfloat16),
                       jax.ShapeDtypeStruct((B, 2, Cp), jnp.float32)),
            grid=(B, nr),
            in_specs=[
                pl.BlockSpec((None, Hp, Wp, Cin), lambda b, r: (b, 0, 0, 0)),
                pl.BlockSpec((9, Cin, Cp), lambda b, r: (0, 0, 0)),
                pl.BlockSpec((1, Cp), lambda b, r: (0, 0)),
                pl.BlockSpec((9, Cp), lambda b, r: (0, 0)),
            ],
            out_specs=(pl.BlockSpec((None, th, W, Cp), lambda b, r: (b, r, 0, 0)),
                       pl.BlockSpec((None, 2, Cp), lambda b, r: (b, 0, 0))),
            scratch_shapes=[pltpu.VMEM((th + 2, W + 2, Cp), jnp.float32)],
            compiler_params=pltpu.CompilerParams(
                dimension_semantics=("parallel", "arbitrary"),
                vmem_limit_bytes=vmem_limit),
        )(xp, w9, bias, dw9)

        # Tiny XLA combine: batch stats -> affine (scale, shift) for the apply pass.
        stats = jnp.sum(stats_part, axis=0)                         # [2, Cp]
        n = float(B * H * W)
        mean = stats[0] / n
        var = jnp.maximum(stats[1] / n - mean * mean, 0.0)          # biased variance
        scale = gamma.astype(jnp.float32) * lax.rsqrt(var + _BN_EPS)
        shift = beta.astype(jnp.float32) - mean * scale
        scale = scale.reshape(1, Cp)
        shift = shift.reshape(1, Cp)

        # Pass 2: recompute the depthwise conv, normalize, max(x, funnel).
        out = pl.pallas_call(
            functools.partial(_frelu_apply_kernel, th=th),
            out_shape=jax.ShapeDtypeStruct((B, H, W, Cp), jnp.float32),
            grid=(B, nr),
            in_specs=[
                pl.BlockSpec((None, H, W, Cp), lambda b, r: (b, 0, 0, 0)),
                pl.BlockSpec((9, Cp), lambda b, r: (0, 0)),
                pl.BlockSpec((1, Cp), lambda b, r: (0, 0)),
                pl.BlockSpec((1, Cp), lambda b, r: (0, 0)),
            ],
            out_specs=pl.BlockSpec((None, th, W, Cp), lambda b, r: (b, r, 0, 0)),
            scratch_shapes=[pltpu.VMEM((th + 2, W + 2, Cp), jnp.float32)],
            compiler_params=pltpu.CompilerParams(
                dimension_semantics=("parallel", "parallel"),
                vmem_limit_bytes=vmem_limit),
        )(conv_out, dw9, scale, shift)

    if pad_c:
        out = out[:, :, :, :Cout]
    return jnp.transpose(out, (0, 3, 1, 2))                         # NHWC -> NCHW


# ---------------------------------------------------------------------------
# Deterministic params, pure-JAX reference, demo
# ---------------------------------------------------------------------------

def init_params(key, in_channels, out_channels):
    k1, k2, k3 = jax.random.split(key, 3)
    bound = 1.0 / math.sqrt(in_channels * 9)             # PyTorch conv default init range
    conv_w = jax.random.uniform(k1, (out_channels, in_channels, 3, 3),
                                jnp.float32, -bound, bound)
    conv_b = jax.random.uniform(k2, (out_channels,), jnp.float32, -bound, bound)
    dw_bound = 1.0 / math.sqrt(9)
    frelu_dw = jax.random.uniform(k3, (out_channels, 1, 3, 3),
                                  jnp.float32, -dw_bound, dw_bound)
    return dict(conv_w=conv_w, conv_b=conv_b, frelu_dw=frelu_dw,
                bn_gamma=jnp.ones((out_channels,), jnp.float32),
                bn_beta=jnp.zeros((out_channels,), jnp.float32))


def conv_block_reference(x_nchw, params, use_frelu):
    x = jnp.transpose(x_nchw, (0, 2, 3, 1))
    xp = jnp.pad(x, ((0, 0), (1, 1), (1, 1), (0, 0)), mode="reflect")
    w = jnp.transpose(params["conv_w"], (2, 3, 1, 0))
    out = lax.conv_general_dilated(
        xp, w, (1, 1), "VALID", dimension_numbers=("NHWC", "HWIO", "NHWC"),
        precision=lax.Precision.HIGHEST) + params["conv_b"]
    if use_frelu:
        dw = jnp.transpose(params["frelu_dw"], (2, 3, 1, 0))
        f = lax.conv_general_dilated(
            out, dw, (1, 1), "SAME", dimension_numbers=("NHWC", "HWIO", "NHWC"),
            feature_group_count=out.shape[-1], precision=lax.Precision.HIGHEST)
        mean = jnp.mean(f, axis=(0, 1, 2))
        var = jnp.mean((f - mean) ** 2, axis=(0, 1, 2))
        f = (f - mean) * lax.rsqrt(var + _BN_EPS) * params["bn_gamma"] + params["bn_beta"]
        out = jnp.maximum(out, f)
    else:
        out = jnp.where(out > 0.0, out, jnp.expm1(out))
    return jnp.transpose(out, (0, 3, 1, 2))


if __name__ == "__main__":
    B, Cin, Cout, H, W = 2, 4, 8, 16, 16
    key = jax.random.PRNGKey(0)
    kx, kp = jax.random.split(key)
    x = jax.random.normal(kx, (B, Cin, H, W), jnp.float32)           # NCHW like PyTorch
    params = init_params(kp, Cin, Cout)

    # row_tile=8 -> two row tiles per image: exercises the halo recompute + pipeline.
    out_frelu = jax.block_until_ready(conv_block(x, params, use_frelu=True, row_tile=8))
    out_elu = jax.block_until_ready(conv_block(x, params, use_frelu=False, row_tile=8))

    assert out_frelu.shape == (B, Cout, H, W)
    assert out_elu.shape == (B, Cout, H, W)

    ref_frelu = conv_block_reference(x, params, True)
    ref_elu = conv_block_reference(x, params, False)
    err_f = float(jnp.max(jnp.abs(out_frelu - ref_frelu)))
    err_e = float(jnp.max(jnp.abs(out_elu - ref_elu)))
    # bf16 matmul operands + bf16 conv_out intermediate (f32 accumulation everywhere)
    # -> small drift vs the f32 reference.
    assert err_f < 1e-1 and err_e < 1e-1, (err_f, err_e)
    print("KERNEL_OK")
</pallas_src>

<mosaic_0001>
module attributes {stable_mosaic.version = 11 : i64} {
  func.func @_conv3x3_frelu_kernel(%arg0: i32, %arg1: i32, %arg2: memref<1x18x18x4xbf16, #tpu.memory_space<vmem>>, %arg3: memref<9x4x8xbf16, #tpu.memory_space<vmem>>, %arg4: memref<1x8xf32, #tpu.memory_space<vmem>>, %arg5: memref<9x8xf32, #tpu.memory_space<vmem>>, %arg6: memref<1x8x16x8xbf16, #tpu.memory_space<vmem>>, %arg7: memref<1x2x8xf32, #tpu.memory_space<vmem>>, %arg8: memref<10x18x8xf32, #tpu.memory_space<vmem>>) attributes {dimension_semantics = [#tpu.dimension_semantics<parallel>, #tpu.dimension_semantics<arbitrary>], iteration_bounds = array<i64: 2, 2>, scalar_prefetch = 0 : i64, scratch_operands = 1 : i64, tpu.core_type = #tpu.core_type<tc>, window_params = [{transform_indices = @transform_0, window_bounds = array<i64: 1, 18, 18, 4>}, {pipeline_mode = #tpu.pipeline_mode<synchronous>, transform_indices = @transform_1, window_bounds = array<i64: 9, 4, 8>}, {pipeline_mode = #tpu.pipeline_mode<synchronous>, transform_indices = @transform_2, window_bounds = array<i64: 1, 8>}, {pipeline_mode = #tpu.pipeline_mode<synchronous>, transform_indices = @transform_3, window_bounds = array<i64: 9, 8>}, {transform_indices = @transform_4, window_bounds = array<i64: 1, 8, 16, 8>}, {transform_indices = @transform_5, window_bounds = array<i64: 1, 2, 8>}]} {
    %c8_i32 = arith.constant 8 : i32
    %0 = arith.muli %arg1, %c8_i32 : i32
    %1 = tpu.assume_multiple %0, 8 : i32
    %c0 = arith.constant 0 : index
    %2 = arith.index_cast %1 : i32 to index
    %c0_0 = arith.constant 0 : index
    %c0_1 = arith.constant 0 : index
    %3 = vector.load %arg2[%c0, %2, %c0_0, %c0_1] : memref<1x18x18x4xbf16, #tpu.memory_space<vmem>>, vector<1x10x18x4xbf16>
    %4 = vector.shape_cast %3 : vector<1x10x18x4xbf16> to vector<10x18x4xbf16>
    %cst = arith.constant 0.000000e+00 : f32
    %5 = vector.broadcast %cst : f32 to vector<128x8xf32>
    %6 = vector.extract_strided_slice %4 {offsets = [0, 0, 0], sizes = [8, 16, 4], strides = [1, 1, 1]} : vector<10x18x4xbf16> to vector<8x16x4xbf16>
    %7 = vector.shape_cast %6 : vector<8x16x4xbf16> to vector<128x4xbf16>
    %c0_2 = arith.constant 0 : index
    %c0_3 = arith.constant 0 : index
    %c0_4 = arith.constant 0 : index
    %8 = vector.load %arg3[%c0_2, %c0_3, %c0_4] : memref<9x4x8xbf16, #tpu.memory_space<vmem>>, vector<1x4x8xbf16>
    %9 = vector.shape_cast %8 : vector<1x4x8xbf16> to vector<4x8xbf16>
    %cst_5 = arith.constant dense<0.000000e+00> : vector<128x8xf32>
    %10 = tpu.matmul %7, %9, %cst_5 {dimension_numbers = #tpu.dot_dimension_numbers<[1], [0], [0], [1], [0, 0, 1, 1], [], []>} : vector<128x4xbf16>, vector<4x8xbf16>, vector<128x8xf32> -> vector<128x8xf32>
    %11 = arith.addf %5, %10 : vector<128x8xf32>
    %12 = vector.extract_strided_slice %4 {offsets = [0, 1, 0], sizes = [8, 16, 4], strides = [1, 1, 1]} : vector<10x18x4xbf16> to vector<8x16x4xbf16>
    %13 = vector.shape_cast %12 : vector<8x16x4xbf16> to vector<128x4xbf16>
    %c1 = arith.constant 1 : index
    %c0_6 = arith.constant 0 : index
    %c0_7 = arith.constant 0 : index
    %14 = vector.load %arg3[%c1, %c0_6, %c0_7] : memref<9x4x8xbf16, #tpu.memory_space<vmem>>, vector<1x4x8xbf16>
    %15 = vector.shape_cast %14 : vector<1x4x8xbf16> to vector<4x8xbf16>
    %cst_8 = arith.constant dense<0.000000e+00> : vector<128x8xf32>
    %16 = tpu.matmul %13, %15, %cst_8 {dimension_numbers = #tpu.dot_dimension_numbers<[1], [0], [0], [1], [0, 0, 1, 1], [], []>} : vector<128x4xbf16>, vector<4x8xbf16>, vector<128x8xf32> -> vector<128x8xf32>
    %17 = arith.addf %11, %16 : vector<128x8xf32>
    %18 = vector.extract_strided_slice %4 {offsets = [0, 2, 0], sizes = [8, 16, 4], strides = [1, 1, 1]} : vector<10x18x4xbf16> to vector<8x16x4xbf16>
    %19 = vector.shape_cast %18 : vector<8x16x4xbf16> to vector<128x4xbf16>
    %c2 = arith.constant 2 : index
    %c0_9 = arith.constant 0 : index
    %c0_10 = arith.constant 0 : index
    %20 = vector.load %arg3[%c2, %c0_9, %c0_10] : memref<9x4x8xbf16, #tpu.memory_space<vmem>>, vector<1x4x8xbf16>
    %21 = vector.shape_cast %20 : vector<1x4x8xbf16> to vector<4x8xbf16>
    %cst_11 = arith.constant dense<0.000000e+00> : vector<128x8xf32>
    %22 = tpu.matmul %19, %21, %cst_11 {dimension_numbers = #tpu.dot_dimension_numbers<[1], [0], [0], [1], [0, 0, 1, 1], [], []>} : vector<128x4xbf16>, vector<4x8xbf16>, vector<128x8xf32> -> vector<128x8xf32>
    %23 = arith.addf %17, %22 : vector<128x8xf32>
    %24 = vector.extract_strided_slice %4 {offsets = [1, 0, 0], sizes = [8, 16, 4], strides = [1, 1, 1]} : vector<10x18x4xbf16> to vector<8x16x4xbf16>
    %25 = vector.shape_cast %24 : vector<8x16x4xbf16> to vector<128x4xbf16>
    %c3 = arith.constant 3 : index
    %c0_12 = arith.constant 0 : index
    %c0_13 = arith.constant 0 : index
    %26 = vector.load %arg3[%c3, %c0_12, %c0_13] : memref<9x4x8xbf16, #tpu.memory_space<vmem>>, vector<1x4x8xbf16>
    %27 = vector.shape_cast %26 : vector<1x4x8xbf16> to vector<4x8xbf16>
    %cst_14 = arith.constant dense<0.000000e+00> : vector<128x8xf32>
    %28 = tpu.matmul %25, %27, %cst_14 {dimension_numbers = #tpu.dot_dimension_numbers<[1], [0], [0], [1], [0, 0, 1, 1], [], []>} : vector<128x4xbf16>, vector<4x8xbf16>, vector<128x8xf32> -> vector<128x8xf32>
    %29 = arith.addf %23, %28 : vector<128x8xf32>
    %30 = vector.extract_strided_slice %4 {offsets = [1, 1, 0], sizes = [8, 16, 4], strides = [1, 1, 1]} : vector<10x18x4xbf16> to vector<8x16x4xbf16>
    %31 = vector.shape_cast %30 : vector<8x16x4xbf16> to vector<128x4xbf16>
    %c4 = arith.constant 4 : index
    %c0_15 = arith.constant 0 : index
    %c0_16 = arith.constant 0 : index
    %32 = vector.load %arg3[%c4, %c0_15, %c0_16] : memref<9x4x8xbf16, #tpu.memory_space<vmem>>, vector<1x4x8xbf16>
    %33 = vector.shape_cast %32 : vector<1x4x8xbf16> to vector<4x8xbf16>
    %cst_17 = arith.constant dense<0.000000e+00> : vector<128x8xf32>
    %34 = tpu.matmul %31, %33, %cst_17 {dimension_numbers = #tpu.dot_dimension_numbers<[1], [0], [0], [1], [0, 0, 1, 1], [], []>} : vector<128x4xbf16>, vector<4x8xbf16>, vector<128x8xf32> -> vector<128x8xf32>
    %35 = arith.addf %29, %34 : vector<128x8xf32>
    %36 = vector.extract_strided_slice %4 {offsets = [1, 2, 0], sizes = [8, 16, 4], strides = [1, 1, 1]} : vector<10x18x4xbf16> to vector<8x16x4xbf16>
    %37 = vector.shape_cast %36 : vector<8x16x4xbf16> to vector<128x4xbf16>
    %c5 = arith.constant 5 : index
    %c0_18 = arith.constant 0 : index
    %c0_19 = arith.constant 0 : index
    %38 = vector.load %arg3[%c5, %c0_18, %c0_19] : memref<9x4x8xbf16, #tpu.memory_space<vmem>>, vector<1x4x8xbf16>
    %39 = vector.shape_cast %38 : vector<1x4x8xbf16> to vector<4x8xbf16>
    %cst_20 = arith.constant dense<0.000000e+00> : vector<128x8xf32>
    %40 = tpu.matmul %37, %39, %cst_20 {dimension_numbers = #tpu.dot_dimension_numbers<[1], [0], [0], [1], [0, 0, 1, 1], [], []>} : vector<128x4xbf16>, vector<4x8xbf16>, vector<128x8xf32> -> vector<128x8xf32>
    %41 = arith.addf %35, %40 : vector<128x8xf32>
    %42 = vector.extract_strided_slice %4 {offsets = [2, 0, 0], sizes = [8, 16, 4], strides = [1, 1, 1]} : vector<10x18x4xbf16> to vector<8x16x4xbf16>
    %43 = vector.shape_cast %42 : vector<8x16x4xbf16> to vector<128x4xbf16>
    %c6 = arith.constant 6 : index
    %c0_21 = arith.constant 0 : index
    %c0_22 = arith.constant 0 : index
    %44 = vector.load %arg3[%c6, %c0_21, %c0_22] : memref<9x4x8xbf16, #tpu.memory_space<vmem>>, vector<1x4x8xbf16>
    %45 = vector.shape_cast %44 : vector<1x4x8xbf16> to vector<4x8xbf16>
    %cst_23 = arith.constant dense<0.000000e+00> : vector<128x8xf32>
    %46 = tpu.matmul %43, %45, %cst_23 {dimension_numbers = #tpu.dot_dimension_numbers<[1], [0], [0], [1], [0, 0, 1, 1], [], []>} : vector<128x4xbf16>, vector<4x8xbf16>, vector<128x8xf32> -> vector<128x8xf32>
    %47 = arith.addf %41, %46 : vector<128x8xf32>
    %48 = vector.extract_strided_slice %4 {offsets = [2, 1, 0], sizes = [8, 16, 4], strides = [1, 1, 1]} : vector<10x18x4xbf16> to vector<8x16x4xbf16>
    %49 = vector.shape_cast %48 : vector<8x16x4xbf16> to vector<128x4xbf16>
    %c7 = arith.constant 7 : index
    %c0_24 = arith.constant 0 : index
    %c0_25 = arith.constant 0 : index
    %50 = vector.load %arg3[%c7, %c0_24, %c0_25] : memref<9x4x8xbf16, #tpu.memory_space<vmem>>, vector<1x4x8xbf16>
    %51 = vector.shape_cast %50 : vector<1x4x8xbf16> to vector<4x8xbf16>
    %cst_26 = arith.constant dense<0.000000e+00> : vector<128x8xf32>
    %52 = tpu.matmul %49, %51, %cst_26 {dimension_numbers = #tpu.dot_dimension_numbers<[1], [0], [0], [1], [0, 0, 1, 1], [], []>} : vector<128x4xbf16>, vector<4x8xbf16>, vector<128x8xf32> -> vector<128x8xf32>
    %53 = arith.addf %47, %52 : vector<128x8xf32>
    %54 = vector.extract_strided_slice %4 {offsets = [2, 2, 0], sizes = [8, 16, 4], strides = [1, 1, 1]} : vector<10x18x4xbf16> to vector<8x16x4xbf16>
    %55 = vector.shape_cast %54 : vector<8x16x4xbf16> to vector<128x4xbf16>
    %c8 = arith.constant 8 : index
    %c0_27 = arith.constant 0 : index
    %c0_28 = arith.constant 0 : index
    %56 = vector.load %arg3[%c8, %c0_27, %c0_28] : memref<9x4x8xbf16, #tpu.memory_space<vmem>>, vector<1x4x8xbf16>
    %57 = vector.shape_cast %56 : vector<1x4x8xbf16> to vector<4x8xbf16>
    %cst_29 = arith.constant dense<0.000000e+00> : vector<128x8xf32>
    %58 = tpu.matmul %55, %57, %cst_29 {dimension_numbers = #tpu.dot_dimension_numbers<[1], [0], [0], [1], [0, 0, 1, 1], [], []>} : vector<128x4xbf16>, vector<4x8xbf16>, vector<128x8xf32> -> vector<128x8xf32>
    %59 = arith.addf %53, %58 : vector<128x8xf32>
    %c0_30 = arith.constant 0 : index
    %c0_31 = arith.constant 0 : index
    %60 = vector.load %arg4[%c0_30, %c0_31] : memref<1x8xf32, #tpu.memory_space<vmem>>, vector<1x8xf32>
    %61 = vector.broadcast %60 : vector<1x8xf32> to vector<128x8xf32>
    %62 = arith.addf %59, %61 : vector<128x8xf32>
    %63 = vector.shape_cast %62 : vector<128x8xf32> to vector<8x16x8xf32>
    %64 = arith.truncf %63 : vector<8x16x8xf32> to vector<8x16x8xbf16>
    %c0_32 = arith.constant 0 : index
    %c0_33 = arith.constant 0 : index
    %c0_34 = arith.constant 0 : index
    %c0_35 = arith.constant 0 : index
    %65 = vector.load %arg6[%c0_32, %c0_33, %c0_34, %c0_35] : memref<1x8x16x8xbf16, #tpu.memory_space<vmem>>, vector<1x8x16x8xbf16>
    %66 = vector.shape_cast %65 : vector<1x8x16x8xbf16> to vector<8x16x8xbf16>
    %67 = vector.shape_cast %64 : vector<8x16x8xbf16> to vector<1x8x16x8xbf16>
    tpu.vector_store %arg6[%c0_32, %c0_33, %c0_34, %c0_35], %67 {strides = array<i32>} : memref<1x8x16x8xbf16, #tpu.memory_space<vmem>>, vector<1x8x16x8xbf16>,
    %cst_36 = arith.constant 0.000000e+00 : f32
    %68 = vector.broadcast %cst_36 : f32 to vector<10x1x8xf32>
    %c0_37 = arith.constant 0 : index
    %c0_38 = arith.constant 0 : index
    %c0_39 = arith.constant 0 : index
    %69 = vector.load %arg8[%c0_37, %c0_38, %c0_39] : memref<10x18x8xf32, #tpu.memory_space<vmem>>, vector<10x1x8xf32>
    tpu.vector_store %arg8[%c0_37, %c0_38, %c0_39], %68 {strides = array<i32>} : memref<10x18x8xf32, #tpu.memory_space<vmem>>, vector<10x1x8xf32>,
    %c0_40 = arith.constant 0 : index
    %c17 = arith.constant 17 : index
    %c0_41 = arith.constant 0 : index
    %70 = vector.load %arg8[%c0_40, %c17, %c0_41] : memref<10x18x8xf32, #tpu.memory_space<vmem>>, vector<10x1x8xf32>
    tpu.vector_store %arg8[%c0_40, %c17, %c0_41], %68 {strides = array<i32>} : memref<10x18x8xf32, #tpu.memory_space<vmem>>, vector<10x1x8xf32>,
    %c1_42 = arith.constant 1 : index
    %c1_43 = arith.constant 1 : index
    %c0_44 = arith.constant 0 : index
    %71 = vector.load %arg8[%c1_42, %c1_43, %c0_44] : memref<10x18x8xf32, #tpu.memory_space<vmem>>, vector<8x16x8xf32>
    tpu.vector_store %arg8[%c1_42, %c1_43, %c0_44], %63 {strides = array<i32>} : memref<10x18x8xf32, #tpu.memory_space<vmem>>, vector<8x16x8xf32>,
    %cst_45 = arith.constant 0.000000e+00 : f32
    %72 = vector.broadcast %cst_45 : f32 to vector<1x16x8xf32>
    %c0_46 = arith.constant 0 : index
    %c1_47 = arith.constant 1 : index
    %c0_48 = arith.constant 0 : index
    %73 = vector.load %arg8[%c0_46, %c1_47, %c0_48] : memref<10x18x8xf32, #tpu.memory_space<vmem>>, vector<1x16x8xf32>
    tpu.vector_store %arg8[%c0_46, %c1_47, %c0_48], %72 {strides = array<i32>} : memref<10x18x8xf32, #tpu.memory_space<vmem>>, vector<1x16x8xf32>,
    %c0_i32 = arith.constant 0 : i32
    %74 = arith.cmpi sgt, %arg1, %c0_i32 : i32
    %75 = arith.extui %74 : i1 to i32
    %c0_i32_49 = arith.constant 0 : i32
    %76 = arith.cmpi ne, %75, %c0_i32_49 : i32
    scf.if %76 {
      %c1_i32_115 = arith.constant 1 : i32
      %157 = arith.subi %1, %c1_i32_115 : i32
      %c0_116 = arith.constant 0 : index
      %158 = arith.index_cast %157 : i32 to index
      %c0_117 = arith.constant 0 : index
      %c0_118 = arith.constant 0 : index
      %159 = vector.load %arg2[%c0_116, %158, %c0_117, %c0_118] : memref<1x18x18x4xbf16, #tpu.memory_space<vmem>>, vector<1x3x18x4xbf16>
      %160 = vector.shape_cast %159 : vector<1x3x18x4xbf16> to vector<3x18x4xbf16>
      %cst_119 = arith.constant 0.000000e+00 : f32
      %161 = vector.broadcast %cst_119 : f32 to vector<16x8xf32>
      %162 = vector.extract_strided_slice %160 {offsets = [0, 0, 0], sizes = [1, 16, 4], strides = [1, 1, 1]} : vector<3x18x4xbf16> to vector<1x16x4xbf16>
      %163 = vector.shape_cast %162 : vector<1x16x4xbf16> to vector<16x4xbf16>
      %c0_120 = arith.constant 0 : index
      %c0_121 = arith.constant 0 : index
      %c0_122 = arith.constant 0 : index
      %164 = vector.load %arg3[%c0_120, %c0_121, %c0_122] : memref<9x4x8xbf16, #tpu.memory_space<vmem>>, vector<1x4x8xbf16>
      %165 = vector.shape_cast %164 : vector<1x4x8xbf16> to vector<4x8xbf16>
      %cst_123 = arith.constant dense<0.000000e+00> : vector<16x8xf32>
      %166 = tpu.matmul %163, %165, %cst_123 {dimension_numbers = #tpu.dot_dimension_numbers<[1], [0], [0], [1], [0, 0, 1, 1], [], []>} : vector<16x4xbf16>, vector<4x8xbf16>, vector<16x8xf32> -> vector<16x8xf32>
      %167 = arith.addf %161, %166 : vector<16x8xf32>
      %168 = vector.extract_strided_slice %160 {offsets = [0, 1, 0], sizes = [1, 16, 4], strides = [1, 1, 1]} : vector<3x18x4xbf16> to vector<1x16x4xbf16>
      %169 = vector.shape_cast %168 : vector<1x16x4xbf16> to vector<16x4xbf16>
      %c1_124 = arith.constant 1 : index
      %c0_125 = arith.constant 0 : index
      %c0_126 = arith.constant 0 : index
      %170 = vector.load %arg3[%c1_124, %c0_125, %c0_126] : memref<9x4x8xbf16, #tpu.memory_space<vmem>>, vector<1x4x8xbf16>
      %171 = vector.shape_cast %170 : vector<1x4x8xbf16> to vector<4x8xbf16>
      %cst_127 = arith.constant dense<0.000000e+00> : vector<16x8xf32>
      %172 = tpu.matmul %169, %171, %cst_127 {dimension_numbers = #tpu.dot_dimension_numbers<[1], [0], [0], [1], [0, 0, 1, 1], [], []>} : vector<16x4xbf16>, vector<4x8xbf16>, vector<16x8xf32> -> vector<16x8xf32>
      %173 = arith.addf %167, %172 : vector<16x8xf32>
      %174 = vector.extract_strided_slice %160 {offsets = [0, 2, 0], sizes = [1, 16, 4], strides = [1, 1, 1]} : vector<3x18x4xbf16> to vector<1x16x4xbf16>
      %175 = vector.shape_cast %174 : vector<1x16x4xbf16> to vector<16x4xbf16>
      %c2_128 = arith.constant 2 : index
      %c0_129 = arith.constant 0 : index
      %c0_130 = arith.constant 0 : index
      %176 = vector.load %arg3[%c2_128, %c0_129, %c0_130] : memref<9x4x8xbf16, #tpu.memory_space<vmem>>, vector<1x4x8xbf16>
      %177 = vector.shape_cast %176 : vector<1x4x8xbf16> to vector<4x8xbf16>
      %cst_131 = arith.constant dense<0.000000e+00> : vector<16x8xf32>
      %178 = tpu.matmul %175, %177, %cst_131 {dimension_numbers = #tpu.dot_dimension_numbers<[1], [0], [0], [1], [0, 0, 1, 1], [], []>} : vector<16x4xbf16>, vector<4x8xbf16>, vector<16x8xf32> -> vector<16x8xf32>
      %179 = arith.addf %173, %178 : vector<16x8xf32>
      %180 = vector.extract_strided_slice %160 {offsets = [1, 0, 0], sizes = [1, 16, 4], strides = [1, 1, 1]} : vector<3x18x4xbf16> to vector<1x16x4xbf16>
      %181 = vector.shape_cast %180 : vector<1x16x4xbf16> to vector<16x4xbf16>
      %c3_132 = arith.constant 3 : index
      %c0_133 = arith.constant 0 : index
      %c0_134 = arith.constant 0 : index
      %182 = vector.load %arg3[%c3_132, %c0_133, %c0_134] : memref<9x4x8xbf16, #tpu.memory_space<vmem>>, vector<1x4x8xbf16>
      %183 = vector.shape_cast %182 : vector<1x4x8xbf16> to vector<4x8xbf16>
      %cst_135 = arith.constant dense<0.000000e+00> : vector<16x8xf32>
      %184 = tpu.matmul %181, %183, %cst_135 {dimension_numbers = #tpu.dot_dimension_numbers<[1], [0], [0], [1], [0, 0, 1, 1], [], []>} : vector<16x4xbf16>, vector<4x8xbf16>, vector<16x8xf32> -> vector<16x8xf32>
      %185 = arith.addf %179, %184 : vector<16x8xf32>
      %186 = vector.extract_strided_slice %160 {offsets = [1, 1, 0], sizes = [1, 16, 4], strides = [1, 1, 1]} : vector<3x18x4xbf16> to vector<1x16x4xbf16>
      %187 = vector.shape_cast %186 : vector<1x16x4xbf16> to vector<16x4xbf16>
      %c4_136 = arith.constant 4 : index
      %c0_137 = arith.constant 0 : index
      %c0_138 = arith.constant 0 : index
      %188 = vector.load %arg3[%c4_136, %c0_137, %c0_138] : memref<9x4x8xbf16, #tpu.memory_space<vmem>>, vector<1x4x8xbf16>
      %189 = vector.shape_cast %188 : vector<1x4x8xbf16> to vector<4x8xbf16>
      %cst_139 = arith.constant dense<0.000000e+00> : vector<16x8xf32>
      %190 = tpu.matmul %187, %189, %cst_139 {dimension_numbers = #tpu.dot_dimension_numbers<[1], [0], [0], [1], [0, 0, 1, 1], [], []>} : vector<16x4xbf16>, vector<4x8xbf16>, vector<16x8xf32> -> vector<16x8xf32>
      %191 = arith.addf %185, %190 : vector<16x8xf32>
      %192 = vector.extract_strided_slice %160 {offsets = [1, 2, 0], sizes = [1, 16, 4], strides = [1, 1, 1]} : vector<3x18x4xbf16> to vector<1x16x4xbf16>
      %193 = vector.shape_cast %192 : vector<1x16x4xbf16> to vector<16x4xbf16>
      %c5_140 = arith.constant 5 : index
      %c0_141 = arith.constant 0 : index
      %c0_142 = arith.constant 0 : index
      %194 = vector.load %arg3[%c5_140, %c0_141, %c0_142] : memref<9x4x8xbf16, #tpu.memory_space<vmem>>, vector<1x4x8xbf16>
      %195 = vector.shape_cast %194 : vector<1x4x8xbf16> to vector<4x8xbf16>
      %cst_143 = arith.constant dense<0.000000e+00> : vector<16x8xf32>
      %196 = tpu.matmul %193, %195, %cst_143 {dimension_numbers = #tpu.dot_dimension_numbers<[1], [0], [0], [1], [0, 0, 1, 1], [], []>} : vector<16x4xbf16>, vector<4x8xbf16>, vector<16x8xf32> -> vector<16x8xf32>
      %197 = arith.addf %191, %196 : vector<16x8xf32>
      %198 = vector.extract_strided_slice %160 {offsets = [2, 0, 0], sizes = [1, 16, 4], strides = [1, 1, 1]} : vector<3x18x4xbf16> to vector<1x16x4xbf16>
      %199 = vector.shape_cast %198 : vector<1x16x4xbf16> to vector<16x4xbf16>
      %c6_144 = arith.constant 6 : index
      %c0_145 = arith.constant 0 : index
      %c0_146 = arith.constant 0 : index
      %200 = vector.load %arg3[%c6_144, %c0_145, %c0_146] : memref<9x4x8xbf16, #tpu.memory_space<vmem>>, vector<1x4x8xbf16>
      %201 = vector.shape_cast %200 : vector<1x4x8xbf16> to vector<4x8xbf16>
      %cst_147 = arith.constant dense<0.000000e+00> : vector<16x8xf32>
      %202 = tpu.matmul %199, %201, %cst_147 {dimension_numbers = #tpu.dot_dimension_numbers<[1], [0], [0], [1], [0, 0, 1, 1], [], []>} : vector<16x4xbf16>, vector<4x8xbf16>, vector<16x8xf32> -> vector<16x8xf32>
      %203 = arith.addf %197, %202 : vector<16x8xf32>
      %204 = vector.extract_strided_slice %160 {offsets = [2, 1, 0], sizes = [1, 16, 4], strides = [1, 1, 1]} : vector<3x18x4xbf16> to vector<1x16x4xbf16>
      %205 = vector.shape_cast %204 : vector<1x16x4xbf16> to vector<16x4xbf16>
      %c7_148 = arith.constant 7 : index
      %c0_149 = arith.constant 0 : index
      %c0_150 = arith.constant 0 : index
      %206 = vector.load %arg3[%c7_148, %c0_149, %c0_150] : memref<9x4x8xbf16, #tpu.memory_space<vmem>>, vector<1x4x8xbf16>
      %207 = vector.shape_cast %206 : vector<1x4x8xbf16> to vector<4x8xbf16>
      %cst_151 = arith.constant dense<0.000000e+00> : vector<16x8xf32>
      %208 = tpu.matmul %205, %207, %cst_151 {dimension_numbers = #tpu.dot_dimension_numbers<[1], [0], [0], [1], [0, 0, 1, 1], [], []>} : vector<16x4xbf16>, vector<4x8xbf16>, vector<16x8xf32> -> vector<16x8xf32>
      %209 = arith.addf %203, %208 : vector<16x8xf32>
      %210 = vector.extract_strided_slice %160 {offsets = [2, 2, 0], sizes = [1, 16, 4], strides = [1, 1, 1]} : vector<3x18x4xbf16> to vector<1x16x4xbf16>
      %211 = vector.shape_cast %210 : vector<1x16x4xbf16> to vector<16x4xbf16>
      %c8_152 = arith.constant 8 : index
      %c0_153 = arith.constant 0 : index
      %c0_154 = arith.constant 0 : index
      %212 = vector.load %arg3[%c8_152, %c0_153, %c0_154] : memref<9x4x8xbf16, #tpu.memory_space<vmem>>, vector<1x4x8xbf16>
      %213 = vector.shape_cast %212 : vector<1x4x8xbf16> to vector<4x8xbf16>
      %cst_155 = arith.constant dense<0.000000e+00> : vector<16x8xf32>
      %214 = tpu.matmul %211, %213, %cst_155 {dimension_numbers = #tpu.dot_dimension_numbers<[1], [0], [0], [1], [0, 0, 1, 1], [], []>} : vector<16x4xbf16>, vector<4x8xbf16>, vector<16x8xf32> -> vector<16x8xf32>
      %215 = arith.addf %209, %214 : vector<16x8xf32>
      %c0_156 = arith.constant 0 : index
      %c0_157 = arith.constant 0 : index
      %216 = vector.load %arg4[%c0_156, %c0_157] : memref<1x8xf32, #tpu.memory_space<vmem>>, vector<1x8xf32>
      %217 = vector.broadcast %216 : vector<1x8xf32> to vector<16x8xf32>
      %218 = arith.addf %215, %217 : vector<16x8xf32>
      %219 = vector.shape_cast %218 : vector<16x8xf32> to vector<1x16x8xf32>
      %c0_158 = arith.constant 0 : index
      %c1_159 = arith.constant 1 : index
      %c0_160 = arith.constant 0 : index
      %220 = vector.load %arg8[%c0_158, %c1_159, %c0_160] : memref<10x18x8xf32, #tpu.memory_space<vmem>>, vector<1x16x8xf32>
      tpu.vector_store %arg8[%c0_158, %c1_159, %c0_160], %219 {strides = array<i32>} : memref<10x18x8xf32, #tpu.memory_space<vmem>>, vector<1x16x8xf32>,
    } else {
    }
    %c9 = arith.constant 9 : index
    %c1_50 = arith.constant 1 : index
    %c0_51 = arith.constant 0 : index
    %77 = vector.load %arg8[%c9, %c1_50, %c0_51] : memref<10x18x8xf32, #tpu.memory_space<vmem>>, vector<1x16x8xf32>
    tpu.vector_store %arg8[%c9, %c1_50, %c0_51], %72 {strides = array<i32>} : memref<10x18x8xf32, #tpu.memory_space<vmem>>, vector<1x16x8xf32>,
    %c1_i32 = arith.constant 1 : i32
    %78 = arith.cmpi slt, %arg1, %c1_i32 : i32
    %79 = arith.extui %78 : i1 to i32
    %c0_i32_52 = arith.constant 0 : i32
    %80 = arith.cmpi ne, %79, %c0_i32_52 : i32
    scf.if %80 {
      %c8_i32_115 = arith.constant 8 : i32
      %157 = arith.addi %1, %c8_i32_115 : i32
      %c0_116 = arith.constant 0 : index
      %158 = arith.index_cast %157 : i32 to index
      %c0_117 = arith.constant 0 : index
      %c0_118 = arith.constant 0 : index
      %159 = vector.load %arg2[%c0_116, %158, %c0_117, %c0_118] : memref<1x18x18x4xbf16, #tpu.memory_space<vmem>>, vector<1x3x18x4xbf16>
      %160 = vector.shape_cast %159 : vector<1x3x18x4xbf16> to vector<3x18x4xbf16>
      %cst_119 = arith.constant 0.000000e+00 : f32
      %161 = vector.broadcast %cst_119 : f32 to vector<16x8xf32>
      %162 = vector.extract_strided_slice %160 {offsets = [0, 0, 0], sizes = [1, 16, 4], strides = [1, 1, 1]} : vector<3x18x4xbf16> to vector<1x16x4xbf16>
      %163 = vector.shape_cast %162 : vector<1x16x4xbf16> to vector<16x4xbf16>
      %c0_120 = arith.constant 0 : index
      %c0_121 = arith.constant 0 : index
      %c0_122 = arith.constant 0 : index
      %164 = vector.load %arg3[%c0_120, %c0_121, %c0_122] : memref<9x4x8xbf16, #tpu.memory_space<vmem>>, vector<1x4x8xbf16>
      %165 = vector.shape_cast %164 : vector<1x4x8xbf16> to vector<4x8xbf16>
      %cst_123 = arith.constant dense<0.000000e+00> : vector<16x8xf32>
      %166 = tpu.matmul %163, %165, %cst_123 {dimension_numbers = #tpu.dot_dimension_numbers<[1], [0], [0], [1], [0, 0, 1, 1], [], []>} : vector<16x4xbf16>, vector<4x8xbf16>, vector<16x8xf32> -> vector<16x8xf32>
      %167 = arith.addf %161, %166 : vector<16x8xf32>
      %168 = vector.extract_strided_slice %160 {offsets = [0, 1, 0], sizes = [1, 16, 4], strides = [1, 1, 1]} : vector<3x18x4xbf16> to vector<1x16x4xbf16>
      %169 = vector.shape_cast %168 : vector<1x16x4xbf16> to vector<16x4xbf16>
      %c1_124 = arith.constant 1 : index
      %c0_125 = arith.constant 0 : index
      %c0_126 = arith.constant 0 : index
      %170 = vector.load %arg3[%c1_124, %c0_125, %c0_126] : memref<9x4x8xbf16, #tpu.memory_space<vmem>>, vector<1x4x8xbf16>
      %171 = vector.shape_cast %170 : vector<1x4x8xbf16> to vector<4x8xbf16>
      %cst_127 = arith.constant dense<0.000000e+00> : vector<16x8xf32>
      %172 = tpu.matmul %169, %171, %cst_127 {dimension_numbers = #tpu.dot_dimension_numbers<[1], [0], [0], [1], [0, 0, 1, 1], [], []>} : vector<16x4xbf16>, vector<4x8xbf16>, vector<16x8xf32> -> vector<16x8xf32>
      %173 = arith.addf %167, %172 : vector<16x8xf32>
      %174 = vector.extract_strided_slice %160 {offsets = [0, 2, 0], sizes = [1, 16, 4], strides = [1, 1, 1]} : vector<3x18x4xbf16> to vector<1x16x4xbf16>
      %175 = vector.shape_cast %174 : vector<1x16x4xbf16> to vector<16x4xbf16>
      %c2_128 = arith.constant 2 : index
      %c0_129 = arith.constant 0 : index
      %c0_130 = arith.constant 0 : index
      %176 = vector.load %arg3[%c2_128, %c0_129, %c0_130] : memref<9x4x8xbf16, #tpu.memory_space<vmem>>, vector<1x4x8xbf16>
      %177 = vector.shape_cast %176 : vector<1x4x8xbf16> to vector<4x8xbf16>
      %cst_131 = arith.constant dense<0.000000e+00> : vector<16x8xf32>
      %178 = tpu.matmul %175, %177, %cst_131 {dimension_numbers = #tpu.dot_dimension_numbers<[1], [0], [0], [1], [0, 0, 1, 1], [], []>} : vector<16x4xbf16>, vector<4x8xbf16>, vector<16x8xf32> -> vector<16x8xf32>
      %179 = arith.addf %173, %178 : vector<16x8xf32>
      %180 = vector.extract_strided_slice %160 {offsets = [1, 0, 0], sizes = [1, 16, 4], strides = [1, 1, 1]} : vector<3x18x4xbf16> to vector<1x16x4xbf16>
      %181 = vector.shape_cast %180 : vector<1x16x4xbf16> to vector<16x4xbf16>
      %c3_132 = arith.constant 3 : index
      %c0_133 = arith.constant 0 : index
      %c0_134 = arith.constant 0 : index
      %182 = vector.load %arg3[%c3_132, %c0_133, %c0_134] : memref<9x4x8xbf16, #tpu.memory_space<vmem>>, vector<1x4x8xbf16>
      %183 = vector.shape_cast %182 : vector<1x4x8xbf16> to vector<4x8xbf16>
      %cst_135 = arith.constant dense<0.000000e+00> : vector<16x8xf32>
      %184 = tpu.matmul %181, %183, %cst_135 {dimension_numbers = #tpu.dot_dimension_numbers<[1], [0], [0], [1], [0, 0, 1, 1], [], []>} : vector<16x4xbf16>, vector<4x8xbf16>, vector<16x8xf32> -> vector<16x8xf32>
      %185 = arith.addf %179, %184 : vector<16x8xf32>
      %186 = vector.extract_strided_slice %160 {offsets = [1, 1, 0], sizes = [1, 16, 4], strides = [1, 1, 1]} : vector<3x18x4xbf16> to vector<1x16x4xbf16>
      %187 = vector.shape_cast %186 : vector<1x16x4xbf16> to vector<16x4xbf16>
      %c4_136 = arith.constant 4 : index
      %c0_137 = arith.constant 0 : index
      %c0_138 = arith.constant 0 : index
      %188 = vector.load %arg3[%c4_136, %c0_137, %c0_138] : memref<9x4x8xbf16, #tpu.memory_space<vmem>>, vector<1x4x8xbf16>
      %189 = vector.shape_cast %188 : vector<1x4x8xbf16> to vector<4x8xbf16>
      %cst_139 = arith.constant dense<0.000000e+00> : vector<16x8xf32>
      %190 = tpu.matmul %187, %189, %cst_139 {dimension_numbers = #tpu.dot_dimension_numbers<[1], [0], [0], [1], [0, 0, 1, 1], [], []>} : vector<16x4xbf16>, vector<4x8xbf16>, vector<16x8xf32> -> vector<16x8xf32>
      %191 = arith.addf %185, %190 : vector<16x8xf32>
      %192 = vector.extract_strided_slice %160 {offsets = [1, 2, 0], sizes = [1, 16, 4], strides = [1, 1, 1]} : vector<3x18x4xbf16> to vector<1x16x4xbf16>
      %193 = vector.shape_cast %192 : vector<1x16x4xbf16> to vector<16x4xbf16>
      %c5_140 = arith.constant 5 : index
      %c0_141 = arith.constant 0 : index
      %c0_142 = arith.constant 0 : index
      %194 = vector.load %arg3[%c5_140, %c0_141, %c0_142] : memref<9x4x8xbf16, #tpu.memory_space<vmem>>, vector<1x4x8xbf16>
      %195 = vector.shape_cast %194 : vector<1x4x8xbf16> to vector<4x8xbf16>
      %cst_143 = arith.constant dense<0.000000e+00> : vector<16x8xf32>
      %196 = tpu.matmul %193, %195, %cst_143 {dimension_numbers = #tpu.dot_dimension_numbers<[1], [0], [0], [1], [0, 0, 1, 1], [], []>} : vector<16x4xbf16>, vector<4x8xbf16>, vector<16x8xf32> -> vector<16x8xf32>
      %197 = arith.addf %191, %196 : vector<16x8xf32>
      %198 = vector.extract_strided_slice %160 {offsets = [2, 0, 0], sizes = [1, 16, 4], strides = [1, 1, 1]} : vector<3x18x4xbf16> to vector<1x16x4xbf16>
      %199 = vector.shape_cast %198 : vector<1x16x4xbf16> to vector<16x4xbf16>
      %c6_144 = arith.constant 6 : index
      %c0_145 = arith.constant 0 : index
      %c0_146 = arith.constant 0 : index
      %200 = vector.load %arg3[%c6_144, %c0_145, %c0_146] : memref<9x4x8xbf16, #tpu.memory_space<vmem>>, vector<1x4x8xbf16>
      %201 = vector.shape_cast %200 : vector<1x4x8xbf16> to vector<4x8xbf16>
      %cst_147 = arith.constant dense<0.000000e+00> : vector<16x8xf32>
      %202 = tpu.matmul %199, %201, %cst_147 {dimension_numbers = #tpu.dot_dimension_numbers<[1], [0], [0], [1], [0, 0, 1, 1], [], []>} : vector<16x4xbf16>, vector<4x8xbf16>, vector<16x8xf32> -> vector<16x8xf32>
      %203 = arith.addf %197, %202 : vector<16x8xf32>
      %204 = vector.extract_strided_slice %160 {offsets = [2, 1, 0], sizes = [1, 16, 4], strides = [1, 1, 1]} : vector<3x18x4xbf16> to vector<1x16x4xbf16>
      %205 = vector.shape_cast %204 : vector<1x16x4xbf16> to vector<16x4xbf16>
      %c7_148 = arith.constant 7 : index
      %c0_149 = arith.constant 0 : index
      %c0_150 = arith.constant 0 : index
      %206 = vector.load %arg3[%c7_148, %c0_149, %c0_150] : memref<9x4x8xbf16, #tpu.memory_space<vmem>>, vector<1x4x8xbf16>
      %207 = vector.shape_cast %206 : vector<1x4x8xbf16> to vector<4x8xbf16>
      %cst_151 = arith.constant dense<0.000000e+00> : vector<16x8xf32>
      %208 = tpu.matmul %205, %207, %cst_151 {dimension_numbers = #tpu.dot_dimension_numbers<[1], [0], [0], [1], [0, 0, 1, 1], [], []>} : vector<16x4xbf16>, vector<4x8xbf16>, vector<16x8xf32> -> vector<16x8xf32>
      %209 = arith.addf %203, %208 : vector<16x8xf32>
      %210 = vector.extract_strided_slice %160 {offsets = [2, 2, 0], sizes = [1, 16, 4], strides = [1, 1, 1]} : vector<3x18x4xbf16> to vector<1x16x4xbf16>
      %211 = vector.shape_cast %210 : vector<1x16x4xbf16> to vector<16x4xbf16>
      %c8_152 = arith.constant 8 : index
      %c0_153 = arith.constant 0 : index
      %c0_154 = arith.constant 0 : index
      %212 = vector.load %arg3[%c8_152, %c0_153, %c0_154] : memref<9x4x8xbf16, #tpu.memory_space<vmem>>, vector<1x4x8xbf16>
      %213 = vector.shape_cast %212 : vector<1x4x8xbf16> to vector<4x8xbf16>
      %cst_155 = arith.constant dense<0.000000e+00> : vector<16x8xf32>
      %214 = tpu.matmul %211, %213, %cst_155 {dimension_numbers = #tpu.dot_dimension_numbers<[1], [0], [0], [1], [0, 0, 1, 1], [], []>} : vector<16x4xbf16>, vector<4x8xbf16>, vector<16x8xf32> -> vector<16x8xf32>
      %215 = arith.addf %209, %214 : vector<16x8xf32>
      %c0_156 = arith.constant 0 : index
      %c0_157 = arith.constant 0 : index
      %216 = vector.load %arg4[%c0_156, %c0_157] : memref<1x8xf32, #tpu.memory_space<vmem>>, vector<1x8xf32>
      %217 = vector.broadcast %216 : vector<1x8xf32> to vector<16x8xf32>
      %218 = arith.addf %215, %217 : vector<16x8xf32>
      %219 = vector.shape_cast %218 : vector<16x8xf32> to vector<1x16x8xf32>
      %c9_158 = arith.constant 9 : index
      %c1_159 = arith.constant 1 : index
      %c0_160 = arith.constant 0 : index
      %220 = vector.load %arg8[%c9_158, %c1_159, %c0_160] : memref<10x18x8xf32, #tpu.memory_space<vmem>>, vector<1x16x8xf32>
      tpu.vector_store %arg8[%c9_158, %c1_159, %c0_160], %219 {strides = array<i32>} : memref<10x18x8xf32, #tpu.memory_space<vmem>>, vector<1x16x8xf32>,
    } else {
    }
    %cst_53 = arith.constant 0.000000e+00 : f32
    %81 = vector.broadcast %cst_53 : f32 to vector<8x16x8xf32>
    %c0_54 = arith.constant 0 : index
    %c0_55 = arith.constant 0 : index
    %82 = vector.load %arg5[%c0_54, %c0_55] : memref<9x8xf32, #tpu.memory_space<vmem>>, vector<1x8xf32>
    %83 = vector.shape_cast %82 : vector<1x8xf32> to vector<1x1x8xf32>
    %c0_56 = arith.constant 0 : index
    %c0_57 = arith.constant 0 : index
    %c0_58 = arith.constant 0 : index
    %84 = vector.load %arg8[%c0_56, %c0_57, %c0_58] : memref<10x18x8xf32, #tpu.memory_space<vmem>>, vector<8x16x8xf32>
    %85 = vector.broadcast %83 : vector<1x1x8xf32> to vector<8x16x8xf32>
    %86 = arith.mulf %84, %85 : vector<8x16x8xf32>
    %87 = arith.addf %81, %86 : vector<8x16x8xf32>
    %c1_59 = arith.constant 1 : index
    %c0_60 = arith.constant 0 : index
    %88 = vector.load %arg5[%c1_59, %c0_60] : memref<9x8xf32, #tpu.memory_space<vmem>>, vector<1x8xf32>
    %89 = vector.shape_cast %88 : vector<1x8xf32> to vector<1x1x8xf32>
    %c0_61 = arith.constant 0 : index
    %c1_62 = arith.constant 1 : index
    %c0_63 = arith.constant 0 : index
    %90 = vector.load %arg8[%c0_61, %c1_62, %c0_63] : memref<10x18x8xf32, #tpu.memory_space<vmem>>, vector<8x16x8xf32>
    %91 = vector.broadcast %89 : vector<1x1x8xf32> to vector<8x16x8xf32>
    %92 = arith.mulf %90, %91 : vector<8x16x8xf32>
    %93 = arith.addf %87, %92 : vector<8x16x8xf32>
    %c2_64 = arith.constant 2 : index
    %c0_65 = arith.constant 0 : index
    %94 = vector.load %arg5[%c2_64, %c0_65] : memref<9x8xf32, #tpu.memory_space<vmem>>, vector<1x8xf32>
    %95 = vector.shape_cast %94 : vector<1x8xf32> to vector<1x1x8xf32>
    %c0_66 = arith.constant 0 : index
    %c2_67 = arith.constant 2 : index
    %c0_68 = arith.constant 0 : index
    %96 = vector.load %arg8[%c0_66, %c2_67, %c0_68] : memref<10x18x8xf32, #tpu.memory_space<vmem>>, vector<8x16x8xf32>
    %97 = vector.broadcast %95 : vector<1x1x8xf32> to vector<8x16x8xf32>
    %98 = arith.mulf %96, %97 : vector<8x16x8xf32>
    %99 = arith.addf %93, %98 : vector<8x16x8xf32>
    %c3_69 = arith.constant 3 : index
    %c0_70 = arith.constant 0 : index
    %100 = vector.load %arg5[%c3_69, %c0_70] : memref<9x8xf32, #tpu.memory_space<vmem>>, vector<1x8xf32>
    %101 = vector.shape_cast %100 : vector<1x8xf32> to vector<1x1x8xf32>
    %c1_71 = arith.constant 1 : index
    %c0_72 = arith.constant 0 : index
    %c0_73 = arith.constant 0 : index
    %102 = vector.load %arg8[%c1_71, %c0_72, %c0_73] : memref<10x18x8xf32, #tpu.memory_space<vmem>>, vector<8x16x8xf32>
    %103 = vector.broadcast %101 : vector<1x1x8xf32> to vector<8x16x8xf32>
    %104 = arith.mulf %102, %103 : vector<8x16x8xf32>
    %105 = arith.addf %99, %104 : vector<8x16x8xf32>
    %c4_74 = arith.constant 4 : index
    %c0_75 = arith.constant 0 : index
    %106 = vector.load %arg5[%c4_74, %c0_75] : memref<9x8xf32, #tpu.memory_space<vmem>>, vector<1x8xf32>
    %107 = vector.shape_cast %106 : vector<1x8xf32> to vector<1x1x8xf32>
    %c1_76 = arith.constant 1 : index
    %c1_77 = arith.constant 1 : index
    %c0_78 = arith.constant 0 : index
    %108 = vector.load %arg8[%c1_76, %c1_77, %c0_78] : memref<10x18x8xf32, #tpu.memory_space<vmem>>, vector<8x16x8xf32>
    %109 = vector.broadcast %107 : vector<1x1x8xf32> to vector<8x16x8xf32>
    %110 = arith.mulf %108, %109 : vector<8x16x8xf32>
    %111 = arith.addf %105, %110 : vector<8x16x8xf32>
    %c5_79 = arith.constant 5 : index
    %c0_80 = arith.constant 0 : index
    %112 = vector.load %arg5[%c5_79, %c0_80] : memref<9x8xf32, #tpu.memory_space<vmem>>, vector<1x8xf32>
    %113 = vector.shape_cast %112 : vector<1x8xf32> to vector<1x1x8xf32>
    %c1_81 = arith.constant 1 : index
    %c2_82 = arith.constant 2 : index
    %c0_83 = arith.constant 0 : index
    %114 = vector.load %arg8[%c1_81, %c2_82, %c0_83] : memref<10x18x8xf32, #tpu.memory_space<vmem>>, vector<8x16x8xf32>
    %115 = vector.broadcast %113 : vector<1x1x8xf32> to vector<8x16x8xf32>
    %116 = arith.mulf %114, %115 : vector<8x16x8xf32>
    %117 = arith.addf %111, %116 : vector<8x16x8xf32>
    %c6_84 = arith.constant 6 : index
    %c0_85 = arith.constant 0 : index
    %118 = vector.load %arg5[%c6_84, %c0_85] : memref<9x8xf32, #tpu.memory_space<vmem>>, vector<1x8xf32>
    %119 = vector.shape_cast %118 : vector<1x8xf32> to vector<1x1x8xf32>
    %c2_86 = arith.constant 2 : index
    %c0_87 = arith.constant 0 : index
    %c0_88 = arith.constant 0 : index
    %120 = vector.load %arg8[%c2_86, %c0_87, %c0_88] : memref<10x18x8xf32, #tpu.memory_space<vmem>>, vector<8x16x8xf32>
    %121 = vector.broadcast %119 : vector<1x1x8xf32> to vector<8x16x8xf32>
    %122 = arith.mulf %120, %121 : vector<8x16x8xf32>
    %123 = arith.addf %117, %122 : vector<8x16x8xf32>
    %c7_89 = arith.constant 7 : index
    %c0_90 = arith.constant 0 : index
    %124 = vector.load %arg5[%c7_89, %c0_90] : memref<9x8xf32, #tpu.memory_space<vmem>>, vector<1x8xf32>
    %125 = vector.shape_cast %124 : vector<1x8xf32> to vector<1x1x8xf32>
    %c2_91 = arith.constant 2 : index
    %c1_92 = arith.constant 1 : index
    %c0_93 = arith.constant 0 : index
    %126 = vector.load %arg8[%c2_91, %c1_92, %c0_93] : memref<10x18x8xf32, #tpu.memory_space<vmem>>, vector<8x16x8xf32>
    %127 = vector.broadcast %125 : vector<1x1x8xf32> to vector<8x16x8xf32>
    %128 = arith.mulf %126, %127 : vector<8x16x8xf32>
    %129 = arith.addf %123, %128 : vector<8x16x8xf32>
    %c8_94 = arith.constant 8 : index
    %c0_95 = arith.constant 0 : index
    %130 = vector.load %arg5[%c8_94, %c0_95] : memref<9x8xf32, #tpu.memory_space<vmem>>, vector<1x8xf32>
    %131 = vector.shape_cast %130 : vector<1x8xf32> to vector<1x1x8xf32>
    %c2_96 = arith.constant 2 : index
    %c2_97 = arith.constant 2 : index
    %c0_98 = arith.constant 0 : index
    %132 = vector.load %arg8[%c2_96, %c2_97, %c0_98] : memref<10x18x8xf32, #tpu.memory_space<vmem>>, vector<8x16x8xf32>
    %133 = vector.broadcast %131 : vector<1x1x8xf32> to vector<8x16x8xf32>
    %134 = arith.mulf %132, %133 : vector<8x16x8xf32>
    %135 = arith.addf %129, %134 : vector<8x16x8xf32>
    %136 = vector.shape_cast %135 : vector<8x16x8xf32> to vector<128x8xf32>
    %c0_i32_99 = arith.constant 0 : i32
    %137 = arith.cmpi eq, %arg1, %c0_i32_99 : i32
    %138 = arith.extui %137 : i1 to i32
    %c0_i32_100 = arith.constant 0 : i32
    %139 = arith.cmpi ne, %138, %c0_i32_100 : i32
    scf.if %139 {
      %cst_115 = arith.constant 0.000000e+00 : f32
      %157 = vector.broadcast %cst_115 : f32 to vector<2x8xf32>
      %c0_116 = arith.constant 0 : index
      %c0_117 = arith.constant 0 : index
      %c0_118 = arith.constant 0 : index
      %158 = vector.load %arg7[%c0_116, %c0_117, %c0_118] : memref<1x2x8xf32, #tpu.memory_space<vmem>>, vector<1x2x8xf32>
      %159 = vector.shape_cast %158 : vector<1x2x8xf32> to vector<2x8xf32>
      %160 = vector.shape_cast %157 : vector<2x8xf32> to vector<1x2x8xf32>
      tpu.vector_store %arg7[%c0_116, %c0_117, %c0_118], %160 {strides = array<i32>} : memref<1x2x8xf32, #tpu.memory_space<vmem>>, vector<1x2x8xf32>,
    } else {
    }
    %c0_101 = arith.constant 0 : index
    %c0_102 = arith.constant 0 : index
    %c0_103 = arith.constant 0 : index
    %140 = vector.load %arg7[%c0_101, %c0_102, %c0_103] : memref<1x2x8xf32, #tpu.memory_space<vmem>>, vector<1x1x8xf32>
    %141 = vector.shape_cast %140 : vector<1x1x8xf32> to vector<1x8xf32>
    %cst_104 = arith.constant dense<0.000000e+00> : vector<8xf32>
    %142 = vector.multi_reduction <add>, %136, %cst_104 [0] : vector<128x8xf32> to vector<8xf32>
    %143 = vector.shape_cast %142 : vector<8xf32> to vector<1x8xf32>
    %144 = arith.addf %141, %143 : vector<1x8xf32>
    %c0_105 = arith.constant 0 : index
    %c0_106 = arith.constant 0 : index
    %c0_107 = arith.constant 0 : index
    %145 = vector.load %arg7[%c0_105, %c0_106, %c0_107] : memref<1x2x8xf32, #tpu.memory_space<vmem>>, vector<1x1x8xf32>
    %146 = vector.shape_cast %145 : vector<1x1x8xf32> to vector<1x8xf32>
    %147 = vector.shape_cast %144 : vector<1x8xf32> to vector<1x1x8xf32>
    tpu.vector_store %arg7[%c0_105, %c0_106, %c0_107], %147 {strides = array<i32>} : memref<1x2x8xf32, #tpu.memory_space<vmem>>, vector<1x1x8xf32>,
    %c0_108 = arith.constant 0 : index
    %c1_109 = arith.constant 1 : index
    %c0_110 = arith.constant 0 : index
    %148 = vector.load %arg7[%c0_108, %c1_109, %c0_110] : memref<1x2x8xf32, #tpu.memory_space<vmem>>, vector<1x1x8xf32>
    %149 = vector.shape_cast %148 : vector<1x1x8xf32> to vector<1x8xf32>
    %150 = arith.mulf %136, %136 : vector<128x8xf32>
    %cst_111 = arith.constant dense<0.000000e+00> : vector<8xf32>
    %151 = vector.multi_reduction <add>, %150, %cst_111 [0] : vector<128x8xf32> to vector<8xf32>
    %152 = vector.shape_cast %151 : vector<8xf32> to vector<1x8xf32>
    %153 = arith.addf %149, %152 : vector<1x8xf32>
    %c0_112 = arith.constant 0 : index
    %c1_113 = arith.constant 1 : index
    %c0_114 = arith.constant 0 : index
    %154 = vector.load %arg7[%c0_112, %c1_113, %c0_114] : memref<1x2x8xf32, #tpu.memory_space<vmem>>, vector<1x1x8xf32>
    %155 = vector.shape_cast %154 : vector<1x1x8xf32> to vector<1x8xf32>
    %156 = vector.shape_cast %153 : vector<1x8xf32> to vector<1x1x8xf32>
    tpu.vector_store %arg7[%c0_112, %c1_113, %c0_114], %156 {strides = array<i32>} : memref<1x2x8xf32, #tpu.memory_space<vmem>>, vector<1x1x8xf32>,
    return
  }
  func.func @transform_0(%arg0: i32, %arg1: i32) -> (i32, i32, i32, i32) {
    %c0_i32 = arith.constant 0 : i32
    %c0_i32_0 = arith.constant 0 : i32
    %c0_i32_1 = arith.constant 0 : i32
    %c0_i32_2 = arith.constant 0 : i32
    return %arg0, %c0_i32, %c0_i32_0, %c0_i32_1 : i32, i32, i32, i32
  }
  func.func @transform_1(%arg0: i32, %arg1: i32) -> (i32, i32, i32) {
    %c0_i32 = arith.constant 0 : i32
    %c0_i32_0 = arith.constant 0 : i32
    %c0_i32_1 = arith.constant 0 : i32
    %c0_i32_2 = arith.constant 0 : i32
    return %c0_i32, %c0_i32_0, %c0_i32_1 : i32, i32, i32
  }
  func.func @transform_2(%arg0: i32, %arg1: i32) -> (i32, i32) {
    %c0_i32 = arith.constant 0 : i32
    %c0_i32_0 = arith.constant 0 : i32
    %c0_i32_1 = arith.constant 0 : i32
    return %c0_i32, %c0_i32_0 : i32, i32
  }
  func.func @transform_3(%arg0: i32, %arg1: i32) -> (i32, i32) {
    %c0_i32 = arith.constant 0 : i32
    %c0_i32_0 = arith.constant 0 : i32
    %c0_i32_1 = arith.constant 0 : i32
    return %c0_i32, %c0_i32_0 : i32, i32
  }
  func.func @transform_4(%arg0: i32, %arg1: i32) -> (i32, i32, i32, i32) {
    %c0_i32 = arith.constant 0 : i32
    %c0_i32_0 = arith.constant 0 : i32
    %c0_i32_1 = arith.constant 0 : i32
    return %arg0, %arg1, %c0_i32, %c0_i32_0 : i32, i32, i32, i32
  }
  func.func @transform_5(%arg0: i32, %arg1: i32) -> (i32, i32, i32) {
    %c0_i32 = arith.constant 0 : i32
    %c0_i32_0 = arith.constant 0 : i32
    %c0_i32_1 = arith.constant 0 : i32
    return %arg0, %c0_i32, %c0_i32_0 : i32, i32, i32
  }
}

</mosaic_0001>

<bundles_post_ra>
// kernel: tpu_custom_call.1
= control target key start
LH: loop header
LB: loop body
LE: loop exit
PB: predicated region body
PF: predicated region fallthrough
CT: control target
= control target key end

     0   :  { %s6142_s0 = inlined_call_operand.vmem [shape: bf16[2,18,18,4], index: 0, kind: input, shape index: {}]   ;;  %s6143_s1 = inlined_call_operand.vmem [shape: bf16[9,4,8], index: 1, kind: input, shape index: {}]   ;;  %s6144_s2 = inlined_call_operand.vmem [shape: f32[1,8], index: 2, kind: input, shape index: {}]   ;;  %s6145_s3 = inlined_call_operand.vmem [shape: f32[9,8], index: 3, kind: input, shape index: {}]   ;;  %s6146_s4 = inlined_call_operand.vmem [shape: bf16[2,16,16,8], index: 4, kind: output, shape index: {0}]   ;;  %s6147_s5 = inlined_call_operand.hbm [shape: f32[2,2,8], index: 5, kind: output, shape index: {1}]  }
   0x1   :  { %6203 = sst [smem:[#allocation35_spill]] %s6142_s0 }
   0x2   :  { %11 = vsyncpa [#allocation4], 0 }
   0x3   :  { %13 = vsyncpa [#allocation4 + $0x1], 0  ;;  %s4819_s18 = smov 0   ;;  %s4821_s19 = smov 0  }
   0x4   :  { %s4823_s20 = smov 0   ;;  %s4825_s21 = smov 0  }
   0x5   :  { %s4827_s22 = smov 0   ;;  %s4829_s23 = smov 0  }
   0x6   :  { %s4831_s24 = smov 0   ;;  %s4833_s25 = smov 0  }
   0x7 LB: > { %s3813_s26 = sadd.s32 4294967295, %s4780_s25   ;;  %s3814_s27 = sadd.s32 4294967294, %s4780_s25   ;;  %s4780_s25 = sphi %s4833_s25, %s19_s25   ;;  %s4776_s24 = sphi %s4831_s24, %s6303_s24   ;;  %s4772_s23 = sphi %s4829_s23, %s6302_s23   ;;  %s4768_s22 = sphi %s4827_s22, %s6301_s22   ;;  %s4764_s21 = sphi %s4825_s21, %s6300_s21   ;;  %s4760_s20 = sphi %s4823_s20, %s6299_s20   ;;  %s4756_s19 = sphi %s4821_s19, %s6298_s19   ;;  %s4752_s18 = sphi %s4819_s18, %s6297_s18  }
   0x8   : > { %s28_s28 = sadd.s32 1, %s4772_s23  ;;  %s31_s29 = sadd.s32 1, %s4776_s24 }
   0x9   : > { %p29_p0 = scmp.ge.s32.totalorder %s28_s28, 2  ;;  %p165_p1 = scmp.ne.s32.totalorder %s4760_s20, %s4756_s19 }
   0xa   : > { %p166_p2 = scmp.eq.s32.totalorder %s3813_s26, 3  ;;  %p171_p4 = scmp.ne.s32.totalorder %s4756_s19, %s4752_s18 }
   0xb   : > { %s6305_s28 = smov (%p29_p0, %s28_s28), 0  ;;  %s6307_s29 = smov (!%p29_p0, %s31_s29), %s4776_s24 }
   0xc   : > { %p4868_p3 = por %p166_p2, %p165_p1  ;;  %p33_p5 = scmp.ge.s32.totalorder %s6307_s29, 2 }
   0xd   : > { %p172_p6 = scmp.eq.s32.totalorder %s3814_s27, 3  ;;  %p3817_p7 = scmp.ge.s32.totalorder %s4780_s25, 1 }
   0xe   : > { %p207_p8 = scmp.lt.s32.totalorder %s4780_s25, 5  ;;  %s6309_s29 = smov (%p33_p5, %s6307_s29), 0 }
   0xf   : > { %p4878_p9 = por %p172_p6, %p171_p4  ;;  %s152_s7 = ssub.s32 %s4776_s24, %s6309_s29 }
  0x10   : > { %p208_p10 = pnand %p3817_p7, %p207_p8  ;;  %s155_s8 = sadd.s32 1, %s4760_s20 }
  0x11   : > { %p153_p11 = scmp.eq.s32.totalorder %s152_s7, 0 }
  0x12   : > { %211 = sbr.rel (%p208_p10) target bundleno = 1075 (0x433), region = 36 }
  0x13   : > { %s4886_s9 = scalar_select %p153_p11, %s4760_s20, %s155_s8  }
  0x19   : > { %s6148_s10 = sand.u32 1, %s4756_s19   ;;  %v3827_v0 = vld [vmem:[%s6143_s1 + $0x2] sm:$0x3]  ;;  %vm543_vm0 = vcmask 1041408   ;;  %v4895_v1 = vld [vmem:[%s6143_s1 + $0x8] sm:$0x3] }
  0x1a   : > { %s4899_s15 = sshll.u32 %s6148_s10, 1  ;;  %4576 = vmatprep.subr.msk.bf16.mxu1 %vm543_vm0, %v3827_v0  ;;  %4580 = vmatprep.subr.msk.bf16.mxu0 %vm543_vm0, %v4895_v1  ;;  %v545_v2 = vsel %vm543_vm0, %v3827_v0, 0  ;;  %v4907_v3 = vsel %vm543_vm0, %v4895_v1, 0  ;;  %p245_p12 = scmp.lt.s32.totalorder %s4768_s22, 1  ;;  %v296_v4 = vld [vmem:[%s6143_s1] sm:$0x3] }
  0x1b   : > { %4177 = vmatpush3.bf16.msra.mxu1 %v545_v2  ;;  %4249 = vmatpush3.bf16.msra.mxu0 %v4907_v3  ;;  %v3906_v5 = vld [vmem:[%s6143_s1 + $0xa] sm:$0x3]  ;;  %s4041_s8 = smul.u32 96, %s4764_s21  ;;  %s6206_s0 = sld [smem:[#allocation35_spill]]  ;;  %vm297_vm1 = vsmask.f32 3328 }
  0x1c   : > { %s4912_s16 = scalar_select %p245_p12, %s4768_s22, 1  ;;  %4577 = vmatprep.subr.msk.bf16.mxu1 %vm543_vm0, %v296_v4  ;;  %4582 = vmatprep.subr.msk.bf16.mxu0 %vm543_vm0, %v3906_v5  ;;  %vm298_vm2 = vsmask.f32 7440  ;;  %v4933_v6 = vsel %vm543_vm0, %v296_v4, 0  ;;  %vm518_vm3 = vcmask 31744   ;;  %v4959_v18 = vsel %vm543_vm0, %v3906_v5, 0 }
  0x1d   : > { %v4964_v23 = vld [vmem:[%s6143_s1 + $0xc] sm:$0x3]  ;;  %vm4976_vm4 = vmor %vm297_vm1, %vm298_vm2  ;;  %vm816_vm5 = vcmask 1042432   ;;  %vm817_vm6 = vcmask 1046532   ;;  %vm1957_vm8 = vcmask 57344   ;;  %vm1979_vm9 = vcmask 64512  }
  0x1e   : > { %s4586_s11 = smul.u32 216, %s4912_s16  ;;  %v4985_v38 = vsel %vm543_vm0, %v4964_v23, 0  ;;  %vm5059_vm7 = vmor %vm816_vm5, %vm817_vm6  ;;  %s5492_s27 = sshll.u32 %s4764_s21, 3  ;;  %vm1940_vm10 = vcmask 60416  }
  0x1f   : > { %p253_p13 = scmp.lt.s32.totalorder %s5492_s27, 15  ;;  %p3964_p0 = scmp.le.s32.totalorder %s4764_s21, 0 }
  0x20   : > { %vm4784_vm11 = vmmov (!%p3964_p0), 0   ;;  %vm2025_vm12 = vsmask.f32 (!%p3964_p0), 7424  ;;  %vm2132_vm13 = vcmask (!%p3964_p0), 1046528  }
  0x21   : > { %s4927_s14 = scalar_lea.vmem %s6206_s0, %s4586_s11  ;;  %s3822_s11 = sshll.u32 %s4912_s16, 5 }
  0x22   : > { %s4930_s10 = scalar_lea.vmem %s4927_s14, %s4041_s8  ;;  %s5572_s0 = scalar_lea.vmem [#allocation3], %s4899_s15 }
  0x23   : > { %v4936_v7 = vld [vmem:[%s4930_s10] sm:$0xf]  ;;  %v4939_v8 = vld [vmem:[%s4930_s10 + $0x4] sm:$0xf]  ;;  %v4942_v9 = vld [vmem:[%s4930_s10 + $0x8] sm:$0x1] }
  0x24   : > { %v301_v10 = vshrl.u32 %v4936_v7, 16  ;;  %v304_v11 = vshll.u32 %v4936_v7, 16  ;;  %v310_v12 = vshll.u32 %v4939_v8, 16  ;;  %v314_v13 = vshrl.u32 %v4939_v8, 16  ;;  %v4949_v14 = vld [vmem:[%s4930_s10 + $0xc] sm:$0xf] }
  0x25   : > { %v320_v15 = vshll.u32 %v4942_v9, 16  ;;  %v4953_v16 = vld [vmem:[%s4930_s10 + $0x10] sm:$0xf]  ;;  %v4956_v17 = vld [vmem:[%s4930_s10 + $0x14] sm:$0x1]  ;;  %v325_v25 = vshrl.u32 %v4949_v14, 16 }
  0x26   : > { %v303_v19 = vrot.slane %v301_v10, 4  ;;  %v306_v20 = vrot.slane %v304_v11, 5  ;;  %v312_v21 = vrot.slane %v310_v12, 5  ;;  %v316_v22 = vrot.slane %v314_v13, 4  ;;  %v4972_v32 = vld [vmem:[%s4930_s10 + $0x18] sm:$0xf] }
  0x27   : > { %v322_v24 = vrot.slane %v320_v15, 5  ;;  %v328_v26 = vshll.u32 %v4949_v14, 16  ;;  %v334_v27 = vshll.u32 %v4953_v16, 16  ;;  %v338_v30 = vshrl.u32 %v4953_v16, 16  ;;  %v4981_v37 = vld [vmem:[%s4930_s10 + $0x1c] sm:$0xf] }
  0x28   : > { %v307_v28 = vor.u32 %v306_v20, %v303_v19  ;;  %v317_v29 = vor.u32 %v316_v22, %v312_v21  ;;  %v344_v31 = vshll.u32 %v4956_v17, 16  ;;  %v327_v34 = vrot.slane %v325_v25, 4  ;;  %v4989_v45 = vld [vmem:[%s4930_s10 + $0x20] sm:$0x1]  ;;  %v4999_v56 = vld [vmem:[%s4930_s10 + $0x24] sm:$0xf] }
  0x29   : > { %v330_v35 = vrot.slane %v328_v26, 5  ;;  %v336_v36 = vrot.slane %v334_v27, 5  ;;  %v340_v41 = vrot.slane %v338_v30, 4  ;;  %v831_v44 = vrot.slane %v4956_v17, 5  ;;  %v5004_v61 = vld [vmem:[%s4930_s10 + $0x28] sm:$0xf] }
  0x2a   : > { %v308_v39 = vrot.slane %v307_v28, 4  ;;  %v318_v40 = vrot.slane %v317_v29, 4  ;;  %v346_v42 = vrot.slane %v344_v31, 5  ;;  %v349_v46 = vshrl.u32 %v4972_v32, 16  ;;  %v5012_v4 = vld [vmem:[%s4930_s10 + $0x2c] sm:$0x1] }
  0x2b   : > { %v331_v43 = vor.u32 %v330_v35, %v327_v34  ;;  %v352_v47 = vshll.u32 %v4972_v32, 16  ;;  %v341_v50 = vor.u32 %v340_v41, %v336_v36  ;;  %v358_v51 = vshll.u32 %v4981_v37, 16  ;;  %v5018_v13 = vld [vmem:[%s4930_s10 + $0x30] sm:$0xf]  ;;  %v5025_v22 = vld [vmem:[%s6143_s1 + $0x4] sm:$0x3] }
  0x2c   : > { %v313_v48 = vsel %vm4976_vm4, %v308_v39, %v312_v21  ;;  %v323_v49 = vsel %vm4976_vm4, %v318_v40, %v322_v24  ;;  %v351_v54 = vrot.slane %v349_v46, 4  ;;  %v362_v59 = vshrl.u32 %v4981_v37, 16  ;;  %v5030_v28 = vld [vmem:[%s4930_s10 + $0x34] sm:$0xf]  ;;  %v5037_v34 = vld [vmem:[%s4930_s10 + $0x38] sm:$0x1] }
  0x2d   : > { %v3828_v52 = vcombine.low %v313_v48, %v323_v49  ;;  %v332_v53 = vrot.slane %v331_v43, 4  ;;  %v354_v55 = vrot.slane %v352_v47, 5  ;;  %v342_v57 = vrot.slane %v341_v50, 4  ;;  %s254_s7 = scalar_select %p253_p13, %s5492_s27, 15 }
  0x2e   : > { %v360_v58 = vrot.slane %v358_v51, 5  ;;  %v368_v60 = vshll.u32 %v4989_v45, 16  ;;  %v835_v0 = vrot.slane %v4981_v37, 5  ;;  %v838_v2 = vrot.slane %v4989_v45, 5  ;;  %v5050_v51 = vld [vmem:[%s4930_s10 + $0x3c] sm:$0xf] }
  0x2f   : > { %4178 = vmatprep.mubr.msk.bf16.mxu1 %vm518_vm3, %v3828_v52  ;;  %v337_v62 = vsel %vm4976_vm4, %v332_v53, %v336_v36  ;;  %v355_v63 = vor.u32 %v354_v55, %v351_v54  ;;  %v347_v5 = vsel %vm4976_vm4, %v342_v57, %v346_v42  ;;  %v364_v10 = vrot.slane %v362_v59, 4  ;;  %v5055_v57 = vld [vmem:[%s4930_s10 + $0x40] sm:$0xf]  ;;  %s3821_s8 = sshll.u32 %s254_s7, 1  ;;  %s3965_s15 = sadd.s32 (!%p3964_p0), 4294967295, %s5492_s27 }
  0x30   : > { %v370_v11 = vrot.slane %v368_v60, 5  ;;  %v373_v12 = vshrl.u32 %v4999_v56, 16  ;;  %v3829_v15 = vcombine.low %v337_v62, %v347_v5  ;;  %v376_v20 = vshll.u32 %v4999_v56, 16  ;;  %s257_s12 = sadd.s32 %s3822_s11, %s3821_s8  ;;  %s4058_s17 = smul.u32 (!%p3964_p0), 12, %s3965_s15 }
  0x31   : > { %v356_v19 = vrot.slane %v355_v63, 4  ;;  %v382_v21 = vshll.u32 %v5004_v61, 16  ;;  %v365_v24 = vor.u32 %v364_v10, %v360_v58  ;;  %v386_v26 = vshrl.u32 %v5004_v61, 16  ;;  %s3823_s26 = sshll.u32 %s257_s12, 2 }
  0x32   : > { %v375_v25 = vrot.slane %v373_v12, 4  ;;  %v392_v27 = vshll.u32 %v5012_v4, 16  ;;  %4250 = vmatprep.mubr.msk.bf16.mxu0 %vm518_vm3, %v3829_v15  ;;  %4179 = vmatmul.mubr.msk.bf16.vlgmr.msra.gmra.mrb[0].mxu1 %vm518_vm3, %v3829_v15  ;;  %v378_v30 = vrot.slane %v376_v20, 5  ;;  %v397_v35 = vshrl.u32 %v5018_v13, 16  ;;  %v5076_v20 = vld [vmem:[%s4930_s10 + $0x44] sm:$0x1]  ;;  %s5506_s16 = scalar_lea.vmem %s6146_s4, %s3823_s26 }
  0x33   : > { %v361_v29 = vsel %vm4976_vm4, %v356_v19, %v360_v58  ;;  %v384_v31 = vrot.slane %v382_v21, 5  ;;  %4195 = vmatpush3.bf16.msra.mxu1 %v4933_v6  ;;  %v366_v36 = vrot.slane %v365_v24, 4  ;;  %v388_v39 = vrot.slane %v386_v26, 4 }
  0x34   : > { %v394_v40 = vrot.slane %v392_v27, 5  ;;  %v400_v41 = vshll.u32 %v5018_v13, 16  ;;  %v379_v42 = vor.u32 %v378_v30, %v375_v25  ;;  %v399_v43 = vrot.slane %v397_v35, 4  ;;  %4578 = vmatprep.subr.msk.bf16.mxu1 %vm543_vm0, %v5025_v22 }
  0x35   : > { %v406_v46 = vshll.u32 %v5030_v28, 16  ;;  %v410_v47 = vshrl.u32 %v5030_v28, 16  ;;  %v371_v48 = vsel %vm4976_vm4, %v366_v36, %v370_v11  ;;  %v389_v49 = vor.u32 %v388_v39, %v384_v31  ;;  %v5089_v36 = vld [vmem:[%s4930_s10 + $0x48] sm:$0xf] }
  0x36   : > { %v402_v6 = vrot.slane %v400_v41, 5  ;;  %v416_v50 = vshll.u32 %v5037_v34, 16  ;;  %v5052_v52 = vcombine.low %v361_v29, %v371_v48  ;;  %v380_v53 = vrot.slane %v379_v42, 4  ;;  %v5104_v42 = vld [vmem:[%s4930_s10 + $0x4c] sm:$0xf] }
  0x37   : > { %v408_v54 = vrot.slane %v406_v46, 5  ;;  %v412_v55 = vrot.slane %v410_v47, 4  ;;  %v390_v58 = vrot.slane %v389_v49, 4  ;;  %v3861_v63 = vrot.slane %v4949_v14, 9 }
  0x38   : > { %v403_v59 = vor.u32 %v402_v6, %v399_v43  ;;  %v418_v60 = vrot.slane %v416_v50, 5  ;;  %4251 = vmatmul.mubr.msk.bf16.vlgmr.msra.gmra.mrb[0].mxu0 %vm518_vm3, %v5052_v52  ;;  %4182 = vmatprep.mubr.msk.bf16.mxu1 %vm518_vm3, %v5052_v52  ;;  %v385_v5 = vsel %vm4976_vm4, %v380_v53, %v384_v31  ;;  %v828_v11 = vrot.slane %v4953_v16, 5 }
  0x39   : > { %v413_v10 = vor.u32 %v412_v55, %v408_v54  ;;  %v421_v12 = vshrl.u32 %v5050_v51, 16  ;;  %4267 = vmatpush3.bf16.msra.mxu0 %v4959_v18  ;;  %v395_v15 = vsel %vm4976_vm4, %v390_v58, %v394_v40  ;;  %v424_v21 = vshll.u32 %v5050_v51, 16 }
  0x3a   : > { %v404_v19 = vrot.slane %v403_v59, 4  ;;  %v430_v24 = vshll.u32 %v5055_v57, 16  ;;  %v5080_v25 = vcombine.low %v385_v5, %v395_v15  ;;  %v829_v27 = vsel %vm5059_vm7, %v3861_v63, %v828_v11  ;;  %4583 = vmatprep.subr.msk.bf16.mxu0 %vm543_vm0, %v4964_v23 }
  0x3b   : > { %v414_v26 = vrot.slane %v413_v10, 4  ;;  %v830_v29 = vrot.slane %v828_v11, 4  ;;  %v423_v30 = vrot.slane %v421_v12, 4  ;;  %v426_v31 = vrot.slane %v424_v21, 5 }
  0x3c   : > { %v409_v18 = vsel %vm4976_vm4, %v404_v19, %v408_v54  ;;  %v432_v35 = vrot.slane %v430_v24, 5  ;;  %4254 = vmatprep.mubr.msk.bf16.mxu0 %vm518_vm3, %v5080_v25  ;;  %4183 = vmatmul.mubr.msk.bf16.gmra.mrb[4].mxu1 %vm518_vm3, %v5080_v25  ;;  %v434_v40 = vshrl.u32 %v5055_v57, 16  ;;  %v440_v41 = vshll.u32 %v5076_v20, 16  ;;  %v5121_v54 = vld [vmem:[%s4930_s10 + $0x50] sm:$0x1] }
  0x3d   : > { %v419_v39 = vsel %vm4976_vm4, %v414_v26, %v418_v60  ;;  %v832_v23 = vsel %vm5059_vm7, %v830_v29, %v831_v44  ;;  %v427_v47 = vor.u32 %v426_v31, %v423_v30  ;;  %v3862_v48 = vrot.slane %v4972_v32, 9  ;;  %v5146_v29 = vld [vmem:[%s4930_s10 + $0x58] sm:$0xf] }
  0x3e   : > { %v5106_v43 = vcombine.low %v409_v18, %v419_v39  ;;  %v5108_v46 = vcombine.low %v829_v27, %v832_v23  ;;  %v436_v49 = vrot.slane %v434_v40, 4  ;;  %v442_v17 = vrot.slane %v440_v41, 5  ;;  %v5152_v39 = vld [vmem:[%s4930_s10 + $0x5c] sm:$0x1] }
  0x3f   : > { %v837_v6 = vrot.slane %v835_v0, 4  ;;  %v445_v44 = vshrl.u32 %v5089_v36, 16  ;;  %v428_v50 = vrot.slane %v427_v47, 4  ;;  %v836_v53 = vsel %vm5059_vm7, %v3862_v48, %v835_v0  ;;  %v5133_v0 = vld [vmem:[%s4930_s10 + $0x54] sm:$0xf] }
  0x40   : > { %4186 = vmatprep.mubr.msk.bf16.mxu1 %vm518_vm3, %v5106_v43  ;;  %v448_v55 = vshll.u32 %v5089_v36, 16  ;;  %v454_v58 = vshll.u32 %v5104_v42, 16  ;;  %4255 = vmatmul.mubr.msk.bf16.gmra.mrb[4].mxu0 %vm518_vm3, %v5106_v43  ;;  %v437_v59 = vor.u32 %v436_v49, %v432_v35  ;;  %v458_v5 = vshrl.u32 %v5104_v42, 16 }
  0x41   : > { %v839_v60 = vsel %vm5059_vm7, %v837_v6, %v838_v2  ;;  %v447_v63 = vrot.slane %v445_v44, 4  ;;  %4268 = vmatprep.mubr.msk.bf16.mxu0 %vm518_vm3, %v5108_v46  ;;  %v433_v10 = vsel %vm4976_vm4, %v428_v50, %v432_v35  ;;  %v464_v2 = vshll.u32 %v5121_v54, 16 }
  0x42   : > { %v5139_v11 = vcombine.low %v836_v53, %v839_v60  ;;  %v450_v12 = vrot.slane %v448_v55, 5  ;;  %v456_v45 = vrot.slane %v454_v58, 5  ;;  %v438_v15 = vrot.slane %v437_v59, 4  ;;  %v5171_v58 = vld [vmem:[%s6143_s1 + $0xe] sm:$0x3] }
  0x43   : > { %v460_v19 = vrot.slane %v458_v5, 4  ;;  %v3863_v21 = vrot.slane %v4999_v56, 9  ;;  %v842_v26 = vrot.slane %v5004_v61, 5  ;;  %v845_v27 = vrot.slane %v5012_v4, 5 }
  0x44   : > { %v451_v24 = vor.u32 %v450_v12, %v447_v63  ;;  %v469_v18 = vshrl.u32 %v5133_v0, 16  ;;  %v443_v30 = vsel %vm4976_vm4, %v438_v15, %v442_v17  ;;  %v466_v35 = vrot.slane %v464_v2, 5 }
  0x45   : > { %v461_v31 = vor.u32 %v460_v19, %v456_v45  ;;  %v472_v23 = vshll.u32 %v5133_v0, 16  ;;  %v5155_v40 = vcombine.low %v433_v10, %v443_v30  ;;  %v843_v47 = vsel %vm5059_vm7, %v3863_v21, %v842_v26 }
  0x46   : > { %v452_v41 = vrot.slane %v451_v24, 4  ;;  %v844_v4 = vrot.slane %v842_v26, 4  ;;  %v471_v49 = vrot.slane %v469_v18, 4  ;;  %v478_v44 = vshll.u32 %v5146_v29, 16 }
  0x47   : > { %v462_v48 = vrot.slane %v461_v31, 4  ;;  %v474_v6 = vrot.slane %v472_v23, 5  ;;  %4187 = vmatmul.mubr.msk.bf16.gmra.mrb[8].mxu1 %vm518_vm3, %v5155_v40  ;;  %v482_v53 = vshrl.u32 %v5146_v29, 16  ;;  %v488_v55 = vshll.u32 %v5152_v39, 16 }
  0x48   : > { %v457_v17 = vsel %vm4976_vm4, %v452_v41, %v456_v45  ;;  %v846_v50 = vsel %vm5059_vm7, %v844_v4, %v845_v27  ;;  %4269 = vmatmul.mubr.msk.bf16.vlgmr.msra.gmra.mrb[0].mxu0 %vm518_vm3, %v5139_v11  ;;  %v480_v5 = vrot.slane %v478_v44, 5  ;;  %v3864_v45 = vrot.slane %v5018_v13, 9 }
  0x49   : > { %v467_v59 = vsel %vm4976_vm4, %v462_v48, %v466_v35  ;;  %v5177_v60 = vcombine.low %v843_v47, %v846_v50  ;;  %v475_v63 = vor.u32 %v474_v6, %v471_v49  ;;  %4285 = vmatpush3.bf16.msra.mxu0 %v4985_v38  ;;  %v484_v12 = vrot.slane %v482_v53, 4  ;;  %v5215_v53 = vld [vmem:[%s4930_s10 + $0x64] sm:$0xf] }
  0x4a   : > { %v5180_v10 = vcombine.low %v457_v17, %v467_v59  ;;  %v849_v19 = vrot.slane %v5030_v28, 5  ;;  %v852_v2 = vrot.slane %v5037_v34, 5  ;;  %v3865_v21 = vrot.slane %v5050_v51, 9  ;;  %4584 = vmatprep.subr.msk.bf16.mxu0 %vm543_vm0, %v5171_v58 }
  0x4b   : > { %4272 = vmatprep.mubr.msk.bf16.mxu0 %vm518_vm3, %v5177_v60  ;;  %v476_v15 = vrot.slane %v475_v63, 4  ;;  %v485_v38 = vor.u32 %v484_v12, %v480_v5  ;;  %v490_v24 = vrot.slane %v488_v55, 5  ;;  %v856_v26 = vrot.slane %v5055_v57, 5 }
  0x4c   : > { %4190 = vmatprep.mubr.msk.bf16.mxu1 %vm518_vm3, %v5180_v10  ;;  %v859_v27 = vrot.slane %v5076_v20, 5  ;;  %v850_v18 = vsel %vm5059_vm7, %v3864_v45, %v849_v19  ;;  %v851_v30 = vrot.slane %v849_v19, 4  ;;  %v3844_v34 = vcombine.low %v4936_v7, %v4939_v8  ;;  %v5237_v19 = vld [vmem:[%s4930_s10 + $0x68] sm:$0x1] }
  0x4d   : > { %v863_v31 = vrot.slane %v5104_v42, 5  ;;  %v481_v35 = vsel %vm4976_vm4, %v476_v15, %v480_v5  ;;  %v486_v23 = vrot.slane %v485_v38, 4  ;;  %v857_v41 = vsel %vm5059_vm7, %v3865_v21, %v856_v26  ;;  %v5226_v5 = vld [vmem:[%s4930_s10 + $0x60] sm:$0xf] }
  0x4e   : > { %v858_v47 = vrot.slane %v856_v26, 4  ;;  %v853_v20 = vsel %vm5059_vm7, %v851_v30, %v852_v2  ;;  %v3866_v4 = vrot.slane %v5089_v36, 9  ;;  %v866_v49 = vrot.slane %v5121_v54, 5 }
  0x4f   : > { %v865_v48 = vrot.slane %v863_v31, 4  ;;  %v491_v6 = vsel %vm4976_vm4, %v486_v23, %v490_v24  ;;  %v5209_v44 = vcombine.low %v850_v18, %v853_v20  ;;  %v3867_v50 = vrot.slane %v5133_v0, 9  ;;  %v5262_v23 = vld [vmem:[%s4930_s10 + $0x70] sm:$0xf] }
  0x50   : > { %v860_v17 = vsel %vm5059_vm7, %v858_v47, %v859_v27  ;;  %v5217_v55 = vcombine.low %v481_v35, %v491_v6  ;;  %v870_v63 = vrot.slane %v5146_v29, 5  ;;  %v873_v54 = vrot.slane %v5152_v39, 5 }
  0x51   : > { %v5219_v59 = vcombine.low %v857_v41, %v860_v17  ;;  %4273 = vmatmul.mubr.msk.bf16.gmra.mrb[4].mxu0 %vm518_vm3, %v5209_v44  ;;  %v864_v12 = vsel %vm5059_vm7, %v3866_v4, %v863_v31  ;;  %v867_v45 = vsel %vm5059_vm7, %v865_v48, %v866_v49  ;;  %v1318_v39 = vrot.slane %v5215_v53, 5  ;;  %v295_v49 = vld [vmem:[%s4930_s10 + $0x74] sm:$0x1] }
  0x52   : > { %4191 = vmatmul.mubr.msk.bf16.gmra.mrb[12].mxu1 %vm518_vm3, %v5217_v55  ;;  %v872_v15 = vrot.slane %v870_v63, 4  ;;  %v871_v2 = vsel %vm5059_vm7, %v3867_v50, %v870_v63  ;;  %v824_v21 = vrot.slane %v4942_v9, 5  ;;  %v3905_v24 = vrot.slane %v5226_v5, 9 }
  0x53   : > { %4276 = vmatprep.mubr.msk.bf16.mxu0 %vm518_vm3, %v5219_v59  ;;  %4196 = vmatprep.mubr.msk.bf16.mxu1 %vm518_vm3, %v3844_v34  ;;  %v3860_v26 = vrot.slane %v4936_v7, 9  ;;  %v5248_v27 = vcombine.low %v864_v12, %v867_v45  ;;  %v1320_v18 = vrot.slane %v1318_v39, 4  ;;  %v1321_v30 = vrot.slane %v5237_v19, 5  ;;  %v5253_v34 = vld [vmem:[%s4930_s10 + $0x6c] sm:$0xf] }
  0x54   : > { %v874_v38 = vsel %vm5059_vm7, %v872_v15, %v873_v54  ;;  %v821_v31 = vrot.slane %v4939_v8, 5  ;;  %v5257_v9 = vcombine.low %v4949_v14, %v4953_v16  ;;  %v1574_v7 = vshrl.u32 %v5253_v34, 16 }
  0x55   : > { %v5259_v35 = vcombine.low %v871_v2, %v874_v38  ;;  %v1577_v41 = vshll.u32 %v5253_v34, 16  ;;  %v5268_v47 = vcombine.low %v4972_v32, %v4981_v37  ;;  %v1587_v4 = vshrl.u32 %v5262_v23, 16  ;;  %v3885_v37 = vld [vmem:[%s6143_s1 + $0x6] sm:$0x3] }
  0x56   : > { %v822_v8 = vsel %vm5059_vm7, %v3860_v26, %v821_v31  ;;  %v823_v20 = vrot.slane %v821_v31, 4  ;;  %v926_v14 = vsel %vm543_vm0, %v5025_v22, 0  ;;  %v1319_v16 = vsel %vm5059_vm7, %v3905_v24, %v1318_v39 }
  0x57   : > { %v1322_v48 = vsel %vm5059_vm7, %v1320_v18, %v1321_v30  ;;  %v1576_v6 = vrot.slane %v1574_v7, 4  ;;  %v1579_v17 = vrot.slane %v1577_v41, 5  ;;  %v1583_v63 = vshll.u32 %v5262_v23, 16 }
  0x58   : > { %v825_v32 = vsel %vm5059_vm7, %v823_v20, %v824_v21  ;;  %v1589_v54 = vrot.slane %v1587_v4, 4  ;;  %v5294_v12 = vcombine.low %v1319_v16, %v1322_v48  ;;  %v1593_v45 = vshll.u32 %v295_v49, 16 }
  0x59   : > { %4277 = vmatmul.mubr.msk.bf16.gmra.mrb[8].mxu0 %vm518_vm3, %v5248_v27  ;;  %v3869_v22 = vcombine.low %v822_v8, %v825_v32  ;;  %v1580_v50 = vor.u32 %v1579_v17, %v1576_v6  ;;  %v3936_v15 = vrot.slane %v5253_v34, 9  ;;  %v1585_v2 = vrot.slane %v1583_v63, 5 }
  0x5a   : > { %4197 = vmatmul.mubr.msk.bf16.vlgmr.msra.gmra.mrb[0].mxu1 %vm518_vm3, %v5257_v9  ;;  %4280 = vmatprep.mubr.msk.bf16.mxu0 %vm518_vm3, %v5259_v35  ;;  %v1724_v21 = vrot.slane %v5262_v23, 5  ;;  %v1727_v38 = vrot.slane %v295_v49, 5  ;;  %v5301_v24 = vcombine.low %v4999_v56, %v5004_v61  ;;  %v5305_v26 = vcombine.low %v5018_v13, %v5030_v28 }
  0x5b   : > { %4213 = vmatpush3.bf16.msra.mxu1 %v926_v14  ;;  %4200 = vmatprep.mubr.msk.bf16.mxu1 %vm518_vm3, %v5268_v47  ;;  %v1581_v39 = vrot.slane %v1580_v50, 4  ;;  %v1595_v18 = vrot.slane %v1593_v45, 5  ;;  %v1590_v31 = vor.u32 %v1589_v54, %v1585_v2  ;;  %v5331_v62 = vcombine.low %v5050_v51, %v5055_v57  ;;  %v3937_v14 = vld [vmem:[%s6143_s1 + $0x10] sm:$0x3] }
  0x5c   : > { %4579 = vmatprep.subr.msk.bf16.mxu1 %vm543_vm0, %v3885_v37  ;;  %v5311_v7 = vsel %vm5059_vm7, %v3936_v15, %v1724_v21  ;;  %v1726_v41 = vrot.slane %v1724_v21, 4  ;;  %v1606_v20 = vsel %vm543_vm0, %v5171_v58, 0  ;;  %v5337_v4 = vcombine.low %v5089_v36, %v5104_v42 }
  0x5d   : > { %v1586_v30 = vsel %vm4976_vm4, %v1581_v39, %v1585_v2  ;;  %v1591_v8 = vrot.slane %v1590_v31, 4  ;;  %v3851_v51 = vcombine.low %v5133_v0, %v5146_v29  ;;  %v3886_v57 = vcombine.low %v5226_v5, %v5215_v53 }
  0x5e   : > { %v5317_v56 = vsel %vm5059_vm7, %v1726_v41, %v1727_v38  ;;  %v1052_v36 = vsel %vm543_vm0, %v3885_v37, 0  ;;  %v3917_v42 = vcombine.low %v5253_v34, %v5262_v23  ;;  %v1171_v0 = vshll.u32 %v5226_v5, 16 }
  0x5f   : > { %v3938_v61 = vcombine.low %v5311_v7, %v5317_v56  ;;  %v1596_v13 = vsel %vm4976_vm4, %v1591_v8, %v1595_v18  ;;  %v1181_v29 = vshrl.u32 %v5215_v53, 16  ;;  %v1738_v58 = vsel %vm543_vm0, %v3937_v14, 0 }
  0x60   : > { %v3927_v28 = vcombine.low %v1586_v30, %v1596_v13  ;;  %v1173_v23 = vrot.slane %v1171_v0, 5 }
  0x61   : > { %4281 = vmatmul.mubr.msk.bf16.gmra.mrb[12].mxu0 %vm518_vm3, %v5294_v12  ;;  %v1183_v48 = vrot.slane %v1181_v29, 4 }
  0x62   : > { %4201 = vmatmul.mubr.msk.bf16.gmra.mrb[4].mxu1 %vm518_vm3, %v5301_v24  ;;  %4286 = vmatprep.mubr.msk.bf16.mxu0 %vm518_vm3, %v5268_v47 }
  0x63   : > { %4204 = vmatprep.mubr.msk.bf16.mxu1 %vm518_vm3, %v5305_v26 }
  0x69   : > { %4287 = vmatmul.mubr.msk.bf16.vlgmr.msra.gmra.mrb[0].mxu0 %vm518_vm3, %v5301_v24 }
  0x6a   : > { %4205 = vmatmul.mubr.msk.bf16.gmra.mrb[8].mxu1 %vm518_vm3, %v5331_v62  ;;  %4303 = vmatpush3.bf16.msra.mxu0 %v1606_v20 }
  0x6b   : > { %4208 = vmatprep.mubr.msk.bf16.mxu1 %vm518_vm3, %v5337_v4  ;;  %4290 = vmatprep.mubr.msk.bf16.mxu0 %vm518_vm3, %v5305_v26 }
  0x6c   : > { %4585 = vmatprep.subr.msk.bf16.mxu0 %vm543_vm0, %v3937_v14 }
  0x71   : > { %4291 = vmatmul.mubr.msk.bf16.gmra.mrb[4].mxu0 %vm518_vm3, %v5331_v62 }
  0x72   : > { %4209 = vmatmul.mubr.msk.bf16.gmra.mrb[12].mxu1 %vm518_vm3, %v3851_v51  ;;  %4294 = vmatprep.mubr.msk.bf16.mxu0 %vm518_vm3, %v5337_v4 }
  0x73   : > { %4214 = vmatprep.mubr.msk.bf16.mxu1 %vm518_vm3, %v3869_v22 }
  0x79   : > { %4295 = vmatmul.mubr.msk.bf16.gmra.mrb[8].mxu0 %vm518_vm3, %v3851_v51 }
  0x7a   : > { %4215 = vmatmul.mubr.msk.bf16.vlgmr.msra.gmra.mrb[0].mxu1 %vm518_vm3, %v5108_v46  ;;  %4298 = vmatprep.mubr.msk.bf16.mxu0 %vm518_vm3, %v3886_v57  ;;  %v1168_v46 = vshrl.u32 %v5226_v5, 16  ;;  %v1187_v5 = vshll.u32 %v5237_v19, 16 }
  0x7b   : > { %4231 = vmatpush3.bf16.msra.mxu1 %v1052_v36  ;;  %4218 = vmatprep.mubr.msk.bf16.mxu1 %vm518_vm3, %v5139_v11 }
  0x7c   : > { %4581 = vmatprep.subr.msk.bf16.mxu1 %vm543_vm0, %v4895_v1  ;;  %v1177_v1 = vshll.u32 %v5215_v53, 16  ;;  %v1170_v34 = vrot.slane %v1168_v46, 4  ;;  %v1189_v49 = vrot.slane %v1187_v5, 5 }
  0x7e   : > { %v1179_v16 = vrot.slane %v1177_v1, 5 }
  0x80   : > { %v1184_v53 = vor.u32 %v1183_v48, %v1179_v16 }
  0x81   : > { %4299 = vmatmul.mubr.msk.bf16.gmra.mrb[12].mxu0 %vm518_vm3, %v3917_v42 }
  0x82   : > { %4219 = vmatmul.mubr.msk.bf16.gmra.mrb[4].mxu1 %vm518_vm3, %v5177_v60  ;;  %4304 = vmatprep.mubr.msk.bf16.mxu0 %vm518_vm3, %v5052_v52  ;;  %v1174_v52 = vor.u32 %v1173_v23, %v1170_v34  ;;  %v1185_v37 = vrot.slane %v1184_v53, 4 }
  0x83   : > { %4222 = vmatprep.mubr.msk.bf16.mxu1 %vm518_vm3, %v5209_v44 }
  0x84   : > { %v1175_v32 = vrot.slane %v1174_v52, 4 }
  0x89   : > { %4305 = vmatmul.mubr.msk.bf16.vlgmr.msra.gmra.mrb[0].mxu0 %vm518_vm3, %v5080_v25  ;;  %v1180_v25 = vsel %vm4976_vm4, %v1175_v32, %v1179_v16 }
  0x8a   : > { %4223 = vmatmul.mubr.msk.bf16.gmra.mrb[8].mxu1 %vm518_vm3, %v5219_v59  ;;  %4321 = vmatpush3.bf16.msra.mxu0 %v1738_v58 }
  0x8b   : > { %4226 = vmatprep.mubr.msk.bf16.mxu1 %vm518_vm3, %v5248_v27  ;;  %4308 = vmatprep.mubr.msk.bf16.mxu0 %vm518_vm3, %v5106_v43  ;;  %v1190_v43 = vsel %vm4976_vm4, %v1185_v37, %v1189_v49 }
  0x8c   : > { %v3896_v19 = vcombine.low %v1180_v25, %v1190_v43 }
  0x91   : > { %4309 = vmatmul.mubr.msk.bf16.gmra.mrb[4].mxu0 %vm518_vm3, %v5155_v40 }
  0x92   : > { %4227 = vmatmul.mubr.msk.bf16.gmra.mrb[12].mxu1 %vm518_vm3, %v5259_v35  ;;  %4312 = vmatprep.mubr.msk.bf16.mxu0 %vm518_vm3, %v5180_v10 }
  0x93   : > { %4232 = vmatprep.mubr.msk.bf16.mxu1 %vm518_vm3, %v5257_v9  ;;  %v5500_v9 = vld [vmem:[%s6144_s2] ss:$0 sm:$0xff] }
  0x99   : > { %4313 = vmatmul.mubr.msk.bf16.gmra.mrb[8].mxu0 %vm518_vm3, %v5217_v55 }
  0x9a   : > { %4233 = vmatmul.mubr.msk.bf16.vlgmr.msra.gmra.mrb[0].mxu1 %vm518_vm3, %v5268_v47  ;;  %4316 = vmatprep.mubr.msk.bf16.mxu0 %vm518_vm3, %v3896_v19 }
  0x9b   : > { %4447 = vmatpush3.bf16.msra.mxu1 %v4907_v3  ;;  %4236 = vmatprep.mubr.msk.bf16.mxu1 %vm518_vm3, %v5301_v24  ;;  %v4782_v3 = vmov 0.0  }
  0x9c   : > { %1958 = vst.msk [vmem:[#allocation2] sm:$0x1] %vm1957_vm8, %v4782_v3  ;;  %1959 = vst.msk [vmem:[#allocation2 + $0x18] sm:$0x1] %vm1957_vm8, %v4782_v3 }
  0x9d   : > { %1960 = vst.msk [vmem:[#allocation2 + $0x30] sm:$0x1] %vm1957_vm8, %v4782_v3  ;;  %1961 = vst.msk [vmem:[#allocation2 + $0x48] sm:$0x1] %vm1957_vm8, %v4782_v3 }
  0x9e   : > { %1962 = vst.msk [vmem:[#allocation2 + $0x60] sm:$0x1] %vm1957_vm8, %v4782_v3  ;;  %1963 = vst.msk [vmem:[#allocation2 + $0x78] sm:$0x1] %vm1957_vm8, %v4782_v3 }
  0x9f   : > { %1964 = vst.msk [vmem:[#allocation2 + $0x90] sm:$0x1] %vm1957_vm8, %v4782_v3  ;;  %1965 = vst.msk [vmem:[#allocation2 + $0xa8] sm:$0x1] %vm1957_vm8, %v4782_v3 }
  0xa0   : > { %1966 = vst.msk [vmem:[#allocation2 + $0xc0] sm:$0x1] %vm1957_vm8, %v4782_v3  ;;  %1967 = vst.msk [vmem:[#allocation2 + $0xd8] sm:$0x1] %vm1957_vm8, %v4782_v3 }
  0xa1   : > { %4317 = vmatmul.mubr.msk.bf16.gmra.mrb[12].mxu0 %vm518_vm3, %v3927_v28  ;;  %1968 = vst.msk [vmem:[#allocation2 + $0x11] sm:$0x1] %vm1957_vm8, %v4782_v3  ;;  %1969 = vst.msk [vmem:[#allocation2 + $0x29] sm:$0x1] %vm1957_vm8, %v4782_v3 }
  0xa2   : > { %4237 = vmatmul.mubr.msk.bf16.gmra.mrb[4].mxu1 %vm518_vm3, %v5305_v26  ;;  %4322 = vmatprep.mubr.msk.bf16.mxu0 %vm518_vm3, %v5139_v11  ;;  %1970 = vst.msk [vmem:[#allocation2 + $0x41] sm:$0x1] %vm1957_vm8, %v4782_v3  ;;  %1971 = vst.msk [vmem:[#allocation2 + $0x59] sm:$0x1] %vm1957_vm8, %v4782_v3 }
  0xa3   : > { %4240 = vmatprep.mubr.msk.bf16.mxu1 %vm518_vm3, %v5331_v62  ;;  %1972 = vst.msk [vmem:[#allocation2 + $0x71] sm:$0x1] %vm1957_vm8, %v4782_v3  ;;  %1973 = vst.msk [vmem:[#allocation2 + $0x89] sm:$0x1] %vm1957_vm8, %v4782_v3 }
  0xa4   : > { %1974 = vst.msk [vmem:[#allocation2 + $0xa1] sm:$0x1] %vm1957_vm8, %v4782_v3  ;;  %1975 = vst.msk [vmem:[#allocation2 + $0xb9] sm:$0x1] %vm1957_vm8, %v4782_v3 }
  0xa5   : > { %1976 = vst.msk [vmem:[#allocation2 + $0xd1] sm:$0x1] %vm1957_vm8, %v4782_v3  ;;  %1977 = vst.msk [vmem:[#allocation2 + $0xe9] sm:$0x1] %vm1957_vm8, %v4782_v3 }
  0xa6   : > { %1996 = vst.msk [vmem:[#allocation2 + $0x1] sm:$0xff] %vm1979_vm9, %v4782_v3  ;;  %1997 = vst.msk [vmem:[#allocation2 + $0x9] sm:$0xff] %vm1979_vm9, %v4782_v3 }
  0xa9   : > { %4323 = vmatmul.mubr.msk.bf16.vlgmr.msra.gmra.mrb[0].mxu0 %vm518_vm3, %v5177_v60 }
  0xaa   : > { %4241 = vmatmul.mubr.msk.bf16.gmra.mrb[8].mxu1 %vm518_vm3, %v5337_v4  ;;  %4326 = vmatprep.mubr.msk.bf16.mxu0 %vm518_vm3, %v5209_v44 }
  0xab   : > { %4244 = vmatprep.mubr.msk.bf16.mxu1 %vm518_vm3, %v3851_v51 }
  0xb1   : > { %4327 = vmatmul.mubr.msk.bf16.gmra.mrb[4].mxu0 %vm518_vm3, %v5219_v59 }
  0xb2   : > { %4245 = vmatmul.mubr.msk.bf16.gmra.mrb[12].mxu1 %vm518_vm3, %v3886_v57  ;;  %4330 = vmatprep.mubr.msk.bf16.mxu0 %vm518_vm3, %v5248_v27 }
  0xb3   : > { %4258 = vmatprep.mubr.msk.bf16.mxu1 %vm518_vm3, %v5155_v40 }
  0xb9   : > { %4331 = vmatmul.mubr.msk.bf16.gmra.mrb[8].mxu0 %vm518_vm3, %v5259_v35 }
  0xba   : > { %4259 = vmatmul.mubr.msk.bf16.vlgmr.msra.gmra.mrb[8].mxu1 %vm518_vm3, %v5180_v10  ;;  %4334 = vmatprep.mubr.msk.bf16.mxu0 %vm518_vm3, %v5294_v12 }
  0xbb   : > { %4262 = vmatprep.mubr.msk.bf16.mxu1 %vm518_vm3, %v5217_v55 }
  0xc1   : > { %4335 = vmatmul.mubr.msk.bf16.gmra.mrb[12].mxu0 %vm518_vm3, %v3938_v61 }
  0xc2   : > { %4263 = vmatmul.mubr.msk.bf16.gmra.mrb[12].mxu1 %vm518_vm3, %v3896_v19 }
 0x16d   : > { %v4234_v33 = vpop.f32.mrb[0].mxu1 }
 0x16e   : > { %v1088_v11 = vpop.f32.mrb[1].mxu1 }
 0x16f   : > { %v4235_v40 = vpop.f32.mrb[2].mxu1 }
 0x170   : > { %v1091_v60 = vpop.f32.mrb[3].mxu1 }
 0x175   : > { %v4238_v10 = vpop.f32.mrb[4].mxu1 }
 0x176   : > { %v1104_v44 = vpop.f32.mrb[5].mxu1 }
 0x177   : > { %v4239_v55 = vpop.f32.mrb[6].mxu1 }
 0x178   : > { %v1107_v59 = vpop.f32.mrb[7].mxu1 }
 0x17c   : > { %v4324_v27 = vpop.f32.mrb[0].mxu0 }
 0x17d   : > { %v4448_v35 = vadd.f32 %v4324_v27, %v4234_v33  ;;  %v1774_v47 = vpop.f32.mrb[1].mxu0 }
 0x17e   : > { %v4449_v6 = vadd.f32 %v1774_v47, %v1088_v11  ;;  %v4325_v17 = vpop.f32.mrb[2].mxu0 }
 0x17f   : > { %v1862_v22 = vadd.f32 %v4448_v35, %v5500_v9  ;;  %v4450_v50 = vadd.f32 %v4325_v17, %v4235_v40  ;;  %v1777_v63 = vpop.f32.mrb[3].mxu0 }
 0x180   : > { %v1860_v54 = vadd.f32 %v4449_v6, %v5500_v9  ;;  %v4451_v12 = vadd.f32 %v1777_v63, %v1091_v60 }
 0x181   : > { %v4044_v45 = vpack.c.bf16 %v1862_v22, %v1862_v22  ;;  %1982 = vst.msk [vmem:[#allocation2 + $0x31] sm:$0xff] %vm1979_vm9, %v1862_v22  ;;  %v1863_v15 = vadd.f32 %v4450_v50, %v5500_v9 }
 0x182   : > { %v4042_v39 = vpack.c.bf16 %v1860_v54, %v1860_v54  ;;  %1980 = vst.msk [vmem:[#allocation2 + $0x19] sm:$0xff] %vm1979_vm9, %v1860_v54  ;;  %v1861_v2 = vadd.f32 %v4451_v12, %v5500_v9 }
 0x183   : > { %1943 = vst.msk [vmem:[%s5506_s16 + $0x8] sm:$0xf] %vm1940_vm10, %v4044_v45  ;;  %v4045_v21 = vpack.c.bf16 %v1863_v15, %v1863_v15  ;;  %v2015_v45 = vld [vmem:[%s6143_s1] sm:$0x3] (!%p3964_p0) }
 0x184   : > { %1983 = vst.msk [vmem:[#allocation2 + $0x39] sm:$0xff] %vm1979_vm9, %v1863_v15  ;;  %v4043_v38 = vpack.c.bf16 %v1861_v2, %v1861_v2  ;;  %1981 = vst.msk [vmem:[#allocation2 + $0x21] sm:$0xff] %vm1979_vm9, %v1861_v2  ;;  %v4328_v24 = vpop.f32.mrb[4].mxu0  ;;  %v4783_v15 = vmov (!%p3964_p0), 0.0   ;;  %v2088_v2 = vsel (!%p3964_p0), %vm543_vm0, %v2015_v45, 0 }
 0x185   : > { %1941 = vst.msk [vmem:[%s5506_s16] sm:$0xf] %vm1940_vm10, %v4042_v39  ;;  %1944 = vst.msk [vmem:[%s5506_s16 + $0xc] sm:$0xf] %vm1940_vm10, %v4045_v21  ;;  %v4452_v26 = vadd.f32 %v4328_v24, %v4238_v10  ;;  %v1790_v18 = vpop.f32.mrb[5].mxu0  ;;  %4338 = vmatprep.subr.bf16.mxu0 (!%p3964_p0), %v4783_v15  ;;  %4344 = vmatprep.subr.bf16.mxu1 (!%p3964_p0), %v4783_v15 }
 0x186   : > { %1942 = vst.msk [vmem:[%s5506_s16 + $0x4] sm:$0xf] %vm1940_vm10, %v4043_v38  ;;  %v4453_v30 = vadd.f32 %v1790_v18, %v1104_v44  ;;  %v4329_v31 = vpop.f32.mrb[6].mxu0  ;;  %4345 = vmatpush3.bf16.msra.mxu1 (!%p3964_p0), %v2088_v2  ;;  %v3974_v21 = vld [vmem:[%s6143_s1 + $0x6] sm:$0x3] (!%p3964_p0)  ;;  %4340 = vmatprep.mubr.msk.bf16.mxu0 (!%p3964_p0), %vm4784_vm11, %v4783_v15 }
 0x187   : > { %v1866_v7 = vadd.f32 %v4452_v26, %v5500_v9  ;;  %v4454_v41 = vadd.f32 %v4329_v31, %v4239_v55  ;;  %v1793_v8 = vpop.f32.mrb[7].mxu0  ;;  %4346 = vmatprep.mubr.msk.bf16.mxu1 (!%p3964_p0), %vm4784_vm11, %v4783_v15  ;;  %4356 = vmatprep.subr.bf16.mxu1 (!%p3964_p0), %v4783_v15  ;;  %v2195_v38 = vsel (!%p3964_p0), %vm543_vm0, %v3974_v21, 0 }
 0x188   : > { %v1864_v56 = vadd.f32 %v4453_v30, %v5500_v9  ;;  %v4455_v61 = vadd.f32 %v1793_v8, %v1107_v59  ;;  %v3972_v8 = vld [vmem:[%s6143_s1 + $0x4] sm:$0x3] (!%p3964_p0) }
 0x189   : > { %v4048_v13 = vpack.c.bf16 %v1866_v7, %v1866_v7  ;;  %1986 = vst.msk [vmem:[#allocation2 + $0x61] sm:$0xff] %vm1979_vm9, %v1866_v7  ;;  %v1867_v28 = vadd.f32 %v4454_v41, %v5500_v9 }
 0x18a   : > { %v4046_v62 = vpack.c.bf16 %v1864_v56, %v1864_v56  ;;  %1984 = vst.msk [vmem:[#allocation2 + $0x49] sm:$0xff] %vm1979_vm9, %v1864_v56  ;;  %v1865_v20 = vadd.f32 %v4455_v61, %v5500_v9 }
 0x18b   : > { %1947 = vst.msk [vmem:[%s5506_s16 + $0x18] sm:$0xf] %vm1940_vm10, %v4048_v13  ;;  %v4049_v4 = vpack.c.bf16 %v1867_v28, %v1867_v28  ;;  %v3980_v13 = vld [vmem:[%s6143_s1 + $0xa] sm:$0x3] (!%p3964_p0) }
 0x18c   : > { %1987 = vst.msk [vmem:[#allocation2 + $0x69] sm:$0xff] %vm1979_vm9, %v1867_v28  ;;  %v4047_v14 = vpack.c.bf16 %v1865_v20, %v1865_v20  ;;  %1985 = vst.msk [vmem:[#allocation2 + $0x51] sm:$0xff] %vm1979_vm9, %v1865_v20  ;;  %v4332_v51 = vpop.f32.mrb[8].mxu0  ;;  %v2140_v28 = vsel (!%p3964_p0), %vm543_vm0, %v3972_v8, 0 }
 0x18d   : > { %1945 = vst.msk [vmem:[%s5506_s16 + $0x10] sm:$0xf] %vm1940_vm10, %v4046_v62  ;;  %1948 = vst.msk [vmem:[%s5506_s16 + $0x1c] sm:$0xf] %vm1940_vm10, %v4049_v4  ;;  %v4260_v57 = vpop.f32.mrb[8].mxu1  ;;  %v1806_v36 = vpop.f32.mrb[9].mxu0 }
 0x18e   : > { %1946 = vst.msk [vmem:[%s5506_s16 + $0x14] sm:$0xf] %vm1940_vm10, %v4047_v14  ;;  %v4456_v42 = vadd.f32 %v4332_v51, %v4260_v57  ;;  %v1268_v46 = vpop.f32.mrb[9].mxu1  ;;  %v4333_v0 = vpop.f32.mrb[10].mxu0  ;;  %v2312_v4 = vsel (!%p3964_p0), %vm543_vm0, %v3980_v13, 0 }
 0x18f   : > { %v4457_v1 = vadd.f32 %v1806_v36, %v1268_v46  ;;  %v4261_v29 = vpop.f32.mrb[10].mxu1  ;;  %v1809_v58 = vpop.f32.mrb[11].mxu0 }
 0x190   : > { %v1870_v34 = vadd.f32 %v4456_v42, %v5500_v9  ;;  %v4458_v23 = vadd.f32 %v4333_v0, %v4261_v29  ;;  %v1271_v16 = vpop.f32.mrb[11].mxu1  ;;  %v3977_v42 = vld [vmem:[%s6143_s1 + $0x8] sm:$0x3] (!%p3964_p0) }
 0x191   : > { %v1868_v48 = vadd.f32 %v4457_v1, %v5500_v9  ;;  %v4459_v52 = vadd.f32 %v1809_v58, %v1271_v16 }
 0x192   : > { %v4052_v53 = vpack.c.bf16 %v1870_v34, %v1870_v34  ;;  %1990 = vst.msk [vmem:[#allocation2 + $0x91] sm:$0xff] %vm1979_vm9, %v1870_v34  ;;  %v1871_v5 = vadd.f32 %v4458_v23, %v5500_v9 }
 0x193   : > { %v4050_v32 = vpack.c.bf16 %v1868_v48, %v1868_v48  ;;  %1988 = vst.msk [vmem:[#allocation2 + $0x79] sm:$0xff] %vm1979_vm9, %v1868_v48  ;;  %v1869_v37 = vadd.f32 %v4459_v52, %v5500_v9  ;;  %v3985_v48 = vld [vmem:[%s6143_s1 + $0xe] sm:$0x3] (!%p3964_p0)  ;;  %v2259_v52 = vsel (!%p3964_p0), %vm543_vm0, %v3977_v42, 0 }
 0x194   : > { %1951 = vst.msk [vmem:[%s5506_s16 + $0x28] sm:$0xf] %vm1940_vm10, %v4052_v53  ;;  %v4053_v49 = vpack.c.bf16 %v1871_v5, %v1871_v5  ;;  %v4336_v25 = vpop.f32.mrb[12].mxu0 }
 0x195   : > { %1991 = vst.msk [vmem:[#allocation2 + $0x99] sm:$0xff] %vm1979_vm9, %v1871_v5  ;;  %v4051_v43 = vpack.c.bf16 %v1869_v37, %v1869_v37  ;;  %1989 = vst.msk [vmem:[#allocation2 + $0x81] sm:$0xff] %vm1979_vm9, %v1869_v37  ;;  %v4264_v19 = vpop.f32.mrb[12].mxu1  ;;  %v1822_v33 = vpop.f32.mrb[13].mxu0 }
 0x196   : > { %1949 = vst.msk [vmem:[%s5506_s16 + $0x20] sm:$0xf] %vm1940_vm10, %v4050_v32  ;;  %1952 = vst.msk [vmem:[%s5506_s16 + $0x2c] sm:$0xf] %vm1940_vm10, %v4053_v49  ;;  %v4460_v11 = vadd.f32 %v4336_v25, %v4264_v19  ;;  %v1284_v40 = vpop.f32.mrb[13].mxu1  ;;  %v4337_v60 = vpop.f32.mrb[14].mxu0 }
 0x197   : > { %1950 = vst.msk [vmem:[%s5506_s16 + $0x24] sm:$0xf] %vm1940_vm10, %v4051_v43  ;;  %v4461_v10 = vadd.f32 %v1822_v33, %v1284_v40  ;;  %v4265_v44 = vpop.f32.mrb[14].mxu1  ;;  %v1825_v55 = vpop.f32.mrb[15].mxu0  ;;  %v2431_v49 = vsel (!%p3964_p0), %vm543_vm0, %v3985_v48, 0 }
 0x198   : > { %v1874_v59 = vadd.f32 %v4460_v11, %v5500_v9  ;;  %v4462_v27 = vadd.f32 %v4337_v60, %v4265_v44  ;;  %v1287_v35 = vpop.f32.mrb[15].mxu1  ;;  %v3982_v19 = vld [vmem:[%s6143_s1 + $0xc] sm:$0x3] (!%p3964_p0)  ;;  %v3988_v44 = vld [vmem:[%s6143_s1 + $0x10] sm:$0x3] (!%p3964_p0) }
 0x199   : > { %v1872_v47 = vadd.f32 %v4461_v10, %v5500_v9  ;;  %v4463_v6 = vadd.f32 %v1825_v55, %v1287_v35  ;;  %2001 = sbr.rel (%p3964_p0) target bundleno = 675 (0x2a3), region = 40  ;;  %v2367_v60 = vsel (!%p3964_p0), %vm543_vm0, %v3982_v19, 0  ;;  %v2484_v55 = vsel (!%p3964_p0), %vm543_vm0, %v3988_v44, 0 }
 0x19a   : > { %v4056_v17 = vpack.c.bf16 %v1874_v59, %v1874_v59  ;;  %1994 = vst.msk [vmem:[#allocation2 + $0xc1] sm:$0xff] %vm1979_vm9, %v1874_v59  ;;  %v1875_v22 = vadd.f32 %v4462_v27, %v5500_v9 }
 0x19b   : > { %v4054_v50 = vpack.c.bf16 %v1872_v47, %v1872_v47  ;;  %1992 = vst.msk [vmem:[#allocation2 + $0xa9] sm:$0xff] %vm1979_vm9, %v1872_v47  ;;  %v1873_v63 = vadd.f32 %v4463_v6, %v5500_v9  ;;  %v3967_v9 = vld [vmem:[%s6143_s1 + $0x2] sm:$0x3] (!%p3964_p0) }
 0x19c   : > { %1955 = vst.msk [vmem:[%s5506_s16 + $0x38] sm:$0xf] %vm1940_vm10, %v4056_v17  ;;  %v4057_v54 = vpack.c.bf16 %v1875_v22, %v1875_v22  ;;  %v2042_v39 = vsel (!%p3964_p0), %vm543_vm0, %v3967_v9, 0 }
 0x19d   : > { %1995 = vst.msk [vmem:[#allocation2 + $0xc9] sm:$0xff] %vm1979_vm9, %v1875_v22  ;;  %v4055_v12 = vpack.c.bf16 %v1873_v63, %v1873_v63  ;;  %1993 = vst.msk [vmem:[#allocation2 + $0xb1] sm:$0xff] %vm1979_vm9, %v1873_v63  ;;  %4339 = vmatpush3.bf16.msra.mxu0 (!%p3964_p0), %v2042_v39 }
 0x19e   : > { %1953 = vst.msk [vmem:[%s5506_s16 + $0x30] sm:$0xf] %vm1940_vm10, %v4054_v50  ;;  %1956 = vst.msk [vmem:[%s5506_s16 + $0x3c] sm:$0xf] %vm1940_vm10, %v4057_v54  ;;  %4350 = vmatprep.subr.bf16.mxu0 (!%p3964_p0), %v4783_v15 }
 0x19f   : > { %1954 = vst.msk [vmem:[%s5506_s16 + $0x34] sm:$0xf] %vm1940_vm10, %v4055_v12  ;;  %s5595_s16 = scalar_lea.vmem (!%p3964_p0), %s4927_s14, %s4058_s17 }
 0x1a0   : > { %v4674_v24 = vld [vmem:[%s5595_s16] sm:$0xff]   ;;  %v4675_v26 = vld [vmem:[%s5595_s16 + $0x8] ss:$0 sps:$4 sm:$0x11]   ;;  %v4676_v61 = vld [vmem:[%s5595_s16 + $0xc] sm:$0xff]  }
 0x1a1   : > { %v2027_v18 = vshrl.u32 %v4674_v24, 16  ;;  %v2029_v30 = vshll.u32 %v4674_v24, 16  ;;  %v2034_v31 = vshll.u32 %v4675_v26, 16  ;;  %4347 = vmatmul.mubr.msk.bf16.vlgmr.msra.gmra.mrb[0].mxu1 %vm518_vm3, %v4674_v24  ;;  %v4678_v20 = vld [vmem:[%s5595_s16 + $0x18] sm:$0xff]   ;;  %v2133_v14 = vrot.slane %v4674_v24, 1 }
 0x1a2   : > { %4357 = vmatpush3.bf16.msra.mxu1 %v2195_v38  ;;  %4358 = vmatprep.mubr.msk.bf16.mxu1 %vm4784_vm11, %v4783_v15  ;;  %v2134_v51 = vrot.slane %v4675_v26, 1  ;;  %v4677_v57 = vld [vmem:[%s5595_s16 + $0x14] ss:$0 sps:$4 sm:$0x11]   ;;  %v2246_v36 = vshll.u32 %v4676_v61, 16  ;;  %v2305_v46 = vrot.slane %v4676_v61, 1 }
 0x1a3   : > { %v2031_v7 = vrot.slane %v2029_v30, 1  ;;  %v2036_v41 = vrot.slane %v2034_v31, 1  ;;  %4368 = vmatprep.subr.bf16.mxu1 %v4783_v15  ;;  %v2306_v0 = vrot.slane %v4677_v57, 1  ;;  %v4679_v1 = vld [vmem:[%s5595_s16 + $0x20] ss:$0 sps:$4 sm:$0x11]  }
 0x1a4   : > { %v2418_v29 = vshll.u32 %v4678_v20, 16  ;;  %v2135_v58 = vsel %vm2132_vm13, %v2133_v14, %v2134_v51  ;;  %v2244_v34 = vshrl.u32 %v4676_v61, 16  ;;  %v2248_v23 = vrot.slane %v2246_v36, 1 }
 0x1a5   : > { %v2032_v56 = vor.u32 %v2031_v7, %v2027_v18  ;;  %v2251_v16 = vshll.u32 %v4677_v57, 16  ;;  %v2307_v53 = vsel %vm2132_vm13, %v2305_v46, %v2306_v0  ;;  %v2416_v5 = vshrl.u32 %v4678_v20, 16 }
 0x1a6   : > { %v2420_v32 = vrot.slane %v2418_v29, 1  ;;  %v2423_v37 = vshll.u32 %v4679_v1, 16  ;;  %v2249_v25 = vor.u32 %v2248_v23, %v2244_v34  ;;  %v2477_v59 = vrot.slane %v4678_v20, 1 }
 0x1a7   : > { %v2037_v62 = vsel %vm2025_vm12, %v2032_v56, %v2036_v41  ;;  %v2253_v43 = vrot.slane %v2251_v16, 1  ;;  %v2478_v27 = vrot.slane %v4679_v1, 1 }
 0x1a8   : > { %4341 = vmatmul.mubr.msk.bf16.vlgmr.msra.gmra.mrb[0].mxu0 %vm518_vm3, %v2037_v62  ;;  %v2421_v33 = vor.u32 %v2420_v32, %v2416_v5  ;;  %v2425_v11 = vrot.slane %v2423_v37, 1  ;;  %v3990_v32 = vld [vmem:[%s6144_s2] ss:$0 sm:$0xff] }
 0x1a9   : > { %4351 = vmatpush3.bf16.msra.mxu0 %v2140_v28  ;;  %4352 = vmatprep.mubr.msk.bf16.mxu0 %vm4784_vm11, %v4783_v15  ;;  %v2254_v40 = vsel %vm2025_vm12, %v2249_v25, %v2253_v43  ;;  %v2479_v35 = vsel %vm2132_vm13, %v2477_v59, %v2478_v27 }
 0x1aa   : > { %4362 = vmatprep.subr.bf16.mxu0 %v4783_v15  ;;  %4359 = vmatmul.mubr.msk.bf16.vlgmr.msra.gmra.mrb[4].mxu1 %vm518_vm3, %v4676_v61  ;;  %v2426_v10 = vsel %vm2025_vm12, %v2421_v33, %v2425_v11 }
 0x1ab   : > { %4369 = vmatpush3.bf16.msra.mxu1 %v2312_v4  ;;  %4370 = vmatprep.mubr.msk.bf16.mxu1 %vm4784_vm11, %v4783_v15 }
 0x1ac   : > { %4380 = vmatprep.subr.bf16.mxu1 %v4783_v15 }
 0x1b0   : > { %4353 = vmatmul.mubr.msk.bf16.vlgmr.msra.gmra.mrb[4].mxu0 %vm518_vm3, %v2135_v58 }
 0x1b1   : > { %4363 = vmatpush3.bf16.msra.mxu0 %v2259_v52  ;;  %4364 = vmatprep.mubr.msk.bf16.mxu0 %vm4784_vm11, %v4783_v15 }
 0x1b2   : > { %4374 = vmatprep.subr.bf16.mxu0 %v4783_v15  ;;  %4371 = vmatmul.mubr.msk.bf16.vlgmr.msra.gmra.mrb[8].mxu1 %vm518_vm3, %v2307_v53 }
 0x1b3   : > { %4381 = vmatpush3.bf16.msra.mxu1 %v2431_v49  ;;  %4382 = vmatprep.mubr.msk.bf16.mxu1 %vm4784_vm11, %v4783_v15 }
 0x1b8   : > { %4365 = vmatmul.mubr.msk.bf16.vlgmr.msra.gmra.mrb[8].mxu0 %vm518_vm3, %v2254_v40 }
 0x1b9   : > { %4375 = vmatpush3.bf16.msra.mxu0 %v2367_v60  ;;  %4376 = vmatprep.mubr.msk.bf16.mxu0 %vm4784_vm11, %v4783_v15 }
 0x1ba   : > { %4386 = vmatprep.subr.bf16.mxu0 %v4783_v15  ;;  %4383 = vmatmul.mubr.msk.bf16.vlgmr.msra.gmra.mrb[12].mxu1 %vm518_vm3, %v2426_v10 }
 0x1c0   : > { %4377 = vmatmul.mubr.msk.bf16.vlgmr.msra.gmra.mrb[12].mxu0 %vm518_vm3, %v4678_v20 }
 0x1c1   : > { %4387 = vmatpush3.bf16.msra.mxu0 %v2484_v55  ;;  %4388 = vmatprep.mubr.msk.bf16.mxu0 %vm4784_vm11, %v4783_v15 }
 0x1c8   : > { %4389 = vmatmul.mubr.msk.bf16.vlgmr.msra.gmra.mrb[16].mxu0 %vm518_vm3, %v2479_v35 }
 0x274   : > { %v2124_v47 = vpop.f32.mrb[0].mxu1 }
 0x275   : > { %v4348_v6 = vpop.f32.mrb[1].mxu1 }
 0x276   : > { %v2127_v17 = vpop.f32.mrb[2].mxu1 }
 0x277   : > { %v4349_v22 = vpop.f32.mrb[3].mxu1 }
 0x27b   : > { %v2078_v50 = vpop.f32.mrb[0].mxu0 }
 0x27c   : > { %v2125_v63 = vadd.f32 %v2124_v47, %v2078_v50  ;;  %v4342_v54 = vpop.f32.mrb[1].mxu0 }
 0x27d   : > { %v2081_v12 = vpop.f32.mrb[2].mxu0  ;;  %v2231_v9 = vpop.f32.mrb[4].mxu1 }
 0x27e   : > { %v2128_v45 = vadd.f32 %v2127_v17, %v2081_v12  ;;  %v4343_v39 = vpop.f32.mrb[3].mxu0  ;;  %v4360_v2 = vpop.f32.mrb[5].mxu1 }
 0x27f   : > { %v2234_v21 = vpop.f32.mrb[6].mxu1 }
 0x280   : > { %v4361_v15 = vpop.f32.mrb[7].mxu1 }
 0x283   : > { %v2176_v38 = vpop.f32.mrb[4].mxu0 }
 0x284   : > { %v2183_v24 = vadd.f32 %v2176_v38, %v2125_v63  ;;  %v4354_v26 = vpop.f32.mrb[5].mxu0 }
 0x285   : > { %v2179_v18 = vpop.f32.mrb[6].mxu0  ;;  %v2348_v30 = vpop.f32.mrb[8].mxu1 }
 0x286   : > { %v2184_v31 = vadd.f32 %v2179_v18, %v2128_v45  ;;  %v2238_v7 = vadd.f32 %v2231_v9, %v2183_v24  ;;  %v4355_v41 = vpop.f32.mrb[7].mxu0  ;;  %v4372_v8 = vpop.f32.mrb[9].mxu1 }
 0x287   : > { %v2351_v56 = vpop.f32.mrb[10].mxu1 }
 0x288   : > { %v2239_v61 = vadd.f32 %v2234_v21, %v2184_v31  ;;  %v4373_v13 = vpop.f32.mrb[11].mxu1 }
 0x28b   : > { %v2295_v28 = vpop.f32.mrb[8].mxu0 }
 0x28c   : > { %v2302_v62 = vadd.f32 %v2295_v28, %v2238_v7  ;;  %v4366_v20 = vpop.f32.mrb[9].mxu0 }
 0x28d   : > { %v2298_v4 = vpop.f32.mrb[10].mxu0  ;;  %v2467_v14 = vpop.f32.mrb[12].mxu1 }
 0x28e   : > { %v2303_v51 = vadd.f32 %v2298_v4, %v2239_v61  ;;  %v2355_v57 = vadd.f32 %v2348_v30, %v2302_v62  ;;  %v4367_v36 = vpop.f32.mrb[11].mxu0  ;;  %v4384_v42 = vpop.f32.mrb[13].mxu1 }
 0x28f   : > { %v2470_v46 = vpop.f32.mrb[14].mxu1 }
 0x290   : > { %v2356_v0 = vadd.f32 %v2351_v56, %v2303_v51  ;;  %v4385_v1 = vpop.f32.mrb[15].mxu1 }
 0x293   : > { %v2403_v29 = vpop.f32.mrb[12].mxu0 }
 0x294   : > { %v2410_v58 = vadd.f32 %v2403_v29, %v2355_v57  ;;  %v4378_v34 = vpop.f32.mrb[13].mxu0 }
 0x295   : > { %v2406_v23 = vpop.f32.mrb[14].mxu0 }
 0x296   : > { %v2411_v16 = vadd.f32 %v2406_v23, %v2356_v0  ;;  %v2474_v48 = vadd.f32 %v2467_v14, %v2410_v58  ;;  %v4379_v52 = vpop.f32.mrb[15].mxu0 }
 0x298   : > { %v2475_v53 = vadd.f32 %v2470_v46, %v2411_v16 }
 0x29b   : > { %v2520_v5 = vpop.f32.mrb[16].mxu0 }
 0x29c   : > { %v2527_v37 = vadd.f32 %v2520_v5, %v2474_v48  ;;  %v4390_v49 = vpop.f32.mrb[17].mxu0 }
 0x29d   : > { %v2523_v25 = vpop.f32.mrb[18].mxu0 }
 0x29e   : > { %v2536_v43 = vadd.f32 %v3990_v32, %v2527_v37  ;;  %v2528_v19 = vadd.f32 %v2523_v25, %v2475_v53  ;;  %v4391_v33 = vpop.f32.mrb[19].mxu0 }
 0x2a0   : > { %2538 = vst.msk [vmem:[#allocation2 + $0x1] sm:$0xff] %vm1979_vm9, %v2536_v43  ;;  %v2537_v11 = vadd.f32 %v3990_v32, %v2528_v19 }
 0x2a2   : > { %2539 = vst.msk [vmem:[#allocation2 + $0x9] sm:$0xff] %vm1979_vm9, %v2537_v11 }
 0x2a3 PF: > { %2541 = vst.msk [vmem:[#allocation2 + $0xd9] sm:$0xff] %vm1979_vm9, %v4782_v3  ;;  %2542 = vst.msk [vmem:[#allocation2 + $0xe1] sm:$0xff] %vm1979_vm9, %v4782_v3  ;;  %p3991_p1 = scmp.ge.s32.totalorder %s4764_s21, 1 }
 0x2a4   : > { %v4003_v40 = vld [vmem:[%s6143_s1 + $0x2] sm:$0x3] (!%p3991_p1)  ;;  %v2560_v60 = vld [vmem:[%s6143_s1] sm:$0x3] (!%p3991_p1)  ;;  %v4785_v10 = vmov (!%p3991_p1), 0.0   ;;  %vm4786_vm14 = vmmov (!%p3991_p1), 0  }
 0x2a5   : > { %2546 = sbr.rel (%p3991_p1) target bundleno = 937 (0x3a9), region = 44  ;;  %4392 = vmatprep.subr.bf16.mxu0 (!%p3991_p1), %v4785_v10  ;;  %v2587_v44 = vsel (!%p3991_p1), %vm543_vm0, %v4003_v40, 0  ;;  %4398 = vmatprep.subr.bf16.mxu1 (!%p3991_p1), %v4785_v10  ;;  %v2633_v3 = vsel (!%p3991_p1), %vm543_vm0, %v2560_v60, 0  ;;  %v4680_v55 = vld [vmem:[%s4930_s10 + $0x60] sm:$0xff] (!%p3991_p1)   ;;  %vm2570_vm15 = vsmask.f32 (!%p3991_p1), 7424 }
 0x2a6   : > { %4393 = vmatpush3.bf16.msra.mxu0 (!%p3991_p1), %v2587_v44  ;;  %4399 = vmatpush3.bf16.msra.mxu1 (!%p3991_p1), %v2633_v3  ;;  %v4681_v59 = vld [vmem:[%s4930_s10 + $0x68] ss:$0 sps:$4 sm:$0x11] (!%p3991_p1)   ;;  %v4010_v27 = vld [vmem:[%s6143_s1 + $0x6] sm:$0x3] (!%p3991_p1)  ;;  %v2572_v35 = vshrl.u32 (!%p3991_p1), %v4680_v55, 16 }
 0x2a7   : > { %4394 = vmatprep.mubr.msk.bf16.mxu0 (!%p3991_p1), %vm4786_vm14, %v4785_v10  ;;  %4400 = vmatprep.mubr.msk.bf16.mxu1 (!%p3991_p1), %vm4786_vm14, %v4785_v10  ;;  %v2574_v47 = vshll.u32 (!%p3991_p1), %v4680_v55, 16  ;;  %v2579_v6 = vshll.u32 (!%p3991_p1), %v4681_v59, 16  ;;  %v2740_v17 = vsel (!%p3991_p1), %vm543_vm0, %v4010_v27, 0  ;;  %v4008_v63 = vld [vmem:[%s6143_s1 + $0x4] sm:$0x3] (!%p3991_p1)  ;;  %v4682_v12 = vld [vmem:[%s4930_s10 + $0x6c] sm:$0xff] (!%p3991_p1)  }
 0x2a8   : > { %4404 = vmatprep.subr.bf16.mxu0 (!%p3991_p1), %v4785_v10  ;;  %4410 = vmatprep.subr.bf16.mxu1 (!%p3991_p1), %v4785_v10  ;;  %v4016_v9 = vld [vmem:[%s6143_s1 + $0xa] sm:$0x3] (!%p3991_p1)  ;;  %v2685_v45 = vsel (!%p3991_p1), %vm543_vm0, %v4008_v63, 0  ;;  %v4684_v2 = vld [vmem:[%s4930_s10 + $0x78] sm:$0xff] (!%p3991_p1)   ;;  %v2678_v15 = vrot.slane (!%p3991_p1), %v4680_v55, 1  ;;  %v2679_v38 = vrot.slane (!%p3991_p1), %v4681_v59, 1 }
 0x2a9   : > { %4401 = vmatmul.mubr.msk.bf16.vlgmr.msra.gmra.mrb[0].mxu1 (!%p3991_p1), %vm518_vm3, %v4680_v55  ;;  %v2576_v22 = vrot.slane (!%p3991_p1), %v2574_v47, 1  ;;  %v2581_v50 = vrot.slane (!%p3991_p1), %v2579_v6, 1  ;;  %v2857_v21 = vsel (!%p3991_p1), %vm543_vm0, %v4016_v9, 0  ;;  %v4683_v24 = vld [vmem:[%s4930_s10 + $0x74] ss:$0 sps:$4 sm:$0x11] (!%p3991_p1)  }
 0x2aa   : > { %4411 = vmatpush3.bf16.msra.mxu1 (!%p3991_p1), %v2740_v17  ;;  %4412 = vmatprep.mubr.msk.bf16.mxu1 (!%p3991_p1), %vm4786_vm14, %v4785_v10  ;;  %v2791_v26 = vshll.u32 (!%p3991_p1), %v4682_v12, 16  ;;  %vm2677_vm1 = vcmask (!%p3991_p1), 1046528   ;;  %v4013_v18 = vld [vmem:[%s6143_s1 + $0x8] sm:$0x3] (!%p3991_p1)  ;;  %v2850_v30 = vrot.slane (!%p3991_p1), %v4682_v12, 1  ;;  %v2851_v31 = vrot.slane (!%p3991_p1), %v4683_v24, 1 }
 0x2ab   : > { %4422 = vmatprep.subr.bf16.mxu1 (!%p3991_p1), %v4785_v10  ;;  %v2577_v54 = vor.u32 (!%p3991_p1), %v2576_v22, %v2572_v35  ;;  %v4685_v7 = vld [vmem:[%s4930_s10 + $0x80] ss:$0 sps:$4 sm:$0x11] (!%p3991_p1)   ;;  %v2963_v41 = vshll.u32 (!%p3991_p1), %v4684_v2, 16  ;;  %v2680_v8 = vsel (!%p3991_p1), %vm2677_vm1, %v2678_v15, %v2679_v38  ;;  %v2789_v56 = vshrl.u32 (!%p3991_p1), %v4682_v12, 16 }
 0x2ac   : > { %v2793_v61 = vrot.slane %v2791_v26, 1  ;;  %v2796_v13 = vshll.u32 %v4683_v24, 16  ;;  %v4021_v28 = vld [vmem:[%s6143_s1 + $0xe] sm:$0x3]  ;;  %v2804_v62 = vsel %vm543_vm0, %v4013_v18, 0  ;;  %v2852_v20 = vsel %vm2677_vm1, %v2850_v30, %v2851_v31 }
 0x2ad   : > { %v2582_v39 = vsel %vm2570_vm15, %v2577_v54, %v2581_v50  ;;  %v2961_v4 = vshrl.u32 %v4684_v2, 16  ;;  %v2965_v14 = vrot.slane %v2963_v41, 1  ;;  %v2968_v51 = vshll.u32 %v4685_v7, 16  ;;  %v4018_v46 = vld [vmem:[%s6143_s1 + $0xc] sm:$0x3] }
 0x2ae   : > { %4395 = vmatmul.mubr.msk.bf16.vlgmr.msra.gmra.mrb[0].mxu0 %vm518_vm3, %v2582_v39  ;;  %v2976_v57 = vsel %vm543_vm0, %v4021_v28, 0  ;;  %v2794_v36 = vor.u32 %v2793_v61, %v2789_v56  ;;  %v2798_v42 = vrot.slane %v2796_v13, 1  ;;  %v2912_v58 = vsel %vm543_vm0, %v4018_v46, 0  ;;  %v4024_v23 = vld [vmem:[%s6143_s1 + $0x10] sm:$0x3] }
 0x2af   : > { %4405 = vmatpush3.bf16.msra.mxu0 %v2685_v45  ;;  %4406 = vmatprep.mubr.msk.bf16.mxu0 %vm4786_vm14, %v4785_v10  ;;  %v2966_v0 = vor.u32 %v2965_v14, %v2961_v4  ;;  %v2970_v1 = vrot.slane %v2968_v51, 1  ;;  %v3029_v16 = vsel %vm543_vm0, %v4024_v23, 0  ;;  %v3022_v48 = vrot.slane %v4684_v2, 1  ;;  %v4026_v4 = vld [vmem:[%s6144_s2] ss:$0 sm:$0xff] }
 0x2b0   : > { %4416 = vmatprep.subr.bf16.mxu0 %v4785_v10  ;;  %v2799_v29 = vsel %vm2570_vm15, %v2794_v36, %v2798_v42  ;;  %v3023_v52 = vrot.slane %v4685_v7, 1 }
 0x2b1   : > { %4413 = vmatmul.mubr.msk.bf16.vlgmr.msra.gmra.mrb[4].mxu1 %vm518_vm3, %v4682_v12  ;;  %v2971_v34 = vsel %vm2570_vm15, %v2966_v0, %v2970_v1 }
 0x2b2   : > { %4423 = vmatpush3.bf16.msra.mxu1 %v2857_v21  ;;  %4424 = vmatprep.mubr.msk.bf16.mxu1 %vm4786_vm14, %v4785_v10  ;;  %v3024_v53 = vsel %vm2677_vm1, %v3022_v48, %v3023_v52 }
 0x2b3   : > { %4434 = vmatprep.subr.bf16.mxu1 %v4785_v10 }
 0x2b6   : > { %4407 = vmatmul.mubr.msk.bf16.vlgmr.msra.gmra.mrb[4].mxu0 %vm518_vm3, %v2680_v8 }
 0x2b7   : > { %4417 = vmatpush3.bf16.msra.mxu0 %v2804_v62  ;;  %4418 = vmatprep.mubr.msk.bf16.mxu0 %vm4786_vm14, %v4785_v10 }
 0x2b8   : > { %4428 = vmatprep.subr.bf16.mxu0 %v4785_v10 }
 0x2b9   : > { %4425 = vmatmul.mubr.msk.bf16.vlgmr.msra.gmra.mrb[8].mxu1 %vm518_vm3, %v2852_v20 }
 0x2ba   : > { %4435 = vmatpush3.bf16.msra.mxu1 %v2976_v57  ;;  %4436 = vmatprep.mubr.msk.bf16.mxu1 %vm4786_vm14, %v4785_v10 }
 0x2be   : > { %4419 = vmatmul.mubr.msk.bf16.vlgmr.msra.gmra.mrb[8].mxu0 %vm518_vm3, %v2799_v29 }
 0x2bf   : > { %4429 = vmatpush3.bf16.msra.mxu0 %v2912_v58  ;;  %4430 = vmatprep.mubr.msk.bf16.mxu0 %vm4786_vm14, %v4785_v10 }
 0x2c0   : > { %4440 = vmatprep.subr.bf16.mxu0 %v4785_v10 }
 0x2c1   : > { %4437 = vmatmul.mubr.msk.bf16.vlgmr.msra.gmra.mrb[12].mxu1 %vm518_vm3, %v2971_v34 }
 0x2c6   : > { %4431 = vmatmul.mubr.msk.bf16.vlgmr.msra.gmra.mrb[12].mxu0 %vm518_vm3, %v4684_v2 }
 0x2c7   : > { %4441 = vmatpush3.bf16.msra.mxu0 %v3029_v16  ;;  %4442 = vmatprep.mubr.msk.bf16.mxu0 %vm4786_vm14, %v4785_v10 }
 0x2ce   : > { %4443 = vmatmul.mubr.msk.bf16.vlgmr.msra.gmra.mrb[16].mxu0 %vm518_vm3, %v3024_v53 }
 0x37c   : > { %v2669_v5 = vpop.f32.mrb[0].mxu1 }
 0x37d   : > { %v4402_v32 = vpop.f32.mrb[1].mxu1 }
 0x37e   : > { %v2672_v37 = vpop.f32.mrb[2].mxu1 }
 0x37f   : > { %v4403_v49 = vpop.f32.mrb[3].mxu1 }
 0x381   : > { %v2623_v25 = vpop.f32.mrb[0].mxu0 }
 0x382   : > { %v2670_v43 = vadd.f32 %v2669_v5, %v2623_v25  ;;  %v4396_v19 = vpop.f32.mrb[1].mxu0 }
 0x383   : > { %v2626_v33 = vpop.f32.mrb[2].mxu0 }
 0x384   : > { %v2776_v11 = vpop.f32.mrb[4].mxu1  ;;  %v2673_v40 = vadd.f32 %v2672_v37, %v2626_v33  ;;  %v4397_v60 = vpop.f32.mrb[3].mxu0 }
 0x385   : > { %v4414_v44 = vpop.f32.mrb[5].mxu1 }
 0x386   : > { %v2779_v3 = vpop.f32.mrb[6].mxu1 }
 0x387   : > { %v4415_v10 = vpop.f32.mrb[7].mxu1 }
 0x389   : > { %v2721_v55 = vpop.f32.mrb[4].mxu0 }
 0x38a   : > { %v2728_v59 = vadd.f32 %v2721_v55, %v2670_v43  ;;  %v4408_v27 = vpop.f32.mrb[5].mxu0 }
 0x38b   : > { %v2724_v35 = vpop.f32.mrb[6].mxu0 }
 0x38c   : > { %v2893_v47 = vpop.f32.mrb[8].mxu1  ;;  %v2729_v6 = vadd.f32 %v2724_v35, %v2673_v40  ;;  %v2783_v17 = vadd.f32 %v2776_v11, %v2728_v59  ;;  %v4409_v22 = vpop.f32.mrb[7].mxu0 }
 0x38d   : > { %v4426_v50 = vpop.f32.mrb[9].mxu1 }
 0x38e   : > { %v2896_v63 = vpop.f32.mrb[10].mxu1  ;;  %v2784_v54 = vadd.f32 %v2779_v3, %v2729_v6 }
 0x38f   : > { %v4427_v12 = vpop.f32.mrb[11].mxu1 }
 0x391   : > { %v2840_v9 = vpop.f32.mrb[8].mxu0 }
 0x392   : > { %v2847_v45 = vadd.f32 %v2840_v9, %v2783_v17  ;;  %v4420_v39 = vpop.f32.mrb[9].mxu0 }
 0x393   : > { %v2843_v2 = vpop.f32.mrb[10].mxu0 }
 0x394   : > { %v3012_v21 = vpop.f32.mrb[12].mxu1  ;;  %v2848_v15 = vadd.f32 %v2843_v2, %v2784_v54  ;;  %v2900_v38 = vadd.f32 %v2893_v47, %v2847_v45  ;;  %v4421_v24 = vpop.f32.mrb[11].mxu0 }
 0x395   : > { %v4438_v26 = vpop.f32.mrb[13].mxu1 }
 0x396   : > { %v3015_v18 = vpop.f32.mrb[14].mxu1  ;;  %v2901_v30 = vadd.f32 %v2896_v63, %v2848_v15 }
 0x397   : > { %v4439_v31 = vpop.f32.mrb[15].mxu1 }
 0x399   : > { %v2948_v7 = vpop.f32.mrb[12].mxu0 }
 0x39a   : > { %v2955_v41 = vadd.f32 %v2948_v7, %v2900_v38  ;;  %v4432_v8 = vpop.f32.mrb[13].mxu0 }
 0x39b   : > { %v2951_v56 = vpop.f32.mrb[14].mxu0 }
 0x39c   : > { %v2956_v61 = vadd.f32 %v2951_v56, %v2901_v30  ;;  %v3019_v13 = vadd.f32 %v3012_v21, %v2955_v41  ;;  %v4433_v28 = vpop.f32.mrb[15].mxu0 }
 0x39e   : > { %v3020_v62 = vadd.f32 %v3015_v18, %v2956_v61 }
 0x3a1   : > { %v3065_v20 = vpop.f32.mrb[16].mxu0 }
 0x3a2   : > { %v3072_v14 = vadd.f32 %v3065_v20, %v3019_v13  ;;  %v4444_v51 = vpop.f32.mrb[17].mxu0 }
 0x3a3   : > { %v3068_v57 = vpop.f32.mrb[18].mxu0 }
 0x3a4   : > { %v3081_v36 = vadd.f32 %v4026_v4, %v3072_v14  ;;  %v3073_v42 = vadd.f32 %v3068_v57, %v3020_v62  ;;  %v4445_v46 = vpop.f32.mrb[19].mxu0 }
 0x3a6   : > { %3083 = vst.msk [vmem:[#allocation2 + $0xd9] sm:$0xff] %vm1979_vm9, %v3081_v36  ;;  %v3082_v0 = vadd.f32 %v4026_v4, %v3073_v42 }
 0x3a8   : > { %3084 = vst.msk [vmem:[#allocation2 + $0xe1] sm:$0xff] %vm1979_vm9, %v3082_v0 }
 0x3a9 PF: > { %v4027_v1 = vld [vmem:[%s6145_s3] ss:$0 sm:$0xff]  ;;  %v3087_v58 = vld [vmem:[#allocation2 + $0x8] sm:$0xff]  ;;  %v5765_v34 = vld [vmem:[#allocation2 + $0x18] sm:$0xff]  ;;  %p4036_p2 = scmp.ne.s32.totalorder %s4764_s21, 0 }
 0x3aa   : > { %v3086_v29 = vld [vmem:[#allocation2] sm:$0xff]  ;;  %v5769_v16 = vld [vmem:[#allocation2 + $0x30] sm:$0xff]  ;;  %v5771_v48 = vld [vmem:[#allocation2 + $0x38] sm:$0xff]  ;;  %v3107_v25 = vmul.f32 %v4027_v1, %v3087_v58  ;;  %v3108_v11 = vmul.f32 %v4027_v1, %v5765_v34  ;;  %vm3567_vm0 = vcmask (!%p4036_p2), 58368  }
 0x3ab   : > { %v5767_v23 = vld [vmem:[#allocation2 + $0x20] sm:$0xff]  ;;  %v5773_v52 = vld [vmem:[#allocation2 + $0x48] sm:$0xff]  ;;  %v5775_v53 = vld [vmem:[#allocation2 + $0x50] sm:$0xff]  ;;  %v3106_v49 = vmul.f32 %v4027_v1, %v3086_v29  ;;  %v3110_v60 = vmul.f32 %v4027_v1, %v5769_v16  ;;  %v3111_v44 = vmul.f32 %v4027_v1, %v5771_v48 }
 0x3ac   : > { %v5777_v5 = vld [vmem:[#allocation2 + $0x60] sm:$0xff]  ;;  %v5779_v32 = vld [vmem:[#allocation2 + $0x68] sm:$0xff]  ;;  %v5781_v37 = vld [vmem:[#allocation2 + $0x78] sm:$0xff]  ;;  %v3109_v40 = vmul.f32 %v4027_v1, %v5767_v23  ;;  %v3112_v55 = vmul.f32 %v4027_v1, %v5773_v52  ;;  %v3113_v59 = vmul.f32 %v4027_v1, %v5775_v53 }
 0x3ad   : > { %v5783_v43 = vld [vmem:[#allocation2 + $0x80] sm:$0xff]  ;;  %v5785_v19 = vld [vmem:[#allocation2 + $0x90] sm:$0xff]  ;;  %v5787_v33 = vld [vmem:[#allocation2 + $0x98] sm:$0xff]  ;;  %v3114_v27 = vmul.f32 %v4027_v1, %v5777_v5  ;;  %v3115_v35 = vmul.f32 %v4027_v1, %v5779_v32  ;;  %v3116_v6 = vmul.f32 %v4027_v1, %v5781_v37 }
 0x3ae   : > { %v5793_v3 = vld [vmem:[#allocation2 + $0xa8] sm:$0xff]  ;;  %v5795_v10 = vld [vmem:[#allocation2 + $0xb0] sm:$0xff]  ;;  %v4028_v47 = vld [vmem:[%s6145_s3 + $0x1] ss:$0 sm:$0xff]  ;;  %v3117_v17 = vmul.f32 %v4027_v1, %v5783_v43  ;;  %v3118_v22 = vmul.f32 %v4027_v1, %v5785_v19  ;;  %v3119_v50 = vmul.f32 %v4027_v1, %v5787_v33 }
 0x3af   : > { %v3139_v63 = vld [vmem:[#allocation2 + $0x1] sm:$0xff]  ;;  %v3140_v54 = vld [vmem:[#allocation2 + $0x9] sm:$0xff]  ;;  %v5808_v12 = vld [vmem:[#allocation2 + $0x19] sm:$0xff]  ;;  %v3120_v9 = vmul.f32 %v4027_v1, %v5793_v3  ;;  %v3121_v24 = vmul.f32 %v4027_v1, %v5795_v10 }
 0x3b0   : > { %6211 = vst [vmem:[#allocation6_spill] sm:$0xff] %v5808_v12  ;;  %v5811_v45 = vld [vmem:[#allocation2 + $0x21] sm:$0xff]  ;;  %v5813_v39 = vld [vmem:[#allocation2 + $0x31] sm:$0xff]  ;;  %v5815_v2 = vld [vmem:[#allocation2 + $0x39] sm:$0xff]  ;;  %v3159_v21 = vmul.f32 %v4028_v47, %v3139_v63  ;;  %v3160_v15 = vmul.f32 %v4028_v47, %v3140_v54  ;;  %v3161_v38 = vmul.f32 %v4028_v47, %v5808_v12 }
 0x3b1   : > { %6212 = vst [vmem:[#allocation7_spill] sm:$0xff] %v5811_v45  ;;  %6213 = vst [vmem:[#allocation8_spill] sm:$0xff] %v5813_v39  ;;  %v5819_v26 = vld [vmem:[#allocation2 + $0x49] sm:$0xff]  ;;  %v5821_v18 = vld [vmem:[#allocation2 + $0x51] sm:$0xff]  ;;  %v3162_v31 = vmul.f32 %v4028_v47, %v5811_v45  ;;  %v3163_v7 = vmul.f32 %v4028_v47, %v5813_v39  ;;  %v3164_v41 = vmul.f32 %v4028_v47, %v5815_v2 }
 0x3b2   : > { %6214 = vst [vmem:[#allocation9_spill] sm:$0xff] %v5815_v2  ;;  %6215 = vst [vmem:[#allocation10_spill] sm:$0xff] %v5819_v26  ;;  %v5823_v30 = vld [vmem:[#allocation2 + $0x61] sm:$0xff]  ;;  %v5828_v8 = vld [vmem:[#allocation2 + $0x69] sm:$0xff]  ;;  %v3165_v13 = vmul.f32 %v4028_v47, %v5819_v26  ;;  %v3166_v28 = vmul.f32 %v4028_v47, %v5821_v18  ;;  %v3175_v20 = vadd.f32 %v3159_v21, %v3106_v49 }
 0x3b3   : > { %6216 = vst [vmem:[#allocation11_spill] sm:$0xff] %v5821_v18  ;;  %6217 = vst [vmem:[#allocation12_spill] sm:$0xff] %v5823_v30  ;;  %v5830_v56 = vld [vmem:[#allocation2 + $0x79] sm:$0xff]  ;;  %v5832_v61 = vld [vmem:[#allocation2 + $0x81] sm:$0xff]  ;;  %v3167_v62 = vmul.f32 %v4028_v47, %v5823_v30  ;;  %v3168_v57 = vmul.f32 %v4028_v47, %v5828_v8  ;;  %v3176_v46 = vadd.f32 %v3160_v15, %v3107_v25 }
 0x3b4   : > { %6218 = vst [vmem:[#allocation13_spill] sm:$0xff] %v5828_v8  ;;  %6219 = vst [vmem:[#allocation14_spill] sm:$0xff] %v5830_v56  ;;  %v5837_v4 = vld [vmem:[#allocation2 + $0x91] sm:$0xff]  ;;  %v5839_v14 = vld [vmem:[#allocation2 + $0x99] sm:$0xff]  ;;  %v3169_v36 = vmul.f32 %v4028_v47, %v5830_v56  ;;  %v3170_v42 = vmul.f32 %v4028_v47, %v5832_v61  ;;  %v3177_v49 = vadd.f32 %v3161_v38, %v3108_v11 }
 0x3b5   : > { %6220 = vst [vmem:[#allocation15_spill] sm:$0xff] %v5832_v61  ;;  %6221 = vst [vmem:[#allocation16_spill] sm:$0xff] %v5837_v4  ;;  %v5841_v51 = vld [vmem:[#allocation2 + $0xa9] sm:$0xff]  ;;  %v5846_v0 = vld [vmem:[#allocation2 + $0xb1] sm:$0xff]  ;;  %v3171_v1 = vmul.f32 %v4028_v47, %v5837_v4  ;;  %v3172_v29 = vmul.f32 %v4028_v47, %v5839_v14  ;;  %v3178_v56 = vadd.f32 %v3162_v31, %v3109_v40 }
 0x3b6   : > { %6222 = vst [vmem:[#allocation17_spill] sm:$0xff] %v5839_v14  ;;  %6223 = vst [vmem:[#allocation18_spill] sm:$0xff] %v5841_v51  ;;  %v3173_v58 = vmul.f32 %v4028_v47, %v5841_v51  ;;  %v4029_v63 = vld [vmem:[%s6145_s3 + $0x2] ss:$0 sm:$0xff]  ;;  %v3174_v21 = vmul.f32 %v4028_v47, %v5846_v0  ;;  %v3179_v8 = vadd.f32 %v3163_v7, %v3110_v60  ;;  %v3193_v25 = vld [vmem:[#allocation2 + $0xa] sm:$0xff] }
 0x3b7   : > { %6224 = vst [vmem:[#allocation19_spill] sm:$0xff] %v5846_v0  ;;  %v3192_v54 = vld [vmem:[#allocation2 + $0x2] sm:$0xff]  ;;  %v3180_v61 = vadd.f32 %v3164_v41, %v3111_v44  ;;  %v5855_v15 = vld [vmem:[#allocation2 + $0x1a] sm:$0xff]  ;;  %v3181_v4 = vadd.f32 %v3165_v13, %v3112_v55  ;;  %v3182_v14 = vadd.f32 %v3166_v28, %v3113_v59  ;;  %v3183_v18 = vadd.f32 %v3167_v62, %v3114_v27  ;;  %v5859_v11 = vld [vmem:[#allocation2 + $0x32] sm:$0xff] }
 0x3b8   : > { %6225 = vst [vmem:[#allocation20_spill] sm:$0xff] %v5855_v15  ;;  %v5857_v30 = vld [vmem:[#allocation2 + $0x22] sm:$0xff]  ;;  %v3184_v51 = vadd.f32 %v3168_v57, %v3115_v35  ;;  %6227 = vst [vmem:[#allocation22_spill] sm:$0xff] %v5859_v11  ;;  %v5861_v38 = vld [vmem:[#allocation2 + $0x3a] sm:$0xff]  ;;  %v3185_v2 = vadd.f32 %v3169_v36, %v3116_v6  ;;  %v3186_v47 = vadd.f32 %v3170_v42, %v3117_v17 }
 0x3b9   : > { %6226 = vst [vmem:[#allocation21_spill] sm:$0xff] %v5857_v30  ;;  %6228 = vst [vmem:[#allocation23_spill] sm:$0xff] %v5861_v38  ;;  %v5863_v26 = vld [vmem:[#allocation2 + $0x4a] sm:$0xff]  ;;  %v3187_v40 = vadd.f32 %v3171_v1, %v3118_v22  ;;  %v3188_v60 = vadd.f32 %v3172_v29, %v3119_v50  ;;  %v5865_v44 = vld [vmem:[#allocation2 + $0x52] sm:$0xff]  ;;  %v3189_v55 = vadd.f32 %v3173_v58, %v3120_v9 }
 0x3ba   : > { %6229 = vst [vmem:[#allocation24_spill] sm:$0xff] %v5863_v26  ;;  %6230 = vst [vmem:[#allocation25_spill] sm:$0xff] %v5865_v44  ;;  %v5867_v31 = vld [vmem:[#allocation2 + $0x62] sm:$0xff]  ;;  %v5869_v7 = vld [vmem:[#allocation2 + $0x6a] sm:$0xff]  ;;  %v3190_v59 = vadd.f32 %v3174_v21, %v3121_v24  ;;  %v3212_v13 = vmul.f32 %v4029_v63, %v3192_v54  ;;  %v3213_v28 = vmul.f32 %v4029_v63, %v3193_v25 }
 0x3bb   : > { %6231 = vst [vmem:[#allocation26_spill] sm:$0xff] %v5867_v31  ;;  %6232 = vst [vmem:[#allocation27_spill] sm:$0xff] %v5869_v7  ;;  %v5871_v27 = vld [vmem:[#allocation2 + $0x7a] sm:$0xff]  ;;  %v5873_v35 = vld [vmem:[#allocation2 + $0x82] sm:$0xff]  ;;  %v3214_v50 = vmul.f32 %v4029_v63, %v5855_v15  ;;  %v3215_v62 = vmul.f32 %v4029_v63, %v5857_v30  ;;  %v3216_v9 = vmul.f32 %v4029_v63, %v5859_v11 }
 0x3bc   : > { %6233 = vst [vmem:[#allocation28_spill] sm:$0xff] %v5871_v27  ;;  %6234 = vst [vmem:[#allocation29_spill] sm:$0xff] %v5873_v35  ;;  %v5875_v41 = vld [vmem:[#allocation2 + $0x92] sm:$0xff]  ;;  %v5877_v6 = vld [vmem:[#allocation2 + $0x9a] sm:$0xff]  ;;  %v3217_v24 = vmul.f32 %v4029_v63, %v5861_v38  ;;  %v3218_v57 = vmul.f32 %v4029_v63, %v5863_v26  ;;  %v3219_v36 = vmul.f32 %v4029_v63, %v5865_v44 }
 0x3bd   : > { %6235 = vst [vmem:[#allocation30_spill] sm:$0xff] %v5875_v41  ;;  %6236 = vst [vmem:[#allocation31_spill] sm:$0xff] %v5877_v6  ;;  %v5879_v17 = vld [vmem:[#allocation2 + $0xaa] sm:$0xff]  ;;  %v5881_v22 = vld [vmem:[#allocation2 + $0xb2] sm:$0xff]  ;;  %v3220_v42 = vmul.f32 %v4029_v63, %v5867_v31  ;;  %v3221_v1 = vmul.f32 %v4029_v63, %v5869_v7  ;;  %v3222_v29 = vmul.f32 %v4029_v63, %v5871_v27 }
 0x3be   : > { %6237 = vst [vmem:[#allocation32_spill] sm:$0xff] %v5879_v17  ;;  %6238 = vst [vmem:[#allocation33_spill] sm:$0xff] %v5881_v22  ;;  %v3223_v58 = vmul.f32 %v4029_v63, %v5873_v35  ;;  %v3224_v54 = vmul.f32 %v4029_v63, %v5875_v41  ;;  %v3225_v21 = vmul.f32 %v4029_v63, %v5877_v6  ;;  %v4030_v27 = vld [vmem:[%s6145_s3 + $0x3] ss:$0 sm:$0xff] }
 0x3bf   : > { %v3226_v25 = vmul.f32 %v4029_v63, %v5879_v17  ;;  %v3227_v38 = vmul.f32 %v4029_v63, %v5881_v22  ;;  %v3228_v11 = vadd.f32 %v3212_v13, %v3175_v20  ;;  %v3229_v26 = vadd.f32 %v3213_v28, %v3176_v46 }
 0x3c0   : > { %v3230_v30 = vadd.f32 %v3214_v50, %v3177_v49  ;;  %v3231_v44 = vadd.f32 %v3215_v62, %v3178_v56  ;;  %v3232_v15 = vadd.f32 %v3216_v9, %v3179_v8  ;;  %v3233_v31 = vadd.f32 %v3217_v24, %v3180_v61  ;;  %v5902_v8 = vld [vmem:[#allocation2 + $0xc0] sm:$0xff]  ;;  %v5904_v61 = vld [vmem:[#allocation2 + $0xc8] sm:$0xff] }
 0x3c1   : > { %v3234_v7 = vadd.f32 %v3218_v57, %v3181_v4  ;;  %v3235_v35 = vadd.f32 %v3219_v36, %v3182_v14  ;;  %v3236_v0 = vadd.f32 %v3220_v42, %v3183_v18  ;;  %v3237_v41 = vadd.f32 %v3221_v1, %v3184_v51  ;;  %6239 = vst [vmem:[#allocation34_spill] sm:$0xff] %v5904_v61  ;;  %v4031_v24 = vld [vmem:[%s6145_s3 + $0x4] ss:$0 sm:$0xff] }
 0x3c2   : > { %v3238_v39 = vadd.f32 %v3222_v29, %v3185_v2  ;;  %v3239_v6 = vadd.f32 %v3223_v58, %v3186_v47  ;;  %v3240_v45 = vadd.f32 %v3224_v54, %v3187_v40  ;;  %v3241_v17 = vadd.f32 %v3225_v21, %v3188_v60 }
 0x3c3   : > { %v3242_v12 = vadd.f32 %v3226_v25, %v3189_v55  ;;  %v3243_v63 = vadd.f32 %v3227_v38, %v3190_v59  ;;  %v3265_v20 = vmul.f32 %v4030_v27, %v5765_v34  ;;  %v3266_v56 = vmul.f32 %v4030_v27, %v5767_v23 }
 0x3c4   : > { %v3267_v46 = vmul.f32 %v4030_v27, %v5769_v16  ;;  %v3268_v4 = vmul.f32 %v4030_v27, %v5771_v48  ;;  %v3269_v18 = vmul.f32 %v4030_v27, %v5773_v52  ;;  %v3270_v2 = vmul.f32 %v4030_v27, %v5775_v53 }
 0x3c5   : > { %v3271_v14 = vmul.f32 %v4030_v27, %v5777_v5  ;;  %v3272_v51 = vmul.f32 %v4030_v27, %v5779_v32  ;;  %v3273_v34 = vmul.f32 %v4030_v27, %v5781_v37  ;;  %v3274_v23 = vmul.f32 %v4030_v27, %v5783_v43 }
 0x3c6   : > { %v3275_v49 = vmul.f32 %v4030_v27, %v5785_v19  ;;  %v3276_v38 = vmul.f32 %v4030_v27, %v5787_v33  ;;  %v3277_v47 = vmul.f32 %v4030_v27, %v5793_v3  ;;  %v3278_v40 = vmul.f32 %v4030_v27, %v5795_v10 }
 0x3c7   : > { %v3279_v60 = vmul.f32 %v4030_v27, %v5902_v8  ;;  %v3280_v55 = vmul.f32 %v4030_v27, %v5904_v61  ;;  %v3281_v59 = vadd.f32 %v3265_v20, %v3228_v11  ;;  %v3282_v13 = vadd.f32 %v3266_v56, %v3229_v26  ;;  %v6240_v11 = vld [vmem:[#allocation6_spill] sm:$0xff]  ;;  %v6243_v20 = vld [vmem:[#allocation8_spill] sm:$0xff] }
 0x3c8   : > { %v3283_v28 = vadd.f32 %v3267_v46, %v3230_v30  ;;  %v3284_v50 = vadd.f32 %v3268_v4, %v3231_v44  ;;  %v3285_v62 = vadd.f32 %v3269_v18, %v3232_v15  ;;  %v3286_v9 = vadd.f32 %v3270_v2, %v3233_v31  ;;  %v6241_v30 = vld [vmem:[#allocation7_spill] sm:$0xff]  ;;  %v5927_v31 = vld [vmem:[#allocation2 + $0xc9] sm:$0xff]  ;;  %v6249_v46 = vld [vmem:[#allocation14_spill] sm:$0xff] }
 0x3c9   : > { %v3287_v57 = vadd.f32 %v3271_v14, %v3234_v7  ;;  %v3288_v36 = vadd.f32 %v3272_v51, %v3235_v35  ;;  %v3289_v42 = vadd.f32 %v3273_v34, %v3236_v0  ;;  %v3290_v1 = vadd.f32 %v3274_v23, %v3237_v41  ;;  %v5925_v15 = vld [vmem:[#allocation2 + $0xc1] sm:$0xff]  ;;  %v6244_v7 = vld [vmem:[#allocation9_spill] sm:$0xff]  ;;  %v6245_v0 = vld [vmem:[#allocation10_spill] sm:$0xff] }
 0x3ca   : > { %v3291_v29 = vadd.f32 %v3275_v49, %v3238_v39  ;;  %v3292_v58 = vadd.f32 %v3276_v38, %v3239_v6  ;;  %v3293_v54 = vadd.f32 %v3277_v47, %v3240_v45  ;;  %v3294_v21 = vadd.f32 %v3278_v40, %v3241_v17  ;;  %6242 = vst [vmem:[#allocation6_spill] sm:$0xff] %v5925_v15  ;;  %v6246_v39 = vld [vmem:[#allocation11_spill] sm:$0xff]  ;;  %v6247_v45 = vld [vmem:[#allocation12_spill] sm:$0xff]  ;;  %v6252_v34 = vld [vmem:[#allocation17_spill] sm:$0xff] }
 0x3cb   : > { %v3295_v25 = vadd.f32 %v3279_v60, %v3242_v12  ;;  %v3296_v27 = vadd.f32 %v3280_v55, %v3243_v63  ;;  %v3318_v26 = vmul.f32 %v4031_v24, %v6240_v11  ;;  %v3319_v44 = vmul.f32 %v4031_v24, %v6241_v30  ;;  %v6248_v12 = vld [vmem:[#allocation13_spill] sm:$0xff]  ;;  %v6250_v18 = vld [vmem:[#allocation15_spill] sm:$0xff]  ;;  %v6251_v14 = vld [vmem:[#allocation16_spill] sm:$0xff] }
 0x3cc   : > { %v3320_v56 = vmul.f32 %v4031_v24, %v6243_v20  ;;  %v3321_v35 = vmul.f32 %v4031_v24, %v6244_v7  ;;  %v3322_v41 = vmul.f32 %v4031_v24, %v6245_v0  ;;  %v3323_v6 = vmul.f32 %v4031_v24, %v6246_v39  ;;  %v6253_v49 = vld [vmem:[#allocation18_spill] sm:$0xff]  ;;  %v6254_v47 = vld [vmem:[#allocation19_spill] sm:$0xff] }
 0x3cd   : > { %v3324_v17 = vmul.f32 %v4031_v24, %v6247_v45  ;;  %v3325_v63 = vmul.f32 %v4031_v24, %v6248_v12  ;;  %v3326_v4 = vmul.f32 %v4031_v24, %v6249_v46  ;;  %v3327_v2 = vmul.f32 %v4031_v24, %v6250_v18 }
 0x3ce   : > { %v3328_v51 = vmul.f32 %v4031_v24, %v6251_v14  ;;  %v3329_v23 = vmul.f32 %v4031_v24, %v6252_v34  ;;  %v3330_v38 = vmul.f32 %v4031_v24, %v6253_v49  ;;  %v3331_v40 = vmul.f32 %v4031_v24, %v6254_v47  ;;  %v4032_v14 = vld [vmem:[%s6145_s3 + $0x5] ss:$0 sm:$0xff] }
 0x3cf   : > { %v3332_v60 = vmul.f32 %v4031_v24, %v5925_v15  ;;  %v3333_v55 = vmul.f32 %v4031_v24, %v5927_v31  ;;  %v3334_v11 = vadd.f32 %v3318_v26, %v3281_v59  ;;  %v3335_v30 = vadd.f32 %v3319_v44, %v3282_v13  ;;  %v6255_v59 = vld [vmem:[#allocation20_spill] sm:$0xff]  ;;  %v6258_v26 = vld [vmem:[#allocation22_spill] sm:$0xff] }
 0x3d0   : > { %v3336_v45 = vadd.f32 %v3320_v56, %v3283_v28  ;;  %v3337_v12 = vadd.f32 %v3321_v35, %v3284_v50  ;;  %v3338_v39 = vadd.f32 %v3322_v41, %v3285_v62  ;;  %v3339_v46 = vadd.f32 %v3323_v6, %v3286_v9  ;;  %v6256_v28 = vld [vmem:[#allocation21_spill] sm:$0xff]  ;;  %v5948_v62 = vld [vmem:[#allocation2 + $0xc2] sm:$0xff] }
 0x3d1   : > { %v3340_v18 = vadd.f32 %v3324_v17, %v3287_v57  ;;  %v3341_v34 = vadd.f32 %v3325_v63, %v3288_v36  ;;  %v3342_v0 = vadd.f32 %v3326_v4, %v3289_v42  ;;  %v3343_v49 = vadd.f32 %v3327_v2, %v3290_v1  ;;  %6257 = vst [vmem:[#allocation7_spill] sm:$0xff] %v5948_v62  ;;  %v5950_v9 = vld [vmem:[#allocation2 + $0xca] sm:$0xff]  ;;  %v6259_v57 = vld [vmem:[#allocation23_spill] sm:$0xff]  ;;  %v6266_v17 = vld [vmem:[#allocation30_spill] sm:$0xff] }
 0x3d2   : > { %v3344_v7 = vadd.f32 %v3328_v51, %v3291_v29  ;;  %v3345_v47 = vadd.f32 %v3329_v23, %v3292_v58  ;;  %v3346_v20 = vadd.f32 %v3330_v38, %v3293_v54  ;;  %v3347_v15 = vadd.f32 %v3331_v40, %v3294_v21  ;;  %v6260_v42 = vld [vmem:[#allocation24_spill] sm:$0xff]  ;;  %v6261_v29 = vld [vmem:[#allocation25_spill] sm:$0xff]  ;;  %v6262_v54 = vld [vmem:[#allocation26_spill] sm:$0xff] }
 0x3d3   : > { %v3348_v61 = vadd.f32 %v3332_v60, %v3295_v25  ;;  %v3349_v24 = vadd.f32 %v3333_v55, %v3296_v27  ;;  %v3371_v13 = vmul.f32 %v4032_v14, %v6255_v59  ;;  %v3372_v50 = vmul.f32 %v4032_v14, %v6256_v28  ;;  %v6263_v25 = vld [vmem:[#allocation27_spill] sm:$0xff]  ;;  %v6264_v56 = vld [vmem:[#allocation28_spill] sm:$0xff]  ;;  %v6265_v41 = vld [vmem:[#allocation29_spill] sm:$0xff] }
 0x3d4   : > { %v3373_v44 = vmul.f32 %v4032_v14, %v6258_v26  ;;  %v3374_v36 = vmul.f32 %v4032_v14, %v6259_v57  ;;  %v3375_v1 = vmul.f32 %v4032_v14, %v6260_v42  ;;  %v3376_v58 = vmul.f32 %v4032_v14, %v6261_v29  ;;  %v6267_v4 = vld [vmem:[#allocation31_spill] sm:$0xff]  ;;  %v6268_v51 = vld [vmem:[#allocation32_spill] sm:$0xff] }
 0x3d5   : > { %v3377_v21 = vmul.f32 %v4032_v14, %v6262_v54  ;;  %v3378_v27 = vmul.f32 %v4032_v14, %v6263_v25  ;;  %v3379_v35 = vmul.f32 %v4032_v14, %v6264_v56  ;;  %v3380_v6 = vmul.f32 %v4032_v14, %v6265_v41 }
 0x3d6   : > { %v3381_v63 = vmul.f32 %v4032_v14, %v6266_v17  ;;  %v3382_v2 = vmul.f32 %v4032_v14, %v6267_v4  ;;  %v3383_v23 = vmul.f32 %v4032_v14, %v6268_v51  ;;  %v3384_v38 = vmul.f32 %v4032_v14, %v5881_v22  ;;  %v4033_v17 = vld [vmem:[%s6145_s3 + $0x6] ss:$0 sm:$0xff] }
 0x3d7   : > { %v3385_v40 = vmul.f32 %v4032_v14, %v5948_v62  ;;  %v3386_v60 = vmul.f32 %v4032_v14, %v5950_v9  ;;  %v3387_v55 = vadd.f32 %v3371_v13, %v3334_v11  ;;  %v3388_v59 = vadd.f32 %v3372_v50, %v3335_v30 }
 0x3d8   : > { %v3389_v28 = vadd.f32 %v3373_v44, %v3336_v45  ;;  %v3390_v25 = vadd.f32 %v3374_v36, %v3337_v12  ;;  %v3391_v54 = vadd.f32 %v3375_v1, %v3338_v39  ;;  %v3392_v56 = vadd.f32 %v3376_v58, %v3339_v46  ;;  %v3419_v39 = vld [vmem:[#allocation2 + $0xd8] sm:$0xff]  ;;  %v3420_v12 = vld [vmem:[#allocation2 + $0xe0] sm:$0xff] }
 0x3d9   : > { %v3393_v41 = vadd.f32 %v3377_v21, %v3340_v18  ;;  %v3394_v4 = vadd.f32 %v3378_v27, %v3341_v34  ;;  %v3395_v29 = vadd.f32 %v3379_v35, %v3342_v0  ;;  %v3396_v51 = vadd.f32 %v3380_v6, %v3343_v49  ;;  %v6269_v34 = vld [vmem:[#allocation34_spill] sm:$0xff]  ;;  %v6270_v27 = vld [vmem:[#allocation8_spill] sm:$0xff]  ;;  %v6271_v6 = vld [vmem:[#allocation9_spill] sm:$0xff] }
 0x3da   : > { %v3397_v42 = vadd.f32 %v3381_v63, %v3344_v7  ;;  %v3398_v22 = vadd.f32 %v3382_v2, %v3345_v47  ;;  %v3399_v57 = vadd.f32 %v3383_v23, %v3346_v20  ;;  %v3400_v62 = vadd.f32 %v3384_v38, %v3347_v15  ;;  %v6273_v2 = vld [vmem:[#allocation11_spill] sm:$0xff] }
 0x3db   : > { %v3401_v26 = vadd.f32 %v3385_v40, %v3348_v61  ;;  %v3402_v14 = vadd.f32 %v3386_v60, %v3349_v24  ;;  %v3425_v11 = vmul.f32 %v4033_v17, %v5769_v16  ;;  %v3426_v45 = vmul.f32 %v4033_v17, %v5771_v48  ;;  %v6279_v40 = vld [vmem:[#allocation17_spill] sm:$0xff] }
 0x3dc   : > { %v3427_v46 = vmul.f32 %v4033_v17, %v5773_v52  ;;  %v3428_v30 = vmul.f32 %v4033_v17, %v5775_v53  ;;  %v3429_v18 = vmul.f32 %v4033_v17, %v5777_v5  ;;  %v3430_v0 = vmul.f32 %v4033_v17, %v5779_v32 }
 0x3dd   : > { %v3431_v7 = vmul.f32 %v4033_v17, %v5781_v37  ;;  %v3432_v15 = vmul.f32 %v4033_v17, %v5783_v43  ;;  %v3433_v61 = vmul.f32 %v4033_v17, %v5785_v19  ;;  %v3434_v16 = vmul.f32 %v4033_v17, %v5787_v33  ;;  %v4034_v19 = vld [vmem:[%s6145_s3 + $0x7] ss:$0 sm:$0xff] }
 0x3de   : > { %v3435_v48 = vmul.f32 %v4033_v17, %v5793_v3  ;;  %v3436_v20 = vmul.f32 %v4033_v17, %v5795_v10  ;;  %v3437_v52 = vmul.f32 %v4033_v17, %v5902_v8  ;;  %v3438_v53 = vmul.f32 %v4033_v17, %v6269_v34 }
 0x3df   : > { %v3439_v49 = vmul.f32 %v4033_v17, %v3419_v39  ;;  %v3440_v5 = vmul.f32 %v4033_v17, %v3420_v12  ;;  %v3441_v47 = vadd.f32 %v3425_v11, %v3387_v55  ;;  %v3442_v32 = vadd.f32 %v3426_v45, %v3388_v59  ;;  %v6272_v17 = vld [vmem:[#allocation10_spill] sm:$0xff] }
 0x3e0   : > { %v3443_v24 = vadd.f32 %v3427_v46, %v3389_v28  ;;  %v3444_v37 = vadd.f32 %v3428_v30, %v3390_v25  ;;  %v3445_v13 = vadd.f32 %v3429_v18, %v3391_v54  ;;  %v3446_v43 = vadd.f32 %v3430_v0, %v3392_v56  ;;  %v3472_v54 = vld [vmem:[#allocation2 + $0xd9] sm:$0xff]  ;;  %v3473_v56 = vld [vmem:[#allocation2 + $0xe1] sm:$0xff] }
 0x3e1   : > { %v3447_v33 = vadd.f32 %v3431_v7, %v3393_v41  ;;  %v3448_v3 = vadd.f32 %v3432_v15, %v3394_v4  ;;  %v3449_v50 = vadd.f32 %v3433_v61, %v3395_v29  ;;  %v3450_v10 = vadd.f32 %v3434_v16, %v3396_v51  ;;  %v6274_v41 = vld [vmem:[#allocation12_spill] sm:$0xff]  ;;  %v6275_v29 = vld [vmem:[#allocation13_spill] sm:$0xff]  ;;  %v6280_v55 = vld [vmem:[#allocation18_spill] sm:$0xff] }
 0x3e2   : > { %v3451_v44 = vadd.f32 %v3435_v48, %v3397_v42  ;;  %v3452_v8 = vadd.f32 %v3436_v20, %v3398_v22  ;;  %v3453_v36 = vadd.f32 %v3437_v52, %v3399_v57  ;;  %v3454_v1 = vadd.f32 %v3438_v53, %v3400_v62  ;;  %v6276_v42 = vld [vmem:[#allocation14_spill] sm:$0xff]  ;;  %v6277_v57 = vld [vmem:[#allocation15_spill] sm:$0xff]  ;;  %v4035_v16 = vld [vmem:[%s6145_s3 + $0x8] ss:$0 sm:$0xff] }
 0x3e3   : > { %v3455_v58 = vadd.f32 %v3439_v49, %v3401_v26  ;;  %v3456_v21 = vadd.f32 %v3440_v5, %v3402_v14  ;;  %v3478_v35 = vmul.f32 %v4034_v19, %v6270_v27  ;;  %v3479_v25 = vmul.f32 %v4034_v19, %v6271_v6  ;;  %v6278_v26 = vld [vmem:[#allocation16_spill] sm:$0xff]  ;;  %v6281_v28 = vld [vmem:[#allocation19_spill] sm:$0xff]  ;;  %v6282_v11 = vld [vmem:[#allocation6_spill] sm:$0xff] }
 0x3e4   : > { %v3480_v63 = vmul.f32 %v4034_v19, %v6272_v17  ;;  %v3481_v23 = vmul.f32 %v4034_v19, %v6273_v2  ;;  %v3482_v4 = vmul.f32 %v4034_v19, %v6274_v41  ;;  %v3483_v51 = vmul.f32 %v4034_v19, %v6275_v29 }
 0x3e5   : > { %v3484_v22 = vmul.f32 %v4034_v19, %v6276_v42  ;;  %v3485_v62 = vmul.f32 %v4034_v19, %v6277_v57  ;;  %v3486_v38 = vmul.f32 %v4034_v19, %v6278_v26  ;;  %v3487_v60 = vmul.f32 %v4034_v19, %v6279_v40 }
 0x3e6   : > { %v3488_v59 = vmul.f32 %v4034_v19, %v6280_v55  ;;  %v3489_v14 = vmul.f32 %v4034_v19, %v6281_v28  ;;  %v3490_v45 = vmul.f32 %v4034_v19, %v6282_v11  ;;  %v3491_v39 = vmul.f32 %v4034_v19, %v5927_v31 }
 0x3e7   : > { %v3492_v12 = vmul.f32 %v4034_v19, %v3472_v54  ;;  %v3493_v46 = vmul.f32 %v4034_v19, %v3473_v56  ;;  %v3494_v30 = vadd.f32 %v3478_v35, %v3441_v47  ;;  %v3495_v18 = vadd.f32 %v3479_v25, %v3442_v32  ;;  %v6283_v47 = vld [vmem:[#allocation22_spill] sm:$0xff]  ;;  %v6285_v35 = vld [vmem:[#allocation24_spill] sm:$0xff]  ;;  %v6286_v25 = vld [vmem:[#allocation25_spill] sm:$0xff] }
 0x3e8   : > { %v3496_v0 = vadd.f32 %v3480_v63, %v3443_v24  ;;  %v3497_v7 = vadd.f32 %v3481_v23, %v3444_v37  ;;  %v3498_v15 = vadd.f32 %v3482_v4, %v3445_v13  ;;  %v3499_v61 = vadd.f32 %v3483_v51, %v3446_v43  ;;  %v6284_v24 = vld [vmem:[#allocation23_spill] sm:$0xff]  ;;  %v6293_v63 = vld [vmem:[#allocation32_spill] sm:$0xff]  ;;  %v6294_v23 = vld [vmem:[#allocation33_spill] sm:$0xff] }
 0x3e9   : > { %v3500_v48 = vadd.f32 %v3484_v22, %v3447_v33  ;;  %v3501_v20 = vadd.f32 %v3485_v62, %v3448_v3  ;;  %v3502_v52 = vadd.f32 %v3486_v38, %v3449_v50  ;;  %v3503_v34 = vadd.f32 %v3487_v60, %v3450_v10  ;;  %v3525_v13 = vld [vmem:[#allocation2 + $0xda] sm:$0xff]  ;;  %v3526_v43 = vld [vmem:[#allocation2 + $0xe2] sm:$0xff] }
 0x3ea   : > { %v3504_v53 = vadd.f32 %v3488_v59, %v3451_v44  ;;  %v3505_v49 = vadd.f32 %v3489_v14, %v3452_v8  ;;  %v3506_v5 = vadd.f32 %v3490_v45, %v3453_v36  ;;  %v3507_v31 = vadd.f32 %v3491_v39, %v3454_v1  ;;  %v6287_v33 = vld [vmem:[#allocation26_spill] sm:$0xff]  ;;  %v6288_v50 = vld [vmem:[#allocation27_spill] sm:$0xff]  ;;  %v6289_v44 = vld [vmem:[#allocation28_spill] sm:$0xff] }
 0x3eb   : > { %v3508_v27 = vadd.f32 %v3492_v12, %v3455_v58  ;;  %v3509_v19 = vadd.f32 %v3493_v46, %v3456_v21  ;;  %v3531_v32 = vmul.f32 %v4035_v16, %v6283_v47  ;;  %v3532_v37 = vmul.f32 %v4035_v16, %v6284_v24  ;;  %v6290_v36 = vld [vmem:[#allocation29_spill] sm:$0xff]  ;;  %v6291_v58 = vld [vmem:[#allocation30_spill] sm:$0xff]  ;;  %v6292_v56 = vld [vmem:[#allocation31_spill] sm:$0xff] }
 0x3ec   : > { %v3533_v6 = vmul.f32 %v4035_v16, %v6285_v35  ;;  %v3534_v54 = vmul.f32 %v4035_v16, %v6286_v25  ;;  %v3535_v3 = vmul.f32 %v4035_v16, %v6287_v33  ;;  %v3536_v10 = vmul.f32 %v4035_v16, %v6288_v50  ;;  %v6295_v4 = vld [vmem:[#allocation7_spill] sm:$0xff] }
 0x3ed   : > { %v3537_v8 = vmul.f32 %v4035_v16, %v6289_v44  ;;  %v3538_v1 = vmul.f32 %v4035_v16, %v6290_v36  ;;  %v3539_v21 = vmul.f32 %v4035_v16, %v6291_v58  ;;  %v3540_v17 = vmul.f32 %v4035_v16, %v6292_v56  ;;  %3566 = sbr.rel (%p4036_p2) target bundleno = 1013 (0x3f5), region = 48 }
 0x3ee   : > { %v3541_v2 = vmul.f32 %v4035_v16, %v6293_v63  ;;  %v3542_v41 = vmul.f32 %v4035_v16, %v6294_v23  ;;  %v3543_v29 = vmul.f32 %v4035_v16, %v6295_v4  ;;  %v3544_v51 = vmul.f32 %v4035_v16, %v5950_v9 }
 0x3ef   : > { %v3545_v42 = vmul.f32 %v4035_v16, %v3525_v13  ;;  %v3546_v22 = vmul.f32 %v4035_v16, %v3526_v43  ;;  %v3547_v57 = vadd.f32 %v3531_v32, %v3494_v30  ;;  %v3548_v62 = vadd.f32 %v3532_v37, %v3495_v18 }
 0x3f0   : > { %v3549_v26 = vadd.f32 %v3533_v6, %v3496_v0  ;;  %v3550_v38 = vadd.f32 %v3534_v54, %v3497_v7  ;;  %v3551_v40 = vadd.f32 %v3535_v3, %v3498_v15  ;;  %v3552_v60 = vadd.f32 %v3536_v10, %v3499_v61 }
 0x3f1   : > { %v3553_v55 = vadd.f32 %v3537_v8, %v3500_v48  ;;  %v3554_v59 = vadd.f32 %v3538_v1, %v3501_v20  ;;  %v3555_v28 = vadd.f32 %v3539_v21, %v3502_v52  ;;  %v3556_v14 = vadd.f32 %v3540_v17, %v3503_v34 }
 0x3f2   : > { %v3557_v11 = vadd.f32 %v3541_v2, %v3504_v53  ;;  %v6017_v45 = vadd.f32 %v3542_v41, %v3505_v49  ;;  %v6019_v39 = vadd.f32 %v3543_v29, %v3506_v5  ;;  %v6021_v12 = vadd.f32 %v3544_v51, %v3507_v31 }
 0x3f3   : > { %v6023_v9 = vadd.f32 %v3545_v42, %v3508_v27  ;;  %v6025_v46 = vadd.f32 %v3546_v22, %v3509_v19  ;;  %v4787_v30 = vmov (!%p4036_p2), 0.0  }
 0x3f4   : > { %3568 = vst.msk [vmem:[%s5572_s0] sm:$0x3] %vm3567_vm0, %v4787_v30 }
 0x3f5 PF: > { %v3570_v18 = vsel %vm1979_vm9, %v3547_v57, 0.0  ;;  %v3571_v0 = vsel %vm1979_vm9, %v3548_v62, 0.0  ;;  %v3573_v7 = vsel %vm1979_vm9, %v3549_v26, 0.0  ;;  %v3575_v61 = vsel %vm1979_vm9, %v3550_v38, 0.0  ;;  %s4038_s21 = sshll.u32 %s4768_s22, 5  ;;  %s3693_s10 = sshll.u32 %s5572_s0, 4  ;;  %s6087_s10 = int_to_ptr.vmem [resolvable:$true] %s3693_s10 }
 0x3f6   : > { %v3572_v15 = vadd.f32 %v3571_v0, %v3570_v18  ;;  %v3577_v48 = vsel %vm1979_vm9, %v3551_v40, 0.0  ;;  %v3610_v52 = vmul.f32 %v3547_v57, %v3547_v57  ;;  %v3611_v34 = vmul.f32 %v3548_v62, %v3548_v62  ;;  %s6085_s26 = scalar_lea.hbm %s6147_s5, %s4038_s21  ;;  %s6296_s7 = sand.u32 1, %s4756_s19  }
 0x3f7   : > { %v3612_v53 = vmul.f32 %v3549_v26, %v3549_v26  ;;  %v3579_v49 = vsel %vm1979_vm9, %v3552_v60, 0.0  ;;  %v3613_v31 = vmul.f32 %v3550_v38, %v3550_v38  ;;  %v3581_v27 = vsel %vm1979_vm9, %v3553_v55, 0.0  ;;  %s3676_s16 = scalar_lea.sflag [#allocation4], %s6296_s7  ;;  %s4686_s14 = scalar_lea.vmem %s6087_s10, 32 }
 0x3f8   : > { %v3574_v16 = vadd.f32 %v3573_v7, %v3572_v15  ;;  %v3614_v19 = vmul.f32 %v3551_v40, %v3551_v40  ;;  %v3626_v32 = vsel %vm1979_vm9, %v3610_v52, 0.0  ;;  %v3627_v24 = vsel %vm1979_vm9, %v3611_v34, 0.0  ;;  %p4687_p4 = scmp.ne.s32.totalorder %s6087_s10, %s4686_s14  ;;  %s4788_s22 = smov [#allocation3]  }
 0x3f9   : > { %v3629_v37 = vsel %vm1979_vm9, %v3612_v53, 0.0  ;;  %v3583_v13 = vsel %vm1979_vm9, %v3554_v59, 0.0  ;;  %v3628_v43 = vadd.f32 %v3627_v24, %v3626_v32  ;;  %v3615_v6 = vmul.f32 %v3552_v60, %v3552_v60  ;;  %s4690_s27 = sshll.u32 %s4788_s22, 4  ;;  %s4691_s27 = int_to_ptr.vmem [resolvable:$false] %s4690_s27 }
 0x3fa   : > { %v3576_v20 = vadd.f32 %v3575_v61, %v3574_v16  ;;  %v3631_v25 = vsel %vm1979_vm9, %v3613_v31, 0.0  ;;  %v3585_v54 = vsel %vm1979_vm9, %v3555_v28, 0.0  ;;  %v3616_v50 = vmul.f32 %v3553_v55, %v3553_v55  ;;  %p4688_p5 = pnand %p4687_p4, %p4868_p3  ;;  %s4692_s8 = scalar_lea.vmem %s4691_s27, 64 }
 0x3fb   : > { %v3630_v33 = vadd.f32 %v3629_v37, %v3628_v43  ;;  %v3633_v10 = vsel %vm1979_vm9, %v3614_v19, 0.0  ;;  %v3587_v44 = vsel %vm1979_vm9, %v3556_v14, 0.0  ;;  %v3617_v1 = vmul.f32 %v3554_v59, %v3554_v59  ;;  %p4693_p7 = scmp.lt.s32.totalorder %s6087_s10, %s4691_s27  ;;  %p4694_p8 = scmp.lt.s32.totalorder %s4692_s8, %s4686_s14 }
 0x3fc   : > { %v3578_v5 = vadd.f32 %v3577_v48, %v3576_v20  ;;  %v3635_v58 = vsel %vm1979_vm9, %v3615_v6, 0.0  ;;  %v3589_v21 = vsel %vm1979_vm9, %v3557_v11, 0.0  ;;  %v3618_v63 = vmul.f32 %v3555_v28, %v3555_v28  ;;  %p4689_p6 = pneg %p4688_p5 }
 0x3fd   : > { %v3632_v8 = vadd.f32 %v3631_v25, %v3630_v33  ;;  %v3637_v2 = vsel %vm1979_vm9, %v3616_v50, 0.0  ;;  %v3591_v23 = vsel %vm1979_vm9, %v6017_v45, 0.0  ;;  %v3619_v29 = vmul.f32 %v3556_v14, %v3556_v14  ;;  %p4695_p10 = por %p4694_p8, %p4693_p7 }
 0x3fe   : > { %v3580_v47 = vadd.f32 %v3579_v49, %v3578_v5  ;;  %v3639_v51 = vsel %vm1979_vm9, %v3617_v1, 0.0  ;;  %v3593_v42 = vsel %vm1979_vm9, %v6019_v39, 0.0  ;;  %v3620_v62 = vmul.f32 %v3557_v11, %v3557_v11 }
 0x3ff   : > { %v3634_v56 = vadd.f32 %v3633_v10, %v3632_v8  ;;  %v3641_v26 = vsel %vm1979_vm9, %v3618_v63, 0.0  ;;  %v3595_v38 = vsel %vm1979_vm9, %v6021_v12, 0.0  ;;  %v3621_v55 = vmul.f32 %v6017_v45, %v6017_v45  ;;  %p4696_p11 = pnand %p4695_p10, %p4689_p6 }
 0x400   : > { %v3582_v35 = vadd.f32 %v3581_v27, %v3580_v47  ;;  %v3643_v59 = vsel %vm1979_vm9, %v3619_v29, 0.0  ;;  %v3597_v28 = vsel %vm1979_vm9, %v6023_v9, 0.0  ;;  %v3622_v11 = vmul.f32 %v6019_v39, %v6019_v39 }
 0x401   : > { %v3636_v41 = vadd.f32 %v3635_v58, %v3634_v56  ;;  %v3645_v18 = vsel %vm1979_vm9, %v3620_v62, 0.0  ;;  %v3599_v0 = vsel %vm1979_vm9, %v6025_v46, 0.0  ;;  %v3623_v45 = vmul.f32 %v6021_v12, %v6021_v12 }
 0x402   : > { %v3584_v3 = vadd.f32 %v3583_v13, %v3582_v35  ;;  %v3647_v61 = vsel %vm1979_vm9, %v3621_v55, 0.0  ;;  %v3624_v20 = vmul.f32 %v6023_v9, %v6023_v9  ;;  %v3649_v39 = vsel %vm1979_vm9, %v3622_v11, 0.0  ;;  %v3569_v13 = vld [vmem:[%s5572_s0] sm:$0x1] }
 0x403   : > { %v3638_v22 = vadd.f32 %v3637_v2, %v3636_v41  ;;  %v3625_v53 = vmul.f32 %v6025_v46, %v6025_v46  ;;  %v3651_v49 = vsel %vm1979_vm9, %v3623_v45, 0.0 }
 0x404   : > { %v3586_v36 = vadd.f32 %v3585_v54, %v3584_v3  ;;  %v3653_v31 = vsel %vm1979_vm9, %v3624_v20, 0.0  ;;  %v3609_v3 = vld [vmem:[%s5572_s0 + $0x1] sm:$0x1] }
 0x405   : > { %v3640_v40 = vadd.f32 %v3639_v51, %v3638_v22  ;;  %v3655_v9 = vsel %vm1979_vm9, %v3625_v53, 0.0 }
 0x406   : > { %v3588_v17 = vadd.f32 %v3587_v44, %v3586_v36 }
 0x407   : > { %v3642_v14 = vadd.f32 %v3641_v26, %v3640_v40 }
 0x408   : > { %v3590_v4 = vadd.f32 %v3589_v21, %v3588_v17 }
 0x409   : > { %v3644_v7 = vadd.f32 %v3643_v59, %v3642_v14 }
 0x40a   : > { %v3592_v57 = vadd.f32 %v3591_v23, %v3590_v4 }
 0x40b   : > { %v3646_v16 = vadd.f32 %v3645_v18, %v3644_v7 }
 0x40c   : > { %v3594_v60 = vadd.f32 %v3593_v42, %v3592_v57 }
 0x40d   : > { %v3648_v52 = vadd.f32 %v3647_v61, %v3646_v16 }
 0x40e   : > { %v3596_v30 = vadd.f32 %v3595_v38, %v3594_v60 }
 0x40f   : > { %v3650_v5 = vadd.f32 %v3649_v39, %v3648_v52 }
 0x410   : > { %v3598_v15 = vadd.f32 %v3597_v28, %v3596_v30 }
 0x411   : > { %v3652_v27 = vadd.f32 %v3651_v49, %v3650_v5 }
 0x412   : > { %v3600_v48 = vadd.f32 %v3599_v0, %v3598_v15 }
 0x413   : > { %v3654_v47 = vadd.f32 %v3653_v31, %v3652_v27 }
 0x414   : > { %v3601_v34 = vrot.slane %v3600_v48, 4 }
 0x415   : > { %v3656_v24 = vadd.f32 %v3655_v9, %v3654_v47 }
 0x416   : > { %v3602_v12 = vadd.f32 %v3601_v34, %v3600_v48 }
 0x417   : > { %v3657_v46 = vrot.slane %v3656_v24, 4 }
 0x418   : > { %v3603_v19 = vrot.slane %v3602_v12, 2 }
 0x419   : > { %v3658_v35 = vadd.f32 %v3657_v46, %v3656_v24 }
 0x41a   : > { %v3604_v32 = vadd.f32 %v3603_v19, %v3602_v12 }
 0x41b   : > { %v3659_v25 = vrot.slane %v3658_v35, 2 }
 0x41c   : > { %v3605_v37 = vrot.slane %v3604_v32, 1 }
 0x41d   : > { %v3660_v54 = vadd.f32 %v3659_v25, %v3658_v35 }
 0x41e   : > { %v3606_v43 = vadd.f32 %v3605_v37, %v3604_v32 }
 0x41f   : > { %v3661_v33 = vrot.slane %v3660_v54, 1 }
 0x420   : > { %v3607_v6 = vadd.f32 %v3606_v43, %v3569_v13 }
 0x421   : > { %v3662_v50 = vadd.f32 %v3661_v33, %v3660_v54 }
 0x422   : > { %3608 = vst.msk [vmem:[%s5572_s0] sm:$0x1] %vm1957_vm8, %v3607_v6 }
 0x423   : > { %v3663_v10 = vadd.f32 %v3662_v50, %v3609_v3 }
 0x425   : > { %3664 = vst.msk [vmem:[%s5572_s0 + $0x1] sm:$0x1] %vm1957_vm8, %v3663_v10 }
 0x426   : > { %4699 = shalt.err (!%p4696_p11)
}
 0x427   : > { %s4700_s0 = scalar_lea.hbm %s6085_s26, 32  ;;  %s4704_s13 = scalar_lea.hbm %s6147_s5, 64 }
 0x428   : > { %p4701_p12 = scmp.ne.s32.totalorder %s6085_s26, %s4700_s0  ;;  %p4705_p1 = scmp.lt.u32.totalorder %s6085_s26, %s6147_s5 }
 0x429   : > { %p4706_p2 = scmp.lt.u32.totalorder %s4704_s13, %s4700_s0  ;;  %p4708_p5 = scmp.lt.u32.totalorder %s4700_s0, %s6085_s26 }
 0x42a   : > { %p4702_p13 = pnand %p4701_p12, %p4868_p3 }
 0x42b   : > { %p4707_p4 = por %p4706_p2, %p4705_p1 }
 0x42c   : > { %p4703_p0 = pneg %p4702_p13 }
 0x42d   : > { %p4709_p6 = por %p4708_p5, %p4707_p4 }
 0x42f   : > { %p4710_p7 = pnand %p4709_p6, %p4703_p0 }
 0x431   : > { %4713 = shalt.err (!%p4710_p7)
}
 0x432   : > { %4587 = dma.vmem_to_hbm [thread:$0]  (%p4868_p3), %s6087_s10, 32, %s6085_s26, %s3676_s16  }
 0x433 PF: > { %p4593_p8 = scmp.ge.s32.totalorder %s4780_s25, 2  ;;  %s3718_s17 = sand.u32 1, %s4752_s18  }
 0x434   : > { %s3719_s7 = scalar_lea.sflag [#allocation4], %s3718_s17 }
 0x435   : > { %p4590_p10 = pnand %p4593_p8, %p4878_p9 }
 0x437   : > { %4747 = dma.done.wait (!%p4590_p10), %s3719_s7, 32  }
 0x438   : > { %4749 = vsyncadd (!%p4590_p10), %s3719_s7, 4294967264  ;;  %s19_s25 = sadd.s32 1, %s4780_s25   ;;  %s6297_s18 = smov %s4756_s19 }
 0x439   : > { %p16_p11 = scmp.ge.s32.totalorder %s19_s25, 6   ;;  %s6298_s19 = smov %s4760_s20 }
 0x43a   : > { %s6299_s20 = smov %s4886_s9  ;;  %s6300_s21 = smov %s4772_s23 }
 0x43b   : > { %s6301_s22 = smov %s4776_s24  ;;  %s6302_s23 = smov %s6305_s28 }
 0x43c   : > { %s6303_s24 = smov %s6309_s29  ;;  %18 = sbr.rel (!%p16_p11) target bundleno = 7 (0x7), region = 109 }
 0x443   :  { %3724 = vsyncpa [#allocation4], 1 }
 0x444   :  { %3726 = vsyncpa [#allocation4 + $0x1], 1 }

</bundles_post_ra>
